<compile_context>
chip_gen: v7x
topology: tpu7x:2x2x1
jax: 0.10.0
libtpu: 0.0.40
codegen_flags: <defaults>
</compile_context>

<pallas_src>
import jax
import jax.numpy as jnp
from jax import lax
from jax.experimental import pallas as pl
from jax.experimental.pallas import tpu as pltpu


def _round_up(x, m):
    return (x + m - 1) // m * m


def _pick_tm(m, cap, align=16):
    """Row-tile size: multiple of `align` (bf16 sublane packing), capped, and
    split so the grid has >= 2 steps when possible (v7x megacore)."""
    tm = min(cap, _round_up(m, align))
    if tm >= m and m > align:
        tm = _round_up((m + 1) // 2, align)
    return max(tm, align)


_COMPILER_PARAMS = pltpu.CompilerParams(
    dimension_semantics=("parallel",),
    vmem_limit_bytes=32 * 1024 * 1024,
)


# ----------------------------------------------------------------------------
# Pallas kernels
# ----------------------------------------------------------------------------
def conv_bn_relu_pool_kernel(a_ref, w_ref, b_ref, o_ref):
    """Fused Conv(im2col GEMM) + folded-BN + ReLU + 2x2/stride-2 MaxPool.

    a_ref : (TM, K)       bf16  4x4-window patches; one row per pooled output
                                position (n, h2, w2); K = 16 * Cin.
    w_ref : (K, 4*Cout)   bf16  BN-scale-folded weight replicated into the 4
                                pooling-phase column groups (zero rows for taps
                                outside a phase's 3x3 window).
    b_ref : (1, Cout)     f32   folded BN bias (shared by all phases, so it is
                                applied once, AFTER the max).
    o_ref : (TM, Cout)    bf16  pooled activation tile.
    """
    d = jnp.dot(a_ref[...], w_ref[...], preferred_element_type=jnp.float32)
    c = o_ref.shape[-1]
    pooled = jnp.maximum(jnp.maximum(d[:, 0 * c:1 * c], d[:, 1 * c:2 * c]),
                         jnp.maximum(d[:, 2 * c:3 * c], d[:, 3 * c:4 * c]))
    o_ref[...] = jnp.maximum(pooled + b_ref[...], 0.0).astype(o_ref.dtype)


def fc3_fused_kernel(x_ref, w1_ref, b1_ref, w2_ref, b2_ref, w3_ref, b3_ref,
                     o_ref, h1_s):
    """fc1 -> dropout(eval=identity) -> fc2 -> fc3 fused in one kernel.

    h1 lives in VMEM scratch; h2 is chained in registers; only the (TM, 128)
    logits tile is written to HBM.
    """
    h1 = jnp.dot(x_ref[...], w1_ref[...], preferred_element_type=jnp.float32)
    h1_s[...] = (h1 + b1_ref[...]).astype(h1_s.dtype)
    # TODO(synk): nn.Dropout2d(0.25) is stochastic in train mode; eval-mode
    # identity here.
    h2 = (jnp.dot(h1_s[...], w2_ref[...], preferred_element_type=jnp.float32)
          + b2_ref[...]).astype(jnp.bfloat16)
    out = jnp.dot(h2, w3_ref[...], preferred_element_type=jnp.float32)
    o_ref[...] = (out + b3_ref[...]).astype(o_ref.dtype)


# ----------------------------------------------------------------------------
# Pallas wrappers (M-tiled grids, parallel dimension semantics, no hot-path pad)
# ----------------------------------------------------------------------------
def conv_bn_relu_pool(patches, w_big, bias, *, tm_cap, out_dtype=jnp.bfloat16):
    m, k = patches.shape
    cout = bias.shape[1]
    tm = _pick_tm(m, tm_cap)
    full = lambda i: (0, 0)
    return pl.pallas_call(
        conv_bn_relu_pool_kernel,
        out_shape=jax.ShapeDtypeStruct((m, cout), out_dtype),
        grid=(pl.cdiv(m, tm),),
        in_specs=[pl.BlockSpec((tm, k), lambda i: (i, 0)),
                  pl.BlockSpec((k, 4 * cout), full),
                  pl.BlockSpec((1, cout), full)],
        out_specs=pl.BlockSpec((tm, cout), lambda i: (i, 0)),
        compiler_params=_COMPILER_PARAMS,
    )(patches, w_big, bias)


def fc3_fused(x, w1, b1, w2, b2, w3, b3, *, tm_cap=256):
    m, k = x.shape
    d1, d2, d3 = w1.shape[1], w2.shape[1], w3.shape[1]
    tm = _pick_tm(m, tm_cap)
    full = lambda i: (0, 0)
    return pl.pallas_call(
        fc3_fused_kernel,
        out_shape=jax.ShapeDtypeStruct((m, d3), jnp.float32),
        grid=(pl.cdiv(m, tm),),
        in_specs=[pl.BlockSpec((tm, k), lambda i: (i, 0)),
                  pl.BlockSpec((k, d1), full),
                  pl.BlockSpec((1, d1), full),
                  pl.BlockSpec((d1, d2), full),
                  pl.BlockSpec((1, d2), full),
                  pl.BlockSpec((d2, d3), full),
                  pl.BlockSpec((1, d3), full)],
        out_specs=pl.BlockSpec((tm, d3), lambda i: (i, 0)),
        scratch_shapes=[pltpu.VMEM((tm, d1), jnp.bfloat16)],
        compiler_params=_COMPILER_PARAMS,
    )(x, w1, b1, w2, b2, w3, b3)


# ----------------------------------------------------------------------------
# JAX glue: shared-window patch build (indexing only), weight packing, BN fold
# ----------------------------------------------------------------------------
# TODO(synk): the 4x4-window patch build below is still XLA-side; fully
# in-kernel im2col would need strided in-VMEM gathers of the NHWC activation.
def _conv1_patches(x_pad):
    """(N, 30, 30) bf16 -> (N*196, 16); column a*4+b = x_pad[n, 2*h2+a, 2*w2+b]."""
    n = x_pad.shape[0]
    taps = [x_pad[:, a:a + 28:2, b:b + 28:2] for a in range(4) for b in range(4)]
    return jnp.stack(taps, axis=-1).reshape(n * 196, 16)


def _conv2_patches(y1):
    """(N, 14, 14, 32) bf16 -> (N*36, 512);
    column (a*4+b)*32 + c = y1[n, 2*h2+a, 2*w2+b, c]."""
    n = y1.shape[0]
    taps = [y1[:, a:a + 12:2, b:b + 12:2, :] for a in range(4) for b in range(4)]
    return jnp.stack(taps, axis=3).reshape(n * 36, 16 * 32)


def _pad_cols(v, n):
    v = v.reshape(1, -1)
    return jnp.pad(v, ((0, 0), (0, n - v.shape[1])))


def _pad_2d(w, rows, cols):
    r, c = w.shape
    return jnp.pad(w, ((0, rows - r), (0, cols - c)))


def _pack_conv_weight(w_oihw, conv_b, gamma, beta, mean, var, eps=1e-5):
    """Fold BN scale into the conv weight (f32, before the bf16 cast) and
    expand it over the 4 pooling phases.

    Returns (16*Cin, 4*Cout) bf16 weight and (1, Cout) f32 folded bias.
    Row (a*4+b)*Cin + ci, column g*Cout + co (g = 2p+q) holds
    scale[co] * w[co, ci, a-p, b-q] when (a-p, b-q) is inside the 3x3 kernel.
    """
    cout, cin, _, _ = w_oihw.shape
    scale = gamma / jnp.sqrt(var + eps)                           # (Cout,)
    bias = (conv_b - mean) * scale + beta                         # (Cout,)
    w = w_oihw.astype(jnp.float32) * scale[:, None, None, None]   # fold in f32
    w_hwio = jnp.transpose(w, (2, 3, 1, 0))                       # (3,3,Cin,Cout)
    big = jnp.zeros((4, 4, cin, 4, cout), jnp.float32)            # (a,b,ci,g,co)
    for p in range(2):
        for q in range(2):
            big = big.at[p:p + 3, q:q + 3, :, 2 * p + q, :].set(w_hwio)
    w_big = big.reshape(16 * cin, 4 * cout).astype(jnp.bfloat16)
    return w_big, bias.reshape(1, cout).astype(jnp.float32)


def prepare_params(p):
    """One-time packing: BN folding, pooling-phase expansion, fc transposes,
    flatten-order row permutation of fc1_w, lane padding, bf16 casts."""
    out = {}
    out["c1_w"], out["c1_b"] = _pack_conv_weight(
        p["conv1_w"], p["conv1_b"], p["bn1_gamma"], p["bn1_beta"],
        p["bn1_mean"], p["bn1_var"])                        # (16, 128), (1, 32)
    out["c2_w"], out["c2_b"] = _pack_conv_weight(
        p["conv2_w"], p["conv2_b"], p["bn2_gamma"], p["bn2_beta"],
        p["bn2_mean"], p["bn2_var"])                        # (512, 256), (1, 64)

    # fc1: permute input rows from PyTorch's NCHW flatten order (c*36 + h*6+w)
    # to the (h*6+w)*64 + c order the conv2 kernel output already has, so the
    # hot path needs no transpose/slice between conv2 and fc1.
    w1 = p["fc1_w"].reshape(600, 64, 36)                    # (out, c, s)
    w1 = jnp.transpose(w1, (2, 1, 0)).reshape(36 * 64, 600)  # row = s*64 + c
    out["fc1_w"] = jnp.pad(w1, ((0, 0), (0, 40))).astype(jnp.bfloat16)  # (2304,640)
    out["fc1_b"] = _pad_cols(p["fc1_b"], 640).astype(jnp.float32)
    out["fc2_w"] = _pad_2d(p["fc2_w"].T, 640, 128).astype(jnp.bfloat16)
    out["fc2_b"] = _pad_cols(p["fc2_b"], 128).astype(jnp.float32)
    out["fc3_w"] = _pad_2d(p["fc3_w"].T, 128, 128).astype(jnp.bfloat16)
    out["fc3_b"] = _pad_cols(p["fc3_b"], 128).astype(jnp.float32)
    return out


# ----------------------------------------------------------------------------
# Parameter construction (deterministic, synthetic)
# ----------------------------------------------------------------------------
def make_params(key):
    keys = jax.random.split(key, 16)
    p = {}
    p["conv1_w"] = 0.1 * jax.random.normal(keys[0], (32, 1, 3, 3), jnp.float32)
    p["conv1_b"] = 0.1 * jax.random.normal(keys[1], (32,), jnp.float32)
    p["bn1_gamma"] = 1.0 + 0.05 * jax.random.normal(keys[2], (32,), jnp.float32)
    p["bn1_beta"] = 0.05 * jax.random.normal(keys[3], (32,), jnp.float32)
    p["bn1_mean"] = 0.05 * jax.random.normal(keys[4], (32,), jnp.float32)
    p["bn1_var"] = 1.0 + 0.1 * jnp.abs(jax.random.normal(keys[5], (32,), jnp.float32))

    p["conv2_w"] = 0.05 * jax.random.normal(keys[6], (64, 32, 3, 3), jnp.float32)
    p["conv2_b"] = 0.05 * jax.random.normal(keys[7], (64,), jnp.float32)
    p["bn2_gamma"] = 1.0 + 0.05 * jax.random.normal(keys[8], (64,), jnp.float32)
    p["bn2_beta"] = 0.05 * jax.random.normal(keys[9], (64,), jnp.float32)
    p["bn2_mean"] = 0.05 * jax.random.normal(keys[10], (64,), jnp.float32)
    p["bn2_var"] = 1.0 + 0.1 * jnp.abs(jax.random.normal(keys[11], (64,), jnp.float32))

    p["fc1_w"] = 0.02 * jax.random.normal(keys[12], (600, 64 * 6 * 6), jnp.float32)
    p["fc1_b"] = 0.02 * jax.random.normal(keys[13], (600,), jnp.float32)
    p["fc2_w"] = 0.05 * jax.random.normal(keys[14], (120, 600), jnp.float32)
    p["fc2_b"] = jnp.zeros((120,), jnp.float32)
    p["fc3_w"] = 0.1 * jax.random.normal(keys[15], (10, 120), jnp.float32)
    p["fc3_b"] = jnp.zeros((10,), jnp.float32)
    return p


# ----------------------------------------------------------------------------
# Forward pass (jit'ed; params pre-packed by prepare_params)
# ----------------------------------------------------------------------------
@jax.jit
def fashion_cnn_forward(x_nchw, prm):
    n = x_nchw.shape[0]
    x = x_nchw.reshape(n, 28, 28).astype(jnp.bfloat16)          # Cin = 1
    xp = jnp.pad(x, ((0, 0), (1, 1), (1, 1)))                   # conv1 padding=1

    # layer1: Conv(1->32,k3,p1)+BN+ReLU+MaxPool2  -> rows (n,h2,w2), 32 lanes
    p1 = _conv1_patches(xp)                                      # (N*196, 16)
    y1 = conv_bn_relu_pool(p1, prm["c1_w"], prm["c1_b"], tm_cap=3136)
    y1 = y1.reshape(n, 14, 14, 32)                               # free reshape

    # layer2: Conv(32->64,k3)+BN+ReLU+MaxPool2    -> rows (n,h2,w2), 64 lanes
    p2 = _conv2_patches(y1)                                      # (N*36, 512)
    y2 = conv_bn_relu_pool(p2, prm["c2_w"], prm["c2_b"], tm_cap=1152)

    # flatten: free row-major reshape; PyTorch's NCHW flatten order is absorbed
    # into the one-time row permutation of fc1_w.
    flat = y2.reshape(n, 36 * 64)

    logits = fc3_fused(flat, prm["fc1_w"], prm["fc1_b"],
                       prm["fc2_w"], prm["fc2_b"],
                       prm["fc3_w"], prm["fc3_b"], tm_cap=256)
    return logits[:, :10]


# ----------------------------------------------------------------------------
# Pure-JAX f32 reference (eval mode) for a tolerance sanity check
# ----------------------------------------------------------------------------
def _bn_eval(y, gamma, beta, mean, var, eps=1e-5):
    inv = gamma / jnp.sqrt(var + eps)
    return ((y - mean[None, :, None, None]) * inv[None, :, None, None]
            + beta[None, :, None, None])


def reference_forward(x_nchw, p):
    dn = ("NCHW", "OIHW", "NCHW")
    y = lax.conv_general_dilated(x_nchw, p["conv1_w"], (1, 1),
                                 ((1, 1), (1, 1)), dimension_numbers=dn)
    y = y + p["conv1_b"][None, :, None, None]
    y = jnp.maximum(_bn_eval(y, p["bn1_gamma"], p["bn1_beta"],
                             p["bn1_mean"], p["bn1_var"]), 0.0)
    y = lax.reduce_window(y, -jnp.inf, lax.max, (1, 1, 2, 2), (1, 1, 2, 2), "VALID")

    y = lax.conv_general_dilated(y, p["conv2_w"], (1, 1),
                                 ((0, 0), (0, 0)), dimension_numbers=dn)
    y = y + p["conv2_b"][None, :, None, None]
    y = jnp.maximum(_bn_eval(y, p["bn2_gamma"], p["bn2_beta"],
                             p["bn2_mean"], p["bn2_var"]), 0.0)
    y = lax.reduce_window(y, -jnp.inf, lax.max, (1, 1, 2, 2), (1, 1, 2, 2), "VALID")

    flat = y.reshape(y.shape[0], -1)                   # NCHW flatten (out.view)
    h1 = flat @ p["fc1_w"].T + p["fc1_b"]              # dropout: eval identity
    h2 = h1 @ p["fc2_w"].T + p["fc2_b"]
    return h2 @ p["fc3_w"].T + p["fc3_b"]


# ----------------------------------------------------------------------------
if __name__ == "__main__":
    key = jax.random.PRNGKey(0)
    k_x, k_p = jax.random.split(key)
    # The module's fc1 (64*6*6 features) implies 28x28 single-channel inputs.
    x = jax.random.normal(k_x, (2, 1, 28, 28), jnp.float32)   # NCHW like PyTorch
    raw_params = make_params(k_p)
    prm = prepare_params(raw_params)                          # one-time packing

    out = fashion_cnn_forward(x, prm)
    out = jax.block_until_ready(out)
    assert out.shape == (2, 10), out.shape
    assert bool(jnp.all(jnp.isfinite(out)))

    # bf16-tolerance sanity check against the pure-JAX f32 reference.
    ref = reference_forward(x, raw_params)
    err = float(jnp.max(jnp.abs(out - ref)))
    tol = 0.05 + 0.05 * float(jnp.max(jnp.abs(ref)))
    assert err < tol, (err, tol)

    print("KERNEL_OK")
</pallas_src>

<mosaic_0001>
module attributes {stable_mosaic.version = 11 : i64} {
  func.func @conv_bn_relu_pool_kernel(%arg0: i32, %arg1: memref<208x16xbf16, #tpu.memory_space<vmem>>, %arg2: memref<16x128xbf16, #tpu.memory_space<vmem>>, %arg3: memref<1x32xf32, #tpu.memory_space<vmem>>, %arg4: memref<208x32xbf16, #tpu.memory_space<vmem>>) attributes {dimension_semantics = [#tpu.dimension_semantics<parallel>], iteration_bounds = array<i64: 2>, scalar_prefetch = 0 : i64, scratch_operands = 0 : i64, tpu.core_type = #tpu.core_type<tc>, window_params = [{transform_indices = @transform_0, window_bounds = array<i64: 208, 16>}, {pipeline_mode = #tpu.pipeline_mode<synchronous>, transform_indices = @transform_1, window_bounds = array<i64: 16, 128>}, {pipeline_mode = #tpu.pipeline_mode<synchronous>, transform_indices = @transform_2, window_bounds = array<i64: 1, 32>}, {transform_indices = @transform_3, window_bounds = array<i64: 208, 32>}]} {
    %c0 = arith.constant 0 : index
    %c0_0 = arith.constant 0 : index
    %0 = vector.load %arg1[%c0, %c0_0] : memref<208x16xbf16, #tpu.memory_space<vmem>>, vector<208x16xbf16>
    %c0_1 = arith.constant 0 : index
    %c0_2 = arith.constant 0 : index
    %1 = vector.load %arg2[%c0_1, %c0_2] : memref<16x128xbf16, #tpu.memory_space<vmem>>, vector<16x128xbf16>
    %cst = arith.constant dense<0.000000e+00> : vector<208x128xf32>
    %2 = tpu.matmul %0, %1, %cst {dimension_numbers = #tpu.dot_dimension_numbers<[1], [0], [0], [1], [0, 0, 1, 1], [], []>} : vector<208x16xbf16>, vector<16x128xbf16>, vector<208x128xf32> -> vector<208x128xf32>
    %3 = vector.extract_strided_slice %2 {offsets = [0, 0], sizes = [208, 32], strides = [1, 1]} : vector<208x128xf32> to vector<208x32xf32>
    %4 = vector.extract_strided_slice %2 {offsets = [0, 32], sizes = [208, 32], strides = [1, 1]} : vector<208x128xf32> to vector<208x32xf32>
    %5 = arith.maximumf %3, %4 : vector<208x32xf32>
    %6 = vector.extract_strided_slice %2 {offsets = [0, 64], sizes = [208, 32], strides = [1, 1]} : vector<208x128xf32> to vector<208x32xf32>
    %7 = vector.extract_strided_slice %2 {offsets = [0, 96], sizes = [208, 32], strides = [1, 1]} : vector<208x128xf32> to vector<208x32xf32>
    %8 = arith.maximumf %6, %7 : vector<208x32xf32>
    %9 = arith.maximumf %5, %8 : vector<208x32xf32>
    %c0_3 = arith.constant 0 : index
    %c0_4 = arith.constant 0 : index
    %10 = vector.load %arg3[%c0_3, %c0_4] : memref<1x32xf32, #tpu.memory_space<vmem>>, vector<1x32xf32>
    %11 = vector.broadcast %10 : vector<1x32xf32> to vector<208x32xf32>
    %12 = arith.addf %9, %11 : vector<208x32xf32>
    %cst_5 = arith.constant 0.000000e+00 : f32
    %13 = vector.broadcast %cst_5 : f32 to vector<208x32xf32>
    %14 = arith.maximumf %12, %13 : vector<208x32xf32>
    %15 = arith.truncf %14 : vector<208x32xf32> to vector<208x32xbf16>
    %c0_6 = arith.constant 0 : index
    %c0_7 = arith.constant 0 : index
    %16 = vector.load %arg4[%c0_6, %c0_7] : memref<208x32xbf16, #tpu.memory_space<vmem>>, vector<208x32xbf16>
    tpu.vector_store %arg4[%c0_6, %c0_7], %15 {strides = array<i32>} : memref<208x32xbf16, #tpu.memory_space<vmem>>, vector<208x32xbf16>,
    return
  }
  func.func @transform_0(%arg0: i32) -> (i32, i32) {
    %c0_i32 = arith.constant 0 : i32
    %c0_i32_0 = arith.constant 0 : i32
    return %arg0, %c0_i32 : i32, i32
  }
  func.func @transform_1(%arg0: i32) -> (i32, i32) {
    %c0_i32 = arith.constant 0 : i32
    %c0_i32_0 = arith.constant 0 : i32
    %c0_i32_1 = arith.constant 0 : i32
    return %c0_i32, %c0_i32_0 : i32, i32
  }
  func.func @transform_2(%arg0: i32) -> (i32, i32) {
    %c0_i32 = arith.constant 0 : i32
    %c0_i32_0 = arith.constant 0 : i32
    %c0_i32_1 = arith.constant 0 : i32
    return %c0_i32, %c0_i32_0 : i32, i32
  }
  func.func @transform_3(%arg0: i32) -> (i32, i32) {
    %c0_i32 = arith.constant 0 : i32
    %c0_i32_0 = arith.constant 0 : i32
    return %arg0, %c0_i32 : i32, i32
  }
}

module attributes {stable_mosaic.version = 11 : i64} {
  func.func @conv_bn_relu_pool_kernel(%arg0: i32, %arg1: memref<48x512xbf16, #tpu.memory_space<vmem>>, %arg2: memref<512x256xbf16, #tpu.memory_space<vmem>>, %arg3: memref<1x64xf32, #tpu.memory_space<vmem>>, %arg4: memref<48x64xbf16, #tpu.memory_space<vmem>>) attributes {dimension_semantics = [#tpu.dimension_semantics<parallel>], iteration_bounds = array<i64: 2>, scalar_prefetch = 0 : i64, scratch_operands = 0 : i64, tpu.core_type = #tpu.core_type<tc>, window_params = [{transform_indices = @transform_0, window_bounds = array<i64: 48, 512>}, {pipeline_mode = #tpu.pipeline_mode<synchronous>, transform_indices = @transform_1, window_bounds = array<i64: 512, 256>}, {pipeline_mode = #tpu.pipeline_mode<synchronous>, transform_indices = @transform_2, window_bounds = array<i64: 1, 64>}, {transform_indices = @transform_3, window_bounds = array<i64: 48, 64>}]} {
    %c0 = arith.constant 0 : index
    %c0_0 = arith.constant 0 : index
    %0 = vector.load %arg1[%c0, %c0_0] : memref<48x512xbf16, #tpu.memory_space<vmem>>, vector<48x512xbf16>
    %c0_1 = arith.constant 0 : index
    %c0_2 = arith.constant 0 : index
    %1 = vector.load %arg2[%c0_1, %c0_2] : memref<512x256xbf16, #tpu.memory_space<vmem>>, vector<512x256xbf16>
    %cst = arith.constant dense<0.000000e+00> : vector<48x256xf32>
    %2 = tpu.matmul %0, %1, %cst {dimension_numbers = #tpu.dot_dimension_numbers<[1], [0], [0], [1], [0, 0, 1, 1], [], []>} : vector<48x512xbf16>, vector<512x256xbf16>, vector<48x256xf32> -> vector<48x256xf32>
    %3 = vector.extract_strided_slice %2 {offsets = [0, 0], sizes = [48, 64], strides = [1, 1]} : vector<48x256xf32> to vector<48x64xf32>
    %4 = vector.extract_strided_slice %2 {offsets = [0, 64], sizes = [48, 64], strides = [1, 1]} : vector<48x256xf32> to vector<48x64xf32>
    %5 = arith.maximumf %3, %4 : vector<48x64xf32>
    %6 = vector.extract_strided_slice %2 {offsets = [0, 128], sizes = [48, 64], strides = [1, 1]} : vector<48x256xf32> to vector<48x64xf32>
    %7 = vector.extract_strided_slice %2 {offsets = [0, 192], sizes = [48, 64], strides = [1, 1]} : vector<48x256xf32> to vector<48x64xf32>
    %8 = arith.maximumf %6, %7 : vector<48x64xf32>
    %9 = arith.maximumf %5, %8 : vector<48x64xf32>
    %c0_3 = arith.constant 0 : index
    %c0_4 = arith.constant 0 : index
    %10 = vector.load %arg3[%c0_3, %c0_4] : memref<1x64xf32, #tpu.memory_space<vmem>>, vector<1x64xf32>
    %11 = vector.broadcast %10 : vector<1x64xf32> to vector<48x64xf32>
    %12 = arith.addf %9, %11 : vector<48x64xf32>
    %cst_5 = arith.constant 0.000000e+00 : f32
    %13 = vector.broadcast %cst_5 : f32 to vector<48x64xf32>
    %14 = arith.maximumf %12, %13 : vector<48x64xf32>
    %15 = arith.truncf %14 : vector<48x64xf32> to vector<48x64xbf16>
    %c0_6 = arith.constant 0 : index
    %c0_7 = arith.constant 0 : index
    %16 = vector.load %arg4[%c0_6, %c0_7] : memref<48x64xbf16, #tpu.memory_space<vmem>>, vector<48x64xbf16>
    tpu.vector_store %arg4[%c0_6, %c0_7], %15 {strides = array<i32>} : memref<48x64xbf16, #tpu.memory_space<vmem>>, vector<48x64xbf16>,
    return
  }
  func.func @transform_0(%arg0: i32) -> (i32, i32) {
    %c0_i32 = arith.constant 0 : i32
    %c0_i32_0 = arith.constant 0 : i32
    return %arg0, %c0_i32 : i32, i32
  }
  func.func @transform_1(%arg0: i32) -> (i32, i32) {
    %c0_i32 = arith.constant 0 : i32
    %c0_i32_0 = arith.constant 0 : i32
    %c0_i32_1 = arith.constant 0 : i32
    return %c0_i32, %c0_i32_0 : i32, i32
  }
  func.func @transform_2(%arg0: i32) -> (i32, i32) {
    %c0_i32 = arith.constant 0 : i32
    %c0_i32_0 = arith.constant 0 : i32
    %c0_i32_1 = arith.constant 0 : i32
    return %c0_i32, %c0_i32_0 : i32, i32
  }
  func.func @transform_3(%arg0: i32) -> (i32, i32) {
    %c0_i32 = arith.constant 0 : i32
    %c0_i32_0 = arith.constant 0 : i32
    return %arg0, %c0_i32 : i32, i32
  }
}

module attributes {stable_mosaic.version = 11 : i64} {
  func.func @fc3_fused_kernel(%arg0: i32, %arg1: memref<16x2304xbf16, #tpu.memory_space<vmem>>, %arg2: memref<2304x640xbf16, #tpu.memory_space<vmem>>, %arg3: memref<1x640xf32, #tpu.memory_space<vmem>>, %arg4: memref<640x128xbf16, #tpu.memory_space<vmem>>, %arg5: memref<1x128xf32, #tpu.memory_space<vmem>>, %arg6: memref<128x128xbf16, #tpu.memory_space<vmem>>, %arg7: memref<1x128xf32, #tpu.memory_space<vmem>>, %arg8: memref<16x128xf32, #tpu.memory_space<vmem>>, %arg9: memref<16x640xbf16, #tpu.memory_space<vmem>>) attributes {dimension_semantics = [#tpu.dimension_semantics<parallel>], iteration_bounds = array<i64: 1>, scalar_prefetch = 0 : i64, scratch_operands = 1 : i64, tpu.core_type = #tpu.core_type<tc>, window_params = [{transform_indices = @transform_0, window_bounds = array<i64: 16, 2304>}, {pipeline_mode = #tpu.pipeline_mode<synchronous>, transform_indices = @transform_1, window_bounds = array<i64: 2304, 640>}, {pipeline_mode = #tpu.pipeline_mode<synchronous>, transform_indices = @transform_2, window_bounds = array<i64: 1, 640>}, {pipeline_mode = #tpu.pipeline_mode<synchronous>, transform_indices = @transform_3, window_bounds = array<i64: 640, 128>}, {pipeline_mode = #tpu.pipeline_mode<synchronous>, transform_indices = @transform_4, window_bounds = array<i64: 1, 128>}, {pipeline_mode = #tpu.pipeline_mode<synchronous>, transform_indices = @transform_5, window_bounds = array<i64: 128, 128>}, {pipeline_mode = #tpu.pipeline_mode<synchronous>, transform_indices = @transform_6, window_bounds = array<i64: 1, 128>}, {transform_indices = @transform_7, window_bounds = array<i64: 16, 128>}]} {
    %c0 = arith.constant 0 : index
    %c0_0 = arith.constant 0 : index
    %0 = vector.load %arg1[%c0, %c0_0] : memref<16x2304xbf16, #tpu.memory_space<vmem>>, vector<16x2304xbf16>
    %c0_1 = arith.constant 0 : index
    %c0_2 = arith.constant 0 : index
    %1 = vector.load %arg2[%c0_1, %c0_2] : memref<2304x640xbf16, #tpu.memory_space<vmem>>, vector<2304x640xbf16>
    %cst = arith.constant dense<0.000000e+00> : vector<16x640xf32>
    %2 = tpu.matmul %0, %1, %cst {dimension_numbers = #tpu.dot_dimension_numbers<[1], [0], [0], [1], [0, 0, 1, 1], [], []>} : vector<16x2304xbf16>, vector<2304x640xbf16>, vector<16x640xf32> -> vector<16x640xf32>
    %c0_3 = arith.constant 0 : index
    %c0_4 = arith.constant 0 : index
    %3 = vector.load %arg3[%c0_3, %c0_4] : memref<1x640xf32, #tpu.memory_space<vmem>>, vector<1x640xf32>
    %4 = vector.broadcast %3 : vector<1x640xf32> to vector<16x640xf32>
    %5 = arith.addf %2, %4 : vector<16x640xf32>
    %6 = arith.truncf %5 : vector<16x640xf32> to vector<16x640xbf16>
    %c0_5 = arith.constant 0 : index
    %c0_6 = arith.constant 0 : index
    %7 = vector.load %arg9[%c0_5, %c0_6] : memref<16x640xbf16, #tpu.memory_space<vmem>>, vector<16x640xbf16>
    tpu.vector_store %arg9[%c0_5, %c0_6], %6 {strides = array<i32>} : memref<16x640xbf16, #tpu.memory_space<vmem>>, vector<16x640xbf16>,
    %c0_7 = arith.constant 0 : index
    %c0_8 = arith.constant 0 : index
    %8 = vector.load %arg9[%c0_7, %c0_8] : memref<16x640xbf16, #tpu.memory_space<vmem>>, vector<16x640xbf16>
    %c0_9 = arith.constant 0 : index
    %c0_10 = arith.constant 0 : index
    %9 = vector.load %arg4[%c0_9, %c0_10] : memref<640x128xbf16, #tpu.memory_space<vmem>>, vector<640x128xbf16>
    %cst_11 = arith.constant dense<0.000000e+00> : vector<16x128xf32>
    %10 = tpu.matmul %8, %9, %cst_11 {dimension_numbers = #tpu.dot_dimension_numbers<[1], [0], [0], [1], [0, 0, 1, 1], [], []>} : vector<16x640xbf16>, vector<640x128xbf16>, vector<16x128xf32> -> vector<16x128xf32>
    %c0_12 = arith.constant 0 : index
    %c0_13 = arith.constant 0 : index
    %11 = vector.load %arg5[%c0_12, %c0_13] : memref<1x128xf32, #tpu.memory_space<vmem>>, vector<1x128xf32>
    %12 = vector.broadcast %11 : vector<1x128xf32> to vector<16x128xf32>
    %13 = arith.addf %10, %12 : vector<16x128xf32>
    %14 = arith.truncf %13 : vector<16x128xf32> to vector<16x128xbf16>
    %c0_14 = arith.constant 0 : index
    %c0_15 = arith.constant 0 : index
    %15 = vector.load %arg6[%c0_14, %c0_15] : memref<128x128xbf16, #tpu.memory_space<vmem>>, vector<128x128xbf16>
    %cst_16 = arith.constant dense<0.000000e+00> : vector<16x128xf32>
    %16 = tpu.matmul %14, %15, %cst_16 {dimension_numbers = #tpu.dot_dimension_numbers<[1], [0], [0], [1], [0, 0, 1, 1], [], []>} : vector<16x128xbf16>, vector<128x128xbf16>, vector<16x128xf32> -> vector<16x128xf32>
    %c0_17 = arith.constant 0 : index
    %c0_18 = arith.constant 0 : index
    %17 = vector.load %arg7[%c0_17, %c0_18] : memref<1x128xf32, #tpu.memory_space<vmem>>, vector<1x128xf32>
    %18 = vector.broadcast %17 : vector<1x128xf32> to vector<16x128xf32>
    %19 = arith.addf %16, %18 : vector<16x128xf32>
    %c0_19 = arith.constant 0 : index
    %c0_20 = arith.constant 0 : index
    %20 = vector.load %arg8[%c0_19, %c0_20] : memref<16x128xf32, #tpu.memory_space<vmem>>, vector<16x128xf32>
    tpu.vector_store %arg8[%c0_19, %c0_20], %19 {strides = array<i32>} : memref<16x128xf32, #tpu.memory_space<vmem>>, vector<16x128xf32>,
    return
  }
  func.func @transform_0(%arg0: i32) -> (i32, i32) {
    %c0_i32 = arith.constant 0 : i32
    %c0_i32_0 = arith.constant 0 : i32
    return %arg0, %c0_i32 : i32, i32
  }
  func.func @transform_1(%arg0: i32) -> (i32, i32) {
    %c0_i32 = arith.constant 0 : i32
    %c0_i32_0 = arith.constant 0 : i32
    %c0_i32_1 = arith.constant 0 : i32
    return %c0_i32, %c0_i32_0 : i32, i32
  }
  func.func @transform_2(%arg0: i32) -> (i32, i32) {
    %c0_i32 = arith.constant 0 : i32
    %c0_i32_0 = arith.constant 0 : i32
    %c0_i32_1 = arith.constant 0 : i32
    return %c0_i32, %c0_i32_0 : i32, i32
  }
  func.func @transform_3(%arg0: i32) -> (i32, i32) {
    %c0_i32 = arith.constant 0 : i32
    %c0_i32_0 = arith.constant 0 : i32
    %c0_i32_1 = arith.constant 0 : i32
    return %c0_i32, %c0_i32_0 : i32, i32
  }
  func.func @transform_4(%arg0: i32) -> (i32, i32) {
    %c0_i32 = arith.constant 0 : i32
    %c0_i32_0 = arith.constant 0 : i32
    %c0_i32_1 = arith.constant 0 : i32
    return %c0_i32, %c0_i32_0 : i32, i32
  }
  func.func @transform_5(%arg0: i32) -> (i32, i32) {
    %c0_i32 = arith.constant 0 : i32
    %c0_i32_0 = arith.constant 0 : i32
    %c0_i32_1 = arith.constant 0 : i32
    return %c0_i32, %c0_i32_0 : i32, i32
  }
  func.func @transform_6(%arg0: i32) -> (i32, i32) {
    %c0_i32 = arith.constant 0 : i32
    %c0_i32_0 = arith.constant 0 : i32
    %c0_i32_1 = arith.constant 0 : i32
    return %c0_i32, %c0_i32_0 : i32, i32
  }
  func.func @transform_7(%arg0: i32) -> (i32, i32) {
    %c0_i32 = arith.constant 0 : i32
    %c0_i32_0 = arith.constant 0 : i32
    return %arg0, %c0_i32 : i32, i32
  }
}

</mosaic_0001>

<bundles_post_ra>
// kernel: fashion_cnn_forward.3
= control target key start
LH: loop header
LB: loop body
LE: loop exit
PB: predicated region body
PF: predicated region fallthrough
CT: control target
= control target key end

     0   :  { %8 = vsyncpa [#allocation3], 0  ;;  %s2384_s0 = inlined_call_operand.vmem [shape: bf16[392,16], index: 0, kind: input, shape index: {}]   ;;  %s2385_s1 = inlined_call_operand.hbm [shape: bf16[16,128], index: 1, kind: input, shape index: {}]   ;;  %s2386_s2 = inlined_call_operand.hbm [shape: f32[1,32], index: 2, kind: input, shape index: {}]   ;;  %s2387_s3 = inlined_call_operand.vmem [shape: bf16[392,32], index: 3, kind: output, shape index: {}]  }
   0x1   :  { %9 = vsyncpa [#allocation5], 0  ;;  %s1772_s12 = smov 0   ;;  %s1774_s13 = smov 0  }
   0x2   :  { %s1776_s14 = smov 0  }
   0x3 LB: > { %s1785_s15 = sadd.s32 4294967295, %s1710_s14   ;;  %s1787_s16 = sadd.s32 1, %s1710_s14   ;;  %s1710_s14 = sphi %s1776_s14, %s2404_s14   ;;  %s1706_s13 = sphi %s1774_s13, %s2403_s13   ;;  %s1702_s12 = sphi %s1772_s12, %s2402_s12  }
   0x4   : > { %s87_s17 = ssub.s32 %s1710_s14, %s1787_s16  ;;  %s90_s18 = sadd.s32 1, %s1706_s13 }
   0x5   : > { %p88_p0 = scmp.eq.s32.totalorder %s87_s17, 0  ;;  %p100_p1 = scmp.ne.s32.totalorder %s1706_s13, %s1702_s12 }
   0x6   : > { %p101_p2 = scmp.eq.s32.totalorder %s1785_s15, 1  ;;  %p1286_p3 = scmp.ge.s32.totalorder %s1710_s14, 1 }
   0x7   : > { %s1795_s19 = scalar_select %p88_p0, %s1706_s13, %s90_s18  }
   0x8   : > { %p1797_p4 = por %p101_p2, %p100_p1  ;;  %p114_p5 = scmp.lt.s32.totalorder %s1710_s14, 3 }
   0x9   : > { %p2388_p6 = scmp.eq.s32.totalorder %s1785_s15, 0  ;;  %s1744_s22 = smov [#allocation2]  }
   0xa   : > { %s2390_s20 = scalar_select %p1797_p4, 1, 0 }
   0xb   : > { %p1802_p7 = pnand %p1286_p3, %p114_p5  ;;  %s126_s23 = sshll.u32 %s1744_s22, 4  ;;  %s127_s23 = int_to_ptr.vmem [resolvable:$true] %s126_s23 }
   0xc   : > { %s1745_s25 = smov [#allocation4]   ;;  %s1592_s29 = scalar_lea.hbm %s2385_s1, 128 }
   0xd   : > { %s2391_s21 = scalar_select %p1802_p7, 1, 0 }
   0xe   : > { %p1466_p8 = pneg %p1802_p7  ;;  %s140_s26 = sshll.u32 %s1745_s25, 4  ;;  %s1814_s26 = int_to_ptr.vmem [resolvable:$true] %s140_s26 }
   0xf   : > { %p1593_p10 = scmp.ne.s32.totalorder %s2385_s1, %s1592_s29  ;;  %p1599_p0 = scmp.lt.u32.totalorder %s1592_s29, %s2385_s1 }
  0x10   : > { %p1810_p9 = pnand %p2388_p6, %p1466_p8 }
  0x12   : > { %p1594_p11 = pneg %p1810_p9 }
  0x14   : > { %p1595_p12 = pnand %p1594_p11, %p1593_p10 }
  0x16   : > { %p1596_p13 = pneg %p1595_p12 }
  0x18   : > { %p1601_p1 = pnand %p1599_p0, %p1596_p13 }
  0x1a   : > { %1604 = shalt.err (!%p1601_p1)
}
  0x1b   : > { %s1605_s7 = scalar_lea.vmem %s127_s23, 128  ;;  %p1613_p8 = scmp.lt.s32.totalorder %s127_s23, %s127_s23 }
  0x1c   : > { %p1606_p2 = scmp.ne.s32.totalorder %s127_s23, %s1605_s7  ;;  %p1614_p6 = scmp.lt.s32.totalorder %s1605_s7, %s1605_s7 }
  0x1e   : > { %p1608_p3 = pnand %p1606_p2, %p1594_p11  ;;  %p1615_p4 = por %p1614_p6, %p1613_p8 }
  0x20   : > { %p1609_p5 = pneg %p1608_p3 }
  0x22   : > { %p1616_p7 = pnand %p1615_p4, %p1609_p5 }
  0x24   : > { %1619 = shalt.err (!%p1616_p7)
}
  0x25   : > { %s1746_s8 = smov 64   ;;  %s1747_s9 = smov 4  }
  0x26   : > { %1469 = dma.hbm_to_vmem [thread:$0]  (!%p1810_p9), %s2385_s1, 128, %s127_s23, [#allocation3], %s1746_s8, %s1746_s8, %s1747_s9  }
  0x27   : > { %s1620_s18 = scalar_lea.hbm %s2386_s2, 16 }
  0x28   : > { %p1621_p10 = scmp.ne.s32.totalorder %s2386_s2, %s1620_s18  ;;  %p1627_p7 = scmp.lt.u32.totalorder %s1620_s18, %s2386_s2 }
  0x2a   : > { %p1623_p4 = pnand %p1621_p10, %p1594_p11 }
  0x2c   : > { %p1624_p6 = pneg %p1623_p4 }
  0x2e   : > { %p1629_p12 = pnand %p1627_p7, %p1624_p6 }
  0x30   : > { %1632 = shalt.err (!%p1629_p12)
}
  0x31   : > { %s1633_s23 = scalar_lea.vmem %s1814_s26, 16  ;;  %s1640_s29 = scalar_lea.vmem %s1814_s26, 32 }
  0x32   : > { %p1634_p13 = scmp.ne.s32.totalorder %s1814_s26, %s1633_s23  ;;  %p1641_p2 = scmp.lt.s32.totalorder %s1814_s26, %s1814_s26 }
  0x33   : > { %p1642_p3 = scmp.lt.s32.totalorder %s1640_s29, %s1633_s23 }
  0x34   : > { %p1636_p0 = pnand %p1634_p13, %p1594_p11 }
  0x35   : > { %p1643_p5 = por %p1642_p3, %p1641_p2 }
  0x36   : > { %p1637_p1 = pneg %p1636_p0 }
  0x38   : > { %p1644_p8 = pnand %p1643_p5, %p1637_p1 }
  0x3a   : > { %1647 = shalt.err (!%p1644_p8)
}
  0x3b   : > { %1472 = dma.hbm_to_vmem [thread:$0]  (!%p1810_p9), %s2386_s2, 16, %s1814_s26, [#allocation5]  }
  0x3c   : > { %p2393_p10 = scmp.ne.s32.totalorder %s2391_s21, 0 }
  0x3d   : > { %p2394_p11 = scmp.eq.s32.totalorder (!%p2393_p10), %s1785_s15, 0 }
  0x3e   : > { %170 = sbr.rel (%p2393_p10) target bundleno = 671 (0x29f), region = 32 }
  0x45   : > { %1693 = dma.done.wait (%p2394_p11), [#allocation3], 128   ;;  %p2395_p4 = pmov %p2394_p11 }
  0x47   : > { %1695 = vsyncadd (%p2395_p4), [#allocation3], 4294967168  ;;  %p2396_p6 = pmov %p2395_p4 }
  0x48   : > { %p2397_p7 = pmov %p2395_p4 }
  0x49   : > { %1697 = dma.done.wait (%p2396_p6), [#allocation5], 16  }
  0x4a   : > { %1699 = vsyncadd (%p2397_p7), [#allocation5], 4294967280  ;;  %s1875_s24 = smul.u32 26, %s1785_s15  ;;  %v1748_v0 = vmov 0.0   ;;  %vm1749_vm0 = vmmov 0   ;;  %v1574_v1 = vld [vmem:[#allocation2] sm:$0xff]  }
  0x4b   : > { %1401 = vmatprep.subr.bf16.mxu0 %v1748_v0  ;;  %1455 = vmatprep.subr.bf16.mxu1 %v1748_v0  ;;  %vm320_vm1 = vcmask 130048   ;;  %s1750_s8 = smov 96   ;;  %s1751_s9 = smov 64   ;;  %vm920_vm2 = vcmask 257024  }
  0x4c   : > { %1403 = vmatprep.mubr.msk.bf16.mxu0 %vm1749_vm0, %v1748_v0  ;;  %1431 = vmatprep.mubr.msk.bf16.mxu1 %vm1749_vm0, %v1748_v0  ;;  %p206_p9 = scmp.lt.s32.totalorder %s1875_s24, 48  ;;  %s198_s10 = sand.u32 1, %s1702_s12  }
  0x4d   : > { %1402 = vmatpush3.bf16.msra.mxu0 %v1574_v1  ;;  %1456 = vmatpush3.bf16.msra.mxu1 %v1574_v1  ;;  %s1457_s11 = smul.u32 104, %s198_s10  ;;  %p2398_p12 = scmp.ne.s32.totalorder %s2390_s20, 0 }
  0x4e   : > { %s207_s21 = scalar_select %p206_p9, %s1875_s24, 48 }
  0x4f   : > { %s2164_s14 = scalar_lea.vmem [#allocation6], %s1457_s11   ;;  %s955_s12 = ssub.s32 (%p2398_p12), 49, %s1875_s24 }
  0x50   : > { %s1293_s26 = sshll.u32 %s207_s21, 2  ;;  %s1386_s17 = smul.u32 (%p2398_p12), 104, %s1785_s15 }
  0x51   : > { %s1884_s7 = scalar_lea.vmem %s2384_s0, %s1293_s26  ;;  %p956_p13 = scmp.lt.s32.totalorder (%p2398_p12), %s955_s12, 26 }
  0x52   : > { %v1575_v2 = vld [vmem:[%s1884_s7] sm:$0xff]   ;;  %v1576_v3 = vld [vmem:[%s1884_s7 + $0x38] sm:$0xff]   ;;  %v1577_v4 = vld [vmem:[%s1884_s7 + $0x8] sm:$0xff]   ;;  %s2273_s25 = scalar_lea.vmem (%p2398_p12), %s2387_s3, %s1386_s17  }
  0x53   : > { %1404 = vmatmul.mubr.msk.bf16.vlgmr.msra.gmra.mrb[0].mxu0 %vm320_vm1, %v1575_v2  ;;  %1432 = vmatmul.mubr.msk.bf16.vlgmr.msra.gmra.mrb[0].mxu1 %vm320_vm1, %v1576_v3  ;;  %v1578_v5 = vld [vmem:[%s1884_s7 + $0x40] sm:$0xff]   ;;  %v1579_v6 = vld [vmem:[%s1884_s7 + $0x10] sm:$0xff]   ;;  %v1580_v7 = vld [vmem:[%s1884_s7 + $0x48] sm:$0xff]  }
  0x54   : > { %1407 = vmatprep.mubr.msk.bf16.mxu0 %vm1749_vm0, %v1748_v0  ;;  %1435 = vmatprep.mubr.msk.bf16.mxu1 %vm1749_vm0, %v1748_v0  ;;  %v1581_v8 = vld [vmem:[%s1884_s7 + $0x18] sm:$0xff]   ;;  %v1582_v9 = vld [vmem:[%s1884_s7 + $0x50] sm:$0xff]   ;;  %v1583_v10 = vld [vmem:[%s1884_s7 + $0x20] sm:$0xff]  }
  0x55   : > { %v1584_v11 = vld [vmem:[%s1884_s7 + $0x58] sm:$0xff]   ;;  %v1585_v12 = vld [vmem:[%s1884_s7 + $0x28] sm:$0xff]   ;;  %v1587_v13 = vld [vmem:[%s1884_s7 + $0x60] sm:$0xff]  }
  0x56   : > { %v1586_v14 = vld [vmem:[%s1884_s7 + $0x30] sm:$0xff]  }
  0x5b   : > { %1408 = vmatmul.mubr.msk.bf16.gmra.mrb[4].mxu0 %vm320_vm1, %v1577_v4  ;;  %1436 = vmatmul.mubr.msk.bf16.gmra.mrb[4].mxu1 %vm320_vm1, %v1578_v5 }
  0x5c   : > { %1411 = vmatprep.mubr.msk.bf16.mxu0 %vm1749_vm0, %v1748_v0  ;;  %1439 = vmatprep.mubr.msk.bf16.mxu1 %vm1749_vm0, %v1748_v0 }
  0x63   : > { %1412 = vmatmul.mubr.msk.bf16.gmra.mrb[8].mxu0 %vm320_vm1, %v1579_v6  ;;  %1440 = vmatmul.mubr.msk.bf16.gmra.mrb[8].mxu1 %vm320_vm1, %v1580_v7 }
  0x64   : > { %1415 = vmatprep.mubr.msk.bf16.mxu0 %vm1749_vm0, %v1748_v0  ;;  %1443 = vmatprep.mubr.msk.bf16.mxu1 %vm1749_vm0, %v1748_v0 }
  0x6b   : > { %1416 = vmatmul.mubr.msk.bf16.gmra.mrb[12].mxu0 %vm320_vm1, %v1581_v8  ;;  %1444 = vmatmul.mubr.msk.bf16.gmra.mrb[12].mxu1 %vm320_vm1, %v1582_v9 }
  0x6c   : > { %1419 = vmatprep.mubr.msk.bf16.mxu0 %vm1749_vm0, %v1748_v0  ;;  %1447 = vmatprep.mubr.msk.bf16.mxu1 %vm1749_vm0, %v1748_v0 }
  0x73   : > { %1420 = vmatmul.mubr.msk.bf16.gmra.mrb[16].mxu0 %vm320_vm1, %v1583_v10  ;;  %1448 = vmatmul.mubr.msk.bf16.gmra.mrb[16].mxu1 %vm320_vm1, %v1584_v11 }
  0x74   : > { %1423 = vmatprep.mubr.msk.bf16.mxu0 %vm1749_vm0, %v1748_v0  ;;  %1451 = vmatprep.mubr.msk.bf16.mxu1 %vm1749_vm0, %v1748_v0 }
  0x7b   : > { %1424 = vmatmul.mubr.msk.bf16.gmra.mrb[20].mxu0 %vm320_vm1, %v1585_v12  ;;  %1452 = vmatmul.mubr.msk.bf16.gmra.mrb[20].mxu1 %vm320_vm1, %v1587_v13 }
  0x7c   : > { %1427 = vmatprep.mubr.msk.bf16.mxu0 %vm1749_vm0, %v1748_v0 }
  0x83   : > { %1428 = vmatmul.mubr.msk.bf16.gmra.mrb[24].mxu0 %vm320_vm1, %v1586_v14 }
 0x126   : > { %v1923_v15 = vpop.f32.mrb[0].mxu0  ;;  %v1925_v16 = vpop.f32.mrb[0].mxu1 }
 0x127   : > { %v1433_v17 = vpop.f32.mrb[1].mxu1  ;;  %523 = vrot.lane.b32.xlu0 %v1923_v15, %s1750_s8  ;;  %v1405_v18 = vpop.f32.mrb[1].mxu0 }
 0x128   : > { %v1929_v19 = vpop.f32.mrb[2].mxu0  ;;  %v1931_v20 = vpop.f32.mrb[2].mxu1 }
 0x129   : > { %553 = vrot.lane.b32.xlu1 %v1931_v20, %s1750_s8  ;;  %v1406_v21 = vpop.f32.mrb[3].mxu0  ;;  %v1434_v22 = vpop.f32.mrb[3].mxu1 }
 0x12b   : > { %551 = vrot.lane.b32.xlu0 %v1925_v16, %s1750_s8 }
 0x12e   : > { %v1937_v23 = vpop.f32.mrb[4].mxu0  ;;  %v1939_v24 = vpop.f32.mrb[4].mxu1 }
 0x12f   : > { %525 = vrot.lane.b32.xlu0 %v1929_v19, %s1750_s8  ;;  %527 = vrot.lane.b32.xlu1 %v1937_v23, %s1750_s8  ;;  %v1409_v25 = vpop.f32.mrb[5].mxu0  ;;  %v1437_v26 = vpop.f32.mrb[5].mxu1 }
 0x130   : > { %v1945_v27 = vpop.f32.mrb[6].mxu0  ;;  %v1947_v28 = vpop.f32.mrb[6].mxu1 }
 0x131   : > { %v1410_v29 = vpop.f32.mrb[7].mxu0  ;;  %v1438_v30 = vpop.f32.mrb[7].mxu1 }
 0x133   : > { %555 = vrot.lane.b32.xlu0 %v1939_v24, %s1750_s8  ;;  %529 = vrot.lane.b32.xlu1 %v1945_v27, %s1750_s8 }
 0x136   : > { %v1953_v31 = vpop.f32.mrb[8].mxu0  ;;  %v1955_v32 = vpop.f32.mrb[8].mxu1 }
 0x137   : > { %557 = vrot.lane.b32.xlu1 %v1947_v28, %s1750_s8  ;;  %531 = vrot.lane.b32.xlu0 %v1953_v31, %s1750_s8  ;;  %v1413_v33 = vpop.f32.mrb[9].mxu0  ;;  %v1441_v34 = vpop.f32.mrb[9].mxu1 }
 0x138   : > { %v1961_v35 = vpop.f32.mrb[10].mxu0  ;;  %v1963_v36 = vpop.f32.mrb[10].mxu1 }
 0x139   : > { %v1414_v37 = vpop.f32.mrb[11].mxu0  ;;  %v1442_v38 = vpop.f32.mrb[11].mxu1 }
 0x13b   : > { %559 = vrot.lane.b32.xlu0 %v1955_v32, %s1750_s8  ;;  %533 = vrot.lane.b32.xlu1 %v1961_v35, %s1750_s8 }
 0x13e   : > { %v1969_v39 = vpop.f32.mrb[12].mxu0  ;;  %v1971_v40 = vpop.f32.mrb[12].mxu1 }
 0x13f   : > { %561 = vrot.lane.b32.xlu1 %v1963_v36, %s1750_s8  ;;  %535 = vrot.lane.b32.xlu0 %v1969_v39, %s1750_s8  ;;  %v1417_v41 = vpop.f32.mrb[13].mxu0  ;;  %v1445_v42 = vpop.f32.mrb[13].mxu1 }
 0x140   : > { %v1977_v43 = vpop.f32.mrb[14].mxu0  ;;  %v1979_v44 = vpop.f32.mrb[14].mxu1 }
 0x141   : > { %v1418_v45 = vpop.f32.mrb[15].mxu0  ;;  %v1446_v46 = vpop.f32.mrb[15].mxu1 }
 0x143   : > { %563 = vrot.lane.b32.xlu0 %v1971_v40, %s1750_s8  ;;  %537 = vrot.lane.b32.xlu1 %v1977_v43, %s1750_s8 }
 0x146   : > { %v1985_v47 = vpop.f32.mrb[16].mxu0  ;;  %v1987_v48 = vpop.f32.mrb[16].mxu1 }
 0x147   : > { %565 = vrot.lane.b32.xlu1 %v1979_v44, %s1750_s8  ;;  %539 = vrot.lane.b32.xlu0 %v1985_v47, %s1750_s8  ;;  %v1421_v49 = vpop.f32.mrb[17].mxu0  ;;  %v1449_v50 = vpop.f32.mrb[17].mxu1 }
 0x148   : > { %v1993_v51 = vpop.f32.mrb[18].mxu0  ;;  %v1995_v52 = vpop.f32.mrb[18].mxu1 }
 0x149   : > { %v1422_v53 = vpop.f32.mrb[19].mxu0  ;;  %v1450_v54 = vpop.f32.mrb[19].mxu1 }
 0x14b   : > { %567 = vrot.lane.b32.xlu0 %v1987_v48, %s1750_s8  ;;  %541 = vrot.lane.b32.xlu1 %v1993_v51, %s1750_s8 }
 0x14e   : > { %v2001_v55 = vpop.f32.mrb[20].mxu0  ;;  %v2003_v56 = vpop.f32.mrb[20].mxu1 }
 0x14f   : > { %569 = vrot.lane.b32.xlu1 %v1995_v52, %s1750_s8  ;;  %543 = vrot.lane.b32.xlu0 %v2001_v55, %s1750_s8  ;;  %v1425_v57 = vpop.f32.mrb[21].mxu0  ;;  %v1453_v58 = vpop.f32.mrb[21].mxu1 }
 0x150   : > { %v2009_v59 = vpop.f32.mrb[22].mxu0  ;;  %v2011_v60 = vpop.f32.mrb[22].mxu1 }
 0x151   : > { %v1426_v61 = vpop.f32.mrb[23].mxu0  ;;  %v1454_v62 = vpop.f32.mrb[23].mxu1 }
 0x153   : > { %545 = vrot.lane.b32.xlu1 %v2009_v59, %s1750_s8 }
 0x156   : > { %v2015_v63 = vpop.f32.mrb[24].mxu0 }
 0x157   : > { %547 = vrot.lane.b32.xlu0 %v2015_v63, %s1750_s8  ;;  %v1429_v0 = vpop.f32.mrb[25].mxu0 }
 0x158   : > { %v2019_v1 = vpop.f32.mrb[26].mxu0 }
 0x159   : > { %549 = vrot.lane.b32.xlu1 %v2019_v1, %s1750_s8  ;;  %v1430_v2 = vpop.f32.mrb[27].mxu0 }
 0x15b   : > { %571 = vrot.lane.b32.xlu0 %v2003_v56, %s1750_s8 }
 0x15d   : > { %573 = vrot.lane.b32.xlu1 %v2011_v60, %s1750_s8 }
 0x199   : > { %v524_v3 = vpop.permute.xlu0 %523 }
 0x19a   : > { %v2028_v4 = vmax.f32 %v1923_v15, %v524_v3 }
 0x19b   : > { %v554_v5 = vpop.permute.xlu1 %553 }
 0x19c   : > { %653 = vrot.lane.b32.xlu0 %v2028_v4, %s1751_s9  ;;  %v2048_v14 = vmax.f32 %v1931_v20, %v554_v5 }
 0x19d   : > { %v552_v6 = vpop.permute.xlu0 %551 }
 0x19e   : > { %v2033_v7 = vmax.f32 %v1925_v16, %v552_v6 }
 0x1a0   : > { %681 = vrot.lane.b32.xlu0 %v2033_v7, %s1751_s9 }
 0x1a1   : > { %v526_v8 = vpop.permute.xlu0 %525  ;;  %v528_v9 = vpop.permute.xlu1 %527 }
 0x1a2   : > { %v2038_v10 = vmax.f32 %v1929_v19, %v526_v8  ;;  %v2041_v11 = vmax.f32 %v1937_v23, %v528_v9 }
 0x1a4   : > { %657 = vrot.lane.b32.xlu0 %v2041_v11, %s1751_s9  ;;  %655 = vrot.lane.b32.xlu1 %v2038_v10, %s1751_s9 }
 0x1a5   : > { %v556_v12 = vpop.permute.xlu0 %555  ;;  %v530_v13 = vpop.permute.xlu1 %529 }
 0x1a6   : > { %v2051_v15 = vmax.f32 %v1939_v24, %v556_v12  ;;  %v2058_v18 = vmax.f32 %v1945_v27, %v530_v13 }
 0x1a8   : > { %685 = vrot.lane.b32.xlu0 %v2051_v15, %s1751_s9  ;;  %683 = vrot.lane.b32.xlu1 %v2048_v14, %s1751_s9 }
 0x1a9   : > { %v558_v16 = vpop.permute.xlu1 %557  ;;  %v532_v17 = vpop.permute.xlu0 %531 }
 0x1aa   : > { %v2061_v19 = vmax.f32 %v1953_v31, %v532_v17  ;;  %v2068_v22 = vmax.f32 %v1947_v28, %v558_v16 }
 0x1ac   : > { %661 = vrot.lane.b32.xlu0 %v2061_v19, %s1751_s9  ;;  %659 = vrot.lane.b32.xlu1 %v2058_v18, %s1751_s9 }
 0x1ad   : > { %v560_v20 = vpop.permute.xlu0 %559  ;;  %v534_v21 = vpop.permute.xlu1 %533 }
 0x1ae   : > { %v2071_v23 = vmax.f32 %v1955_v32, %v560_v20  ;;  %v2078_v26 = vmax.f32 %v1961_v35, %v534_v21 }
 0x1b0   : > { %689 = vrot.lane.b32.xlu0 %v2071_v23, %s1751_s9  ;;  %687 = vrot.lane.b32.xlu1 %v2068_v22, %s1751_s9 }
 0x1b1   : > { %v562_v24 = vpop.permute.xlu1 %561  ;;  %v536_v25 = vpop.permute.xlu0 %535 }
 0x1b2   : > { %v2081_v27 = vmax.f32 %v1969_v39, %v536_v25  ;;  %v2088_v30 = vmax.f32 %v1963_v36, %v562_v24 }
 0x1b4   : > { %665 = vrot.lane.b32.xlu0 %v2081_v27, %s1751_s9  ;;  %663 = vrot.lane.b32.xlu1 %v2078_v26, %s1751_s9 }
 0x1b5   : > { %v564_v28 = vpop.permute.xlu0 %563  ;;  %v538_v29 = vpop.permute.xlu1 %537 }
 0x1b6   : > { %v2091_v31 = vmax.f32 %v1971_v40, %v564_v28  ;;  %v2098_v34 = vmax.f32 %v1977_v43, %v538_v29 }
 0x1b8   : > { %693 = vrot.lane.b32.xlu0 %v2091_v31, %s1751_s9  ;;  %691 = vrot.lane.b32.xlu1 %v2088_v30, %s1751_s9 }
 0x1b9   : > { %v566_v32 = vpop.permute.xlu1 %565  ;;  %v540_v33 = vpop.permute.xlu0 %539 }
 0x1ba   : > { %v2101_v35 = vmax.f32 %v1985_v47, %v540_v33  ;;  %v2108_v38 = vmax.f32 %v1979_v44, %v566_v32 }
 0x1bc   : > { %669 = vrot.lane.b32.xlu0 %v2101_v35, %s1751_s9  ;;  %667 = vrot.lane.b32.xlu1 %v2098_v34, %s1751_s9 }
 0x1bd   : > { %v568_v36 = vpop.permute.xlu0 %567  ;;  %v542_v37 = vpop.permute.xlu1 %541 }
 0x1be   : > { %v2111_v39 = vmax.f32 %v1987_v48, %v568_v36  ;;  %v2118_v42 = vmax.f32 %v1993_v51, %v542_v37 }
 0x1c0   : > { %697 = vrot.lane.b32.xlu0 %v2111_v39, %s1751_s9  ;;  %695 = vrot.lane.b32.xlu1 %v2108_v38, %s1751_s9 }
 0x1c1   : > { %v570_v40 = vpop.permute.xlu1 %569  ;;  %v544_v41 = vpop.permute.xlu0 %543 }
 0x1c2   : > { %v2121_v43 = vmax.f32 %v2001_v55, %v544_v41  ;;  %v2128_v44 = vmax.f32 %v1995_v52, %v570_v40  ;;  %v2158_v55 = vld [vmem:[#allocation4] ss:$0 sm:$0xff] }
 0x1c4   : > { %673 = vrot.lane.b32.xlu0 %v2121_v43, %s1751_s9  ;;  %671 = vrot.lane.b32.xlu1 %v2118_v42, %s1751_s9 }
 0x1c5   : > { %v546_v45 = vpop.permute.xlu1 %545 }
 0x1c6   : > { %v2133_v47 = vmax.f32 %v2009_v59, %v546_v45 }
 0x1c8   : > { %699 = vrot.lane.b32.xlu1 %v2128_v44, %s1751_s9 }
 0x1c9   : > { %v548_v46 = vpop.permute.xlu0 %547 }
 0x1ca   : > { %v2136_v48 = vmax.f32 %v2015_v63, %v548_v46 }
 0x1cb   : > { %v550_v49 = vpop.permute.xlu1 %549 }
 0x1cc   : > { %677 = vrot.lane.b32.xlu0 %v2136_v48, %s1751_s9  ;;  %675 = vrot.lane.b32.xlu1 %v2133_v47, %s1751_s9  ;;  %v2143_v51 = vmax.f32 %v2019_v1, %v550_v49 }
 0x1cd   : > { %v572_v50 = vpop.permute.xlu0 %571 }
 0x1ce   : > { %v2146_v52 = vmax.f32 %v2003_v56, %v572_v50 }
 0x1cf   : > { %v574_v53 = vpop.permute.xlu1 %573 }
 0x1d0   : > { %701 = vrot.lane.b32.xlu0 %v2146_v52, %s1751_s9  ;;  %679 = vrot.lane.b32.xlu1 %v2143_v51, %s1751_s9  ;;  %v2153_v54 = vmax.f32 %v2011_v60, %v574_v53 }
 0x1d4   : > { %703 = vrot.lane.b32.xlu1 %v2153_v54, %s1751_s9 }
 0x20e   : > { %v654_v57 = vpop.permute.xlu0 %653 }
 0x20f   : > { %v731_v56 = vmax.f32 %v2028_v4, %v654_v57 }
 0x211   : > { %v764_v58 = vadd.f32 %v2158_v55, %v731_v56 }
 0x212   : > { %v682_v59 = vpop.permute.xlu0 %681 }
 0x213   : > { %v790_v61 = vmax.f32 %v764_v58, 0.0  ;;  %v745_v62 = vmax.f32 %v2033_v7, %v682_v59 }
 0x215   : > { %v1360_v63 = vpack.c.bf16 %v790_v61, %v790_v61  ;;  %v778_v60 = vadd.f32 %v2158_v55, %v745_v62 }
 0x216   : > { %v658_v0 = vpop.permute.xlu0 %657  ;;  %v656_v1 = vpop.permute.xlu1 %655 }
 0x217   : > { %921 = vst.msk [vmem:[%s2164_s14] sm:$0xf] %vm920_vm2, %v1360_v63  ;;  %v804_v2 = vmax.f32 %v778_v60, 0.0  ;;  %v733_v3 = vmax.f32 %v2041_v11, %v658_v0  ;;  %v732_v4 = vmax.f32 %v2038_v10, %v656_v1 }
 0x219   : > { %v1374_v5 = vpack.c.bf16 %v804_v2, %v804_v2  ;;  %v766_v6 = vadd.f32 %v2158_v55, %v733_v3  ;;  %v765_v7 = vadd.f32 %v2158_v55, %v732_v4 }
 0x21a   : > { %v686_v8 = vpop.permute.xlu0 %685  ;;  %v684_v9 = vpop.permute.xlu1 %683 }
 0x21b   : > { %935 = vst.msk [vmem:[%s2164_s14 + $0x38] sm:$0xf] %vm920_vm2, %v1374_v5  ;;  %v792_v12 = vmax.f32 %v766_v6, 0.0  ;;  %v791_v13 = vmax.f32 %v765_v7, 0.0  ;;  %v747_v16 = vmax.f32 %v2051_v15, %v686_v8  ;;  %v746_v17 = vmax.f32 %v2048_v14, %v684_v9 }
 0x21d   : > { %v1362_v11 = vpack.c.bf16 %v792_v12, %v792_v12  ;;  %v1361_v20 = vpack.c.bf16 %v791_v13, %v791_v13  ;;  %v780_v10 = vadd.f32 %v2158_v55, %v747_v16  ;;  %v779_v21 = vadd.f32 %v2158_v55, %v746_v17 }
 0x21e   : > { %v662_v24 = vpop.permute.xlu0 %661  ;;  %v660_v25 = vpop.permute.xlu1 %659 }
 0x21f   : > { %923 = vst.msk [vmem:[%s2164_s14 + $0x8] sm:$0xf] %vm920_vm2, %v1362_v11  ;;  %922 = vst.msk [vmem:[%s2164_s14 + $0x4] sm:$0xf] %vm920_vm2, %v1361_v20  ;;  %v806_v28 = vmax.f32 %v780_v10, 0.0  ;;  %v805_v29 = vmax.f32 %v779_v21, 0.0  ;;  %v735_v15 = vmax.f32 %v2061_v19, %v662_v24  ;;  %v734_v14 = vmax.f32 %v2058_v18, %v660_v25 }
 0x221   : > { %v1376_v32 = vpack.c.bf16 %v806_v28, %v806_v28  ;;  %v1375_v33 = vpack.c.bf16 %v805_v29, %v805_v29  ;;  %v768_v36 = vadd.f32 %v2158_v55, %v735_v15  ;;  %v767_v37 = vadd.f32 %v2158_v55, %v734_v14 }
 0x222   : > { %v690_v40 = vpop.permute.xlu0 %689  ;;  %v688_v41 = vpop.permute.xlu1 %687 }
 0x223   : > { %937 = vst.msk [vmem:[%s2164_s14 + $0x40] sm:$0xf] %vm920_vm2, %v1376_v32  ;;  %936 = vst.msk [vmem:[%s2164_s14 + $0x3c] sm:$0xf] %vm920_vm2, %v1375_v33  ;;  %v794_v45 = vmax.f32 %v768_v36, 0.0  ;;  %v793_v46 = vmax.f32 %v767_v37, 0.0  ;;  %v749_v19 = vmax.f32 %v2071_v23, %v690_v40  ;;  %v748_v18 = vmax.f32 %v2068_v22, %v688_v41 }
 0x225   : > { %v1364_v49 = vpack.c.bf16 %v794_v45, %v794_v45  ;;  %v1363_v50 = vpack.c.bf16 %v793_v46, %v793_v46  ;;  %v782_v53 = vadd.f32 %v2158_v55, %v749_v19  ;;  %v781_v57 = vadd.f32 %v2158_v55, %v748_v18 }
 0x226   : > { %v666_v56 = vpop.permute.xlu0 %665  ;;  %v664_v58 = vpop.permute.xlu1 %663 }
 0x227   : > { %925 = vst.msk [vmem:[%s2164_s14 + $0x10] sm:$0xf] %vm920_vm2, %v1364_v49  ;;  %924 = vst.msk [vmem:[%s2164_s14 + $0xc] sm:$0xf] %vm920_vm2, %v1363_v50  ;;  %v808_v59 = vmax.f32 %v782_v53, 0.0  ;;  %v807_v61 = vmax.f32 %v781_v57, 0.0  ;;  %v737_v23 = vmax.f32 %v2081_v27, %v666_v56  ;;  %v736_v22 = vmax.f32 %v2078_v26, %v664_v58 }
 0x229   : > { %v1378_v62 = vpack.c.bf16 %v808_v59, %v808_v59  ;;  %v1377_v63 = vpack.c.bf16 %v807_v61, %v807_v61  ;;  %v770_v60 = vadd.f32 %v2158_v55, %v737_v23  ;;  %v769_v0 = vadd.f32 %v2158_v55, %v736_v22 }
 0x22a   : > { %v694_v1 = vpop.permute.xlu0 %693  ;;  %v692_v2 = vpop.permute.xlu1 %691 }
 0x22b   : > { %939 = vst.msk [vmem:[%s2164_s14 + $0x48] sm:$0xf] %vm920_vm2, %v1378_v62  ;;  %938 = vst.msk [vmem:[%s2164_s14 + $0x44] sm:$0xf] %vm920_vm2, %v1377_v63  ;;  %v796_v3 = vmax.f32 %v770_v60, 0.0  ;;  %v795_v4 = vmax.f32 %v769_v0, 0.0  ;;  %v751_v27 = vmax.f32 %v2091_v31, %v694_v1  ;;  %v750_v26 = vmax.f32 %v2088_v30, %v692_v2 }
 0x22d   : > { %v1366_v5 = vpack.c.bf16 %v796_v3, %v796_v3  ;;  %v1365_v6 = vpack.c.bf16 %v795_v4, %v795_v4  ;;  %v784_v7 = vadd.f32 %v2158_v55, %v751_v27  ;;  %v783_v8 = vadd.f32 %v2158_v55, %v750_v26 }
 0x22e   : > { %v670_v9 = vpop.permute.xlu0 %669  ;;  %v668_v12 = vpop.permute.xlu1 %667 }
 0x22f   : > { %927 = vst.msk [vmem:[%s2164_s14 + $0x18] sm:$0xf] %vm920_vm2, %v1366_v5  ;;  %926 = vst.msk [vmem:[%s2164_s14 + $0x14] sm:$0xf] %vm920_vm2, %v1365_v6  ;;  %v810_v13 = vmax.f32 %v784_v7, 0.0  ;;  %v809_v16 = vmax.f32 %v783_v8, 0.0  ;;  %v739_v31 = vmax.f32 %v2101_v35, %v670_v9  ;;  %v738_v30 = vmax.f32 %v2098_v34, %v668_v12 }
 0x231   : > { %v1380_v17 = vpack.c.bf16 %v810_v13, %v810_v13  ;;  %v1379_v11 = vpack.c.bf16 %v809_v16, %v809_v16  ;;  %v772_v20 = vadd.f32 %v2158_v55, %v739_v31  ;;  %v771_v10 = vadd.f32 %v2158_v55, %v738_v30 }
 0x232   : > { %v698_v21 = vpop.permute.xlu0 %697  ;;  %v696_v24 = vpop.permute.xlu1 %695 }
 0x233   : > { %941 = vst.msk [vmem:[%s2164_s14 + $0x50] sm:$0xf] %vm920_vm2, %v1380_v17  ;;  %940 = vst.msk [vmem:[%s2164_s14 + $0x4c] sm:$0xf] %vm920_vm2, %v1379_v11  ;;  %v798_v25 = vmax.f32 %v772_v20, 0.0  ;;  %v797_v28 = vmax.f32 %v771_v10, 0.0  ;;  %v753_v35 = vmax.f32 %v2111_v39, %v698_v21  ;;  %v752_v34 = vmax.f32 %v2108_v38, %v696_v24 }
 0x235   : > { %v1368_v29 = vpack.c.bf16 %v798_v25, %v798_v25  ;;  %v1367_v15 = vpack.c.bf16 %v797_v28, %v797_v28  ;;  %v786_v14 = vadd.f32 %v2158_v55, %v753_v35  ;;  %v785_v32 = vadd.f32 %v2158_v55, %v752_v34 }
 0x236   : > { %v674_v33 = vpop.permute.xlu0 %673  ;;  %v672_v36 = vpop.permute.xlu1 %671 }
 0x237   : > { %929 = vst.msk [vmem:[%s2164_s14 + $0x20] sm:$0xf] %vm920_vm2, %v1368_v29  ;;  %928 = vst.msk [vmem:[%s2164_s14 + $0x1c] sm:$0xf] %vm920_vm2, %v1367_v15  ;;  %v812_v37 = vmax.f32 %v786_v14, 0.0  ;;  %v811_v40 = vmax.f32 %v785_v32, 0.0  ;;  %v741_v39 = vmax.f32 %v2121_v43, %v674_v33  ;;  %v740_v38 = vmax.f32 %v2118_v42, %v672_v36 }
 0x239   : > { %v1382_v41 = vpack.c.bf16 %v812_v37, %v812_v37  ;;  %v1381_v45 = vpack.c.bf16 %v811_v40, %v811_v40  ;;  %v774_v46 = vadd.f32 %v2158_v55, %v741_v39  ;;  %v773_v19 = vadd.f32 %v2158_v55, %v740_v38 }
 0x23a   : > { %v700_v18 = vpop.permute.xlu1 %699 }
 0x23b   : > { %943 = vst.msk [vmem:[%s2164_s14 + $0x58] sm:$0xf] %vm920_vm2, %v1382_v41  ;;  %942 = vst.msk [vmem:[%s2164_s14 + $0x54] sm:$0xf] %vm920_vm2, %v1381_v45  ;;  %v800_v49 = vmax.f32 %v774_v46, 0.0  ;;  %v799_v50 = vmax.f32 %v773_v19, 0.0  ;;  %v754_v53 = vmax.f32 %v2128_v44, %v700_v18 }
 0x23d   : > { %v1370_v43 = vpack.c.bf16 %v800_v49, %v800_v49  ;;  %v1369_v42 = vpack.c.bf16 %v799_v50, %v799_v50  ;;  %v787_v57 = vadd.f32 %v2158_v55, %v754_v53 }
 0x23e   : > { %v678_v56 = vpop.permute.xlu0 %677  ;;  %v676_v58 = vpop.permute.xlu1 %675 }
 0x23f   : > { %931 = vst.msk [vmem:[%s2164_s14 + $0x28] sm:$0xf] %vm920_vm2, %v1370_v43  ;;  %930 = vst.msk [vmem:[%s2164_s14 + $0x24] sm:$0xf] %vm920_vm2, %v1369_v42  ;;  %v813_v59 = vmax.f32 %v787_v57, 0.0  ;;  %v743_v61 = vmax.f32 %v2136_v48, %v678_v56  ;;  %v742_v23 = vmax.f32 %v2133_v47, %v676_v58 }
 0x241   : > { %v1383_v22 = vpack.c.bf16 %v813_v59, %v813_v59  ;;  %v776_v44 = vadd.f32 %v2158_v55, %v743_v61  ;;  %v775_v62 = vadd.f32 %v2158_v55, %v742_v23 }
 0x242   : > { %v702_v63 = vpop.permute.xlu0 %701  ;;  %v680_v60 = vpop.permute.xlu1 %679 }
 0x243   : > { %944 = vst.msk [vmem:[%s2164_s14 + $0x5c] sm:$0xf] %vm920_vm2, %v1383_v22  ;;  %v802_v0 = vmax.f32 %v776_v44, 0.0  ;;  %v801_v1 = vmax.f32 %v775_v62, 0.0  ;;  %v755_v2 = vmax.f32 %v2146_v52, %v702_v63  ;;  %v744_v48 = vmax.f32 %v2143_v51, %v680_v60 }
 0x245   : > { %v1372_v47 = vpack.c.bf16 %v802_v0, %v802_v0  ;;  %v1371_v3 = vpack.c.bf16 %v801_v1, %v801_v1  ;;  %v788_v4 = vadd.f32 %v2158_v55, %v755_v2  ;;  %v777_v27 = vadd.f32 %v2158_v55, %v744_v48 }
 0x246   : > { %v704_v26 = vpop.permute.xlu1 %703 }
 0x247   : > { %933 = vst.msk [vmem:[%s2164_s14 + $0x30] sm:$0xf] %vm920_vm2, %v1372_v47  ;;  %932 = vst.msk [vmem:[%s2164_s14 + $0x2c] sm:$0xf] %vm920_vm2, %v1371_v3  ;;  %v814_v5 = vmax.f32 %v788_v4, 0.0  ;;  %v803_v6 = vmax.f32 %v777_v27, 0.0  ;;  %v756_v7 = vmax.f32 %v2153_v54, %v704_v26 }
 0x249   : > { %v1384_v52 = vpack.c.bf16 %v814_v5, %v814_v5  ;;  %v1373_v8 = vpack.c.bf16 %v803_v6, %v803_v6  ;;  %v789_v51 = vadd.f32 %v2158_v55, %v756_v7  ;;  %953 = sbr.rel (!%p2398_p12) target bundleno = 671 (0x29f), region = 44 }
 0x24b   : > { %945 = vst.msk [vmem:[%s2164_s14 + $0x60] sm:$0xf] %vm920_vm2, %v1384_v52  ;;  %934 = vst.msk [vmem:[%s2164_s14 + $0x34] sm:$0xf] %vm920_vm2, %v1373_v8  ;;  %v815_v9 = vmax.f32 %v789_v51, 0.0 }
 0x24d   : > { %v1385_v12 = vpack.c.bf16 %v815_v9, %v815_v9 }
 0x24f   : > { %946 = vst.msk [vmem:[%s2164_s14 + $0x64] sm:$0xf] %vm920_vm2, %v1385_v12 }
 0x250   : > { %s2406_s12 = smov (!%p956_p13, %s955_s12), 26 }
 0x251   : > { %s1348_s27 = sshll.u32 %s2406_s12, 6 }
 0x252   : > { %p1351_p0 = scmp.eq.s32.totalorder %s1348_s27, 0 }
 0x253   : > { %1588 = sdivrem.u32 (!%p1351_p0), %s2406_s12, 26 }
 0x254   : > { %964 = sbr.rel (%p1351_p0) target bundleno = 671 (0x29f), region = 48 }
 0x25c   : > { %s2279_s20 = spop.drf %1588 }
 0x25d   : > { %p1352_p1 = scmp.le.s32.totalorder %s2279_s20, 0 }
 0x25e   : > { %s2399_s15 = smov (!%p1352_p1), %s2273_s25  ;;  %s2400_s28 = smov (!%p1352_p1), %s2164_s14 }
 0x25f   : > { %1223 = sbr.rel (%p1352_p1) target bundleno = 642 (0x282), region = 121  ;;  %s2288_s23 = smov (!%p1352_p1), 0  }
 0x260   : > { %s2290_s29 = smov (!%p1352_p1), 0  }
 0x266 LB: >> { %v981_v54 = vld [vmem:[%s1718_s28] sm:$0xf]  ;;  %v983_v55 = vld [vmem:[%s1718_s28 + $0x4] sm:$0xf]  ;;  %v985_v13 = vld [vmem:[%s1718_s28 + $0x8] sm:$0xf]  ;;  %s1726_s29 = sphi %s2290_s29, %s975_s29   ;;  %s1722_s23 = sphi %s2288_s23, %s2401_s23   ;;  %s1718_s28 = sphi %s2400_s28, %s1038_s28   ;;  %s1714_s15 = sphi %s2399_s15, %s1039_s15  }
 0x267   : >> { %982 = vst [vmem:[%s1714_s15] sm:$0xf] %v981_v54  ;;  %984 = vst [vmem:[%s1714_s15 + $0x4] sm:$0xf] %v983_v55  ;;  %v987_v16 = vld [vmem:[%s1718_s28 + $0xc] sm:$0xf]  ;;  %s1033_s30 = sadd.s32 1, %s1722_s23 }
 0x268   : >> { %986 = vst [vmem:[%s1714_s15 + $0x8] sm:$0xf] %v985_v13  ;;  %v989_v31 = vld [vmem:[%s1718_s28 + $0x10] sm:$0xf]  ;;  %v991_v30 = vld [vmem:[%s1718_s28 + $0x14] sm:$0xf]  ;;  %p1034_p2 = scmp.ge.s32.totalorder %s1033_s30, %s2279_s20 }
 0x269   : >> { %988 = vst [vmem:[%s1714_s15 + $0xc] sm:$0xf] %v987_v16  ;;  %990 = vst [vmem:[%s1714_s15 + $0x10] sm:$0xf] %v989_v31  ;;  %v993_v17 = vld [vmem:[%s1718_s28 + $0x18] sm:$0xf] }
 0x26a   : >> { %992 = vst [vmem:[%s1714_s15 + $0x14] sm:$0xf] %v991_v30  ;;  %v995_v11 = vld [vmem:[%s1718_s28 + $0x1c] sm:$0xf]  ;;  %v997_v20 = vld [vmem:[%s1718_s28 + $0x20] sm:$0xf] }
 0x26b   : >> { %994 = vst [vmem:[%s1714_s15 + $0x18] sm:$0xf] %v993_v17  ;;  %996 = vst [vmem:[%s1714_s15 + $0x1c] sm:$0xf] %v995_v11  ;;  %v999_v10 = vld [vmem:[%s1718_s28 + $0x24] sm:$0xf] }
 0x26c   : >> { %998 = vst [vmem:[%s1714_s15 + $0x20] sm:$0xf] %v997_v20  ;;  %v1001_v21 = vld [vmem:[%s1718_s28 + $0x28] sm:$0xf]  ;;  %v1003_v24 = vld [vmem:[%s1718_s28 + $0x2c] sm:$0xf] }
 0x26d   : >> { %1000 = vst [vmem:[%s1714_s15 + $0x24] sm:$0xf] %v999_v10  ;;  %1002 = vst [vmem:[%s1714_s15 + $0x28] sm:$0xf] %v1001_v21  ;;  %v1005_v25 = vld [vmem:[%s1718_s28 + $0x30] sm:$0xf] }
 0x26e   : >> { %1004 = vst [vmem:[%s1714_s15 + $0x2c] sm:$0xf] %v1003_v24  ;;  %v1007_v28 = vld [vmem:[%s1718_s28 + $0x34] sm:$0xf]  ;;  %v1009_v35 = vld [vmem:[%s1718_s28 + $0x38] sm:$0xf] }
 0x26f   : >> { %1006 = vst [vmem:[%s1714_s15 + $0x30] sm:$0xf] %v1005_v25  ;;  %1008 = vst [vmem:[%s1714_s15 + $0x34] sm:$0xf] %v1007_v28  ;;  %v1011_v34 = vld [vmem:[%s1718_s28 + $0x3c] sm:$0xf] }
 0x270   : >> { %1010 = vst [vmem:[%s1714_s15 + $0x38] sm:$0xf] %v1009_v35  ;;  %v1013_v29 = vld [vmem:[%s1718_s28 + $0x40] sm:$0xf]  ;;  %v1015_v15 = vld [vmem:[%s1718_s28 + $0x44] sm:$0xf] }
 0x271   : >> { %1012 = vst [vmem:[%s1714_s15 + $0x3c] sm:$0xf] %v1011_v34  ;;  %1014 = vst [vmem:[%s1714_s15 + $0x40] sm:$0xf] %v1013_v29  ;;  %v1017_v14 = vld [vmem:[%s1718_s28 + $0x48] sm:$0xf] }
 0x272   : >> { %1016 = vst [vmem:[%s1714_s15 + $0x44] sm:$0xf] %v1015_v15  ;;  %v1019_v32 = vld [vmem:[%s1718_s28 + $0x4c] sm:$0xf]  ;;  %v1021_v33 = vld [vmem:[%s1718_s28 + $0x50] sm:$0xf] }
 0x273   : >> { %1018 = vst [vmem:[%s1714_s15 + $0x48] sm:$0xf] %v1017_v14  ;;  %1020 = vst [vmem:[%s1714_s15 + $0x4c] sm:$0xf] %v1019_v32  ;;  %v1023_v36 = vld [vmem:[%s1718_s28 + $0x54] sm:$0xf] }
 0x274   : >> { %1022 = vst [vmem:[%s1714_s15 + $0x50] sm:$0xf] %v1021_v33  ;;  %v1025_v37 = vld [vmem:[%s1718_s28 + $0x58] sm:$0xf]  ;;  %v1027_v40 = vld [vmem:[%s1718_s28 + $0x5c] sm:$0xf] }
 0x275   : >> { %1024 = vst [vmem:[%s1714_s15 + $0x54] sm:$0xf] %v1023_v36  ;;  %1026 = vst [vmem:[%s1714_s15 + $0x58] sm:$0xf] %v1025_v37  ;;  %v1029_v39 = vld [vmem:[%s1718_s28 + $0x60] sm:$0xf] }
 0x276   : >> { %1028 = vst [vmem:[%s1714_s15 + $0x5c] sm:$0xf] %v1027_v40  ;;  %v1031_v38 = vld [vmem:[%s1718_s28 + $0x64] sm:$0xf]  ;;  %1030 = vst [vmem:[%s1714_s15 + $0x60] sm:$0xf] %v1029_v39 }
 0x277   : >> { %1032 = vst [vmem:[%s1714_s15 + $0x64] sm:$0xf] %v1031_v38  ;;  %s2408_s30 = smov (%p1034_p2, %s1033_s30), 0  ;;  %s975_s29 = sadd.s32 1, %s1726_s29  }
 0x278   : >> { %s1036_s4 = smul.u32 104, %s2408_s30  ;;  %p974_p3 = scmp.ge.s32.totalorder %s975_s29, %s2279_s20 }
 0x279   : >> { %s2401_s23 = smov %s2408_s30 }
 0x27a   : >> { %s1038_s28 = scalar_lea.vmem %s2164_s14, %s1036_s4 [#allocation6]   ;;  %s1039_s15 = scalar_lea.vmem %s2273_s25, %s1036_s4  }
 0x27b   : > { %977 = sbr.rel (!%p974_p3) target bundleno = 614 (0x266), region = 127 }
 0x282 PF: > { %1590 = sdivrem.u32 %s2406_s12, 26 }
 0x283   : > { %s1353_s24 = smul.u32 104, %s2279_s20 }
 0x285   : > { %s1044_s21 = scalar_lea.vmem %s2164_s14, %s1353_s24 [#allocation6]   ;;  %s1046_s26 = scalar_lea.vmem %s2273_s25, %s1353_s24  }
 0x28b   : > { %s1591_s5 = spop.drf %1590 }
 0x28c   : > { %p1355_p5 = scmp.le.s32.totalorder %s1591_s5, 0 }
 0x28d   : > { %s1728_s6 = smov (!%p1355_p5), %s1046_s26   ;;  %s1732_s7 = smov (!%p1355_p5), %s1044_s21  }
 0x28e   : > { %1237 = sbr.rel (%p1355_p5) target bundleno = 671 (0x29f), region = 132  ;;  %s1736_s8 = smov (!%p1355_p5), 0  }
 0x28f   : > { %s1740_s9 = smov (!%p1355_p5), 0  }
 0x295 LB: >> { %v1056_v41 = vld [vmem:[%s1734_s7] sm:$0xf]  ;;  %s1058_s10 = sadd.s32 1, %s1738_s8  ;;  %s1050_s9 = sadd.s32 1, %s1742_s9   ;;  %s1742_s9 = sphi %s1740_s9, %s1050_s9   ;;  %s1738_s8 = sphi %s1736_s8, %s1737_s8   ;;  %s1734_s7 = sphi %s1732_s7, %s1063_s7   ;;  %s1730_s6 = sphi %s1728_s6, %s1064_s6  }
 0x296   : >> { %1057 = vst [vmem:[%s1730_s6] sm:$0xf] %v1056_v41  ;;  %p1059_p8 = scmp.ge.s32.totalorder %s1058_s10, %s1591_s5  ;;  %p1049_p10 = scmp.ge.s32.totalorder %s1050_s9, %s1591_s5 }
 0x298   : >> { %s2410_s10 = smov (%p1059_p8, %s1058_s10), 0  ;;  %1052 = sbr.rel (!%p1049_p10) target bundleno = 661 (0x295), region = 138 }
 0x299   : >> { %s1356_s11 = sshll.u32 %s2410_s10, 2  ;;  %s1737_s8 = smov %s2410_s10  }
 0x29a   : >> { %s1063_s7 = scalar_lea.vmem %s1044_s21, %s1356_s11 [#allocation6]   ;;  %s1064_s6 = scalar_lea.vmem %s1046_s26, %s1356_s11  }
 0x29f PF: > { %p12_p11 = scmp.ge.s32.totalorder %s1787_s16, 4   ;;  %s2402_s12 = smov %s1706_s13 }
 0x2a0   : > { %s2403_s13 = smov %s1795_s19  ;;  %s2404_s14 = smov %s1787_s16 }
 0x2a1   :  { %14 = sbr.rel (!%p12_p11) target bundleno = 3 (0x3), region = 149 }
 0x2a8   :  { %1176 = vsyncpa [#allocation3], 1 }
 0x2a9   :  { %1178 = vsyncpa [#allocation3 + $0x1], 1 }
 0x2aa   :  { %1179 = vsyncpa [#allocation5], 1 }

// kernel: fashion_cnn_forward.4
= control target key start
LH: loop header
LB: loop body
LE: loop exit
PB: predicated region body
PF: predicated region fallthrough
CT: control target
= control target key end

     0   :  { %s1573_s12 = smov 0   ;;  %s1575_s13 = smov 0   ;;  %s1902_s0 = inlined_call_operand.vmem [shape: bf16[72,512], index: 0, kind: input, shape index: {}]   ;;  %s1903_s1 = inlined_call_operand.vmem [shape: bf16[512,256], index: 1, kind: input, shape index: {}]   ;;  %s1904_s2 = inlined_call_operand.vmem [shape: f32[1,64], index: 2, kind: input, shape index: {}]   ;;  %s1905_s3 = inlined_call_operand.vmem [shape: bf16[72,64], index: 3, kind: output, shape index: {}]  }
   0x1   :  { %s1577_s14 = smov 0  }
   0x2 LB: > { %s1586_s15 = sadd.s32 4294967295, %s1518_s14   ;;  %s1588_s16 = sadd.s32 1, %s1518_s14   ;;  %s1518_s14 = sphi %s1577_s14, %s1912_s14   ;;  %s1514_s13 = sphi %s1575_s13, %s1911_s13   ;;  %s1510_s12 = sphi %s1573_s12, %s1910_s12  }
   0x3   : > { %s85_s17 = ssub.s32 %s1518_s14, %s1588_s16  ;;  %s88_s18 = sadd.s32 1, %s1514_s13 }
   0x4   : > { %p86_p0 = scmp.eq.s32.totalorder %s85_s17, 0  ;;  %p98_p1 = scmp.ne.s32.totalorder %s1514_s13, %s1510_s12 }
   0x5   : > { %p99_p2 = scmp.eq.s32.totalorder %s1586_s15, 1  ;;  %p1137_p3 = scmp.ge.s32.totalorder %s1518_s14, 1 }
   0x6   : > { %s1596_s19 = scalar_select %p86_p0, %s1514_s13, %s88_s18  }
   0x7   : > { %p1598_p4 = por %p99_p2, %p98_p1  ;;  %p149_p5 = scmp.lt.s32.totalorder %s1518_s14, 3 }
   0x9   : > { %p150_p6 = pnand %p1137_p3, %p149_p5 }
   0xa   : > { %v1346_v0 = vld [vmem:[%s1903_s1 + $0x4] ss:$8 sps:$4 sm:$0xff] (!%p150_p6)   ;;  %v1350_v2 = vld [vmem:[%s1903_s1] ss:$8 sps:$4 sm:$0xff] (!%p150_p6)   ;;  %v1352_v4 = vld [vmem:[%s1903_s1 + $0x14] ss:$8 sps:$4 sm:$0xff] (!%p150_p6)  }
   0xb   : > { %153 = sbr.rel (%p150_p6) target bundleno = 504 (0x1f8), region = 32  ;;  %v1348_v1 = vld [vmem:[%s1903_s1 + $0x104] ss:$8 sps:$4 sm:$0xff] (!%p150_p6)   ;;  %656 = vmatprep.subr.bf16.mxu1 (!%p150_p6), %v1346_v0  ;;  %v1351_v3 = vld [vmem:[%s1903_s1 + $0x100] ss:$8 sps:$4 sm:$0xff] (!%p150_p6)   ;;  %s1552_s7 = smov (!%p150_p6), 64  }
   0xc   : > { %719 = vmatprep.subr.bf16.mxu0 (!%p150_p6), %v1348_v1  ;;  %657 = vmatpush1.bf16.msra.mxu1 (!%p150_p6), %v1350_v2  ;;  %v1354_v5 = vld [vmem:[%s1903_s1 + $0x114] ss:$8 sps:$4 sm:$0xff] (!%p150_p6)   ;;  %v1356_v6 = vld [vmem:[%s1903_s1 + $0x10] ss:$8 sps:$4 sm:$0xff] (!%p150_p6)   ;;  %v1358_v8 = vld [vmem:[%s1903_s1 + $0x24] ss:$8 sps:$4 sm:$0xff] (!%p150_p6)  }
   0xd   : > { %720 = vmatpush1.bf16.msra.mxu0 (!%p150_p6), %v1351_v3  ;;  %658 = vmatprep.subr.bf16.mxu1 (!%p150_p6), %v1352_v4  ;;  %v1357_v7 = vld [vmem:[%s1903_s1 + $0x110] ss:$8 sps:$4 sm:$0xff] (!%p150_p6)   ;;  %v1360_v9 = vld [vmem:[%s1903_s1 + $0x124] ss:$8 sps:$4 sm:$0xff] (!%p150_p6)   ;;  %v1362_v10 = vld [vmem:[%s1903_s1 + $0x20] ss:$8 sps:$4 sm:$0xff] (!%p150_p6)  }
   0xe   : > { %721 = vmatprep.subr.bf16.mxu0 (!%p150_p6), %v1354_v5  ;;  %v1363_v11 = vld [vmem:[%s1903_s1 + $0x120] ss:$8 sps:$4 sm:$0xff] (!%p150_p6)   ;;  %v1364_v12 = vld [vmem:[%s1903_s1 + $0x34] ss:$8 sps:$4 sm:$0xff] (!%p150_p6)   ;;  %v1368_v14 = vld [vmem:[%s1903_s1 + $0x30] ss:$8 sps:$4 sm:$0xff] (!%p150_p6)  }
   0xf   : > { %v1366_v13 = vld [vmem:[%s1903_s1 + $0x134] ss:$8 sps:$4 sm:$0xff] (!%p150_p6)   ;;  %v1369_v15 = vld [vmem:[%s1903_s1 + $0x130] ss:$8 sps:$4 sm:$0xff] (!%p150_p6)   ;;  %v1370_v16 = vld [vmem:[%s1903_s1 + $0x44] ss:$8 sps:$4 sm:$0xff] (!%p150_p6)  }
  0x10   : > { %659 = vmatpush1.bf16.msra.mxu1 (!%p150_p6), %v1356_v6  ;;  %v1372_v17 = vld [vmem:[%s1903_s1 + $0x144] ss:$8 sps:$4 sm:$0xff] (!%p150_p6)   ;;  %v1374_v18 = vld [vmem:[%s1903_s1 + $0x40] ss:$8 sps:$4 sm:$0xff] (!%p150_p6)   ;;  %v1376_v20 = vld [vmem:[%s1903_s1 + $0x54] ss:$8 sps:$4 sm:$0xff] (!%p150_p6)  }
  0x11   : > { %722 = vmatpush1.bf16.msra.mxu0 (!%p150_p6), %v1357_v7  ;;  %660 = vmatprep.subr.bf16.mxu1 (!%p150_p6), %v1358_v8  ;;  %v1375_v19 = vld [vmem:[%s1903_s1 + $0x140] ss:$8 sps:$4 sm:$0xff] (!%p150_p6)   ;;  %v1378_v21 = vld [vmem:[%s1903_s1 + $0x154] ss:$8 sps:$4 sm:$0xff] (!%p150_p6)   ;;  %v1380_v22 = vld [vmem:[%s1903_s1 + $0x50] ss:$8 sps:$4 sm:$0xff] (!%p150_p6)  }
  0x12   : > { %723 = vmatprep.subr.bf16.mxu0 %v1360_v9  ;;  %v1381_v23 = vld [vmem:[%s1903_s1 + $0x150] ss:$8 sps:$4 sm:$0xff]   ;;  %v1382_v24 = vld [vmem:[%s1903_s1 + $0x64] ss:$8 sps:$4 sm:$0xff]   ;;  %v1386_v26 = vld [vmem:[%s1903_s1 + $0x60] ss:$8 sps:$4 sm:$0xff]  }
  0x13   : > { %v1384_v25 = vld [vmem:[%s1903_s1 + $0x164] ss:$8 sps:$4 sm:$0xff]   ;;  %v1387_v27 = vld [vmem:[%s1903_s1 + $0x160] ss:$8 sps:$4 sm:$0xff]   ;;  %v1388_v28 = vld [vmem:[%s1903_s1 + $0x74] ss:$8 sps:$4 sm:$0xff]  }
  0x14   : > { %661 = vmatpush1.bf16.msra.mxu1 %v1362_v10  ;;  %v1390_v29 = vld [vmem:[%s1903_s1 + $0x174] ss:$8 sps:$4 sm:$0xff]   ;;  %s1693_s14 = smul.u32 6, %s1586_s15  ;;  %v1392_v30 = vld [vmem:[%s1903_s1 + $0x70] ss:$8 sps:$4 sm:$0xff]   ;;  %vm891_vm0 = vcmask 519168  }
  0x15   : > { %724 = vmatpush1.bf16.msra.mxu0 %v1363_v11  ;;  %662 = vmatprep.subr.bf16.mxu1 %v1364_v12  ;;  %v1393_v31 = vld [vmem:[%s1903_s1 + $0x170] ss:$8 sps:$4 sm:$0xff]   ;;  %v1394_v32 = vld [vmem:[%s1903_s1 + $0x84] ss:$8 sps:$4 sm:$0xff]   ;;  %v1398_v34 = vld [vmem:[%s1903_s1 + $0x80] ss:$8 sps:$4 sm:$0xff]  }
  0x16   : > { %725 = vmatprep.subr.bf16.mxu0 %v1366_v13  ;;  %v1396_v33 = vld [vmem:[%s1903_s1 + $0x184] ss:$8 sps:$4 sm:$0xff]   ;;  %p184_p7 = scmp.lt.s32.totalorder %s1693_s14, 8  ;;  %v1399_v35 = vld [vmem:[%s1903_s1 + $0x180] ss:$8 sps:$4 sm:$0xff]   ;;  %s906_s11 = ssub.s32 (%p1598_p4), 9, %s1693_s14 }
  0x17   : > { %v1400_v36 = vld [vmem:[%s1903_s1 + $0x94] ss:$8 sps:$4 sm:$0xff]   ;;  %v1404_v38 = vld [vmem:[%s1903_s1 + $0x90] ss:$8 sps:$4 sm:$0xff]   ;;  %v1406_v40 = vld [vmem:[%s1903_s1 + $0xa4] ss:$8 sps:$4 sm:$0xff]  }
  0x18   : > { %663 = vmatpush1.bf16.msra.mxu1 %v1368_v14  ;;  %v1402_v37 = vld [vmem:[%s1903_s1 + $0x194] ss:$8 sps:$4 sm:$0xff]   ;;  %s185_s8 = scalar_select %p184_p7, %s1693_s14, 8  ;;  %v1405_v39 = vld [vmem:[%s1903_s1 + $0x190] ss:$8 sps:$4 sm:$0xff]  }
  0x19   : > { %726 = vmatpush1.bf16.msra.mxu0 %v1369_v15  ;;  %664 = vmatprep.subr.bf16.mxu1 %v1370_v16  ;;  %v1408_v41 = vld [vmem:[%s1903_s1 + $0x1a4] ss:$8 sps:$4 sm:$0xff]   ;;  %v1410_v42 = vld [vmem:[%s1903_s1 + $0xa0] ss:$8 sps:$4 sm:$0xff]   ;;  %v1412_v44 = vld [vmem:[%s1903_s1 + $0xb4] ss:$8 sps:$4 sm:$0xff]  }
  0x1a   : > { %727 = vmatprep.subr.bf16.mxu0 %v1372_v17  ;;  %s1235_s24 = sshll.u32 %s185_s8, 4  ;;  %v1411_v43 = vld [vmem:[%s1903_s1 + $0x1a0] ss:$8 sps:$4 sm:$0xff]   ;;  %v1414_v45 = vld [vmem:[%s1903_s1 + $0x1b4] ss:$8 sps:$4 sm:$0xff]   ;;  %s1242_s17 = smul.u32 (%p1598_p4), 24, %s1586_s15 }
  0x1b   : > { %s1745_s6 = scalar_lea.vmem %s1902_s0, %s1235_s24  ;;  %v1416_v46 = vld [vmem:[%s1903_s1 + $0xb0] ss:$8 sps:$4 sm:$0xff]   ;;  %v1418_v48 = vld [vmem:[%s1903_s1 + $0xc4] ss:$8 sps:$4 sm:$0xff]   ;;  %v1422_v52 = vld [vmem:[%s1903_s1 + $0xc0] ss:$8 sps:$4 sm:$0xff]  }
  0x1c   : > { %665 = vmatpush1.bf16.msra.mxu1 %v1374_v18  ;;  %v1417_v47 = vld [vmem:[%s1903_s1 + $0x1b0] ss:$8 sps:$4 sm:$0xff]   ;;  %v1444_v49 = vld [vmem:[%s1745_s6 + $0x4] ss:$16 sps:$4 sm:$0xff]   ;;  %v1447_v51 = vld [vmem:[%s1745_s6 + $0xc] ss:$16 sps:$4 sm:$0xff]   ;;  %s1853_s22 = scalar_lea.vmem (%p1598_p4), %s1905_s3, %s1242_s17  }
  0x1d   : > { %728 = vmatpush1.bf16.msra.mxu0 %v1375_v19  ;;  %666 = vmatprep.subr.bf16.mxu1 %v1376_v20  ;;  %v1420_v50 = vld [vmem:[%s1903_s1 + $0x1c4] ss:$8 sps:$4 sm:$0xff]   ;;  %v1423_v53 = vld [vmem:[%s1903_s1 + $0x1c0] ss:$8 sps:$4 sm:$0xff]   ;;  %v1424_v54 = vld [vmem:[%s1903_s1 + $0xd4] ss:$8 sps:$4 sm:$0xff]  }
  0x1e   : > { %729 = vmatprep.subr.bf16.mxu0 %v1378_v21  ;;  %688 = vmatprep.mubr.bf16.mxu1 %v1444_v49  ;;  %v1426_v55 = vld [vmem:[%s1903_s1 + $0x1d4] ss:$8 sps:$4 sm:$0xff]   ;;  %v1428_v56 = vld [vmem:[%s1903_s1 + $0xd0] ss:$8 sps:$4 sm:$0xff]   ;;  %v1430_v58 = vld [vmem:[%s1903_s1 + $0xe4] ss:$8 sps:$4 sm:$0xff]  }
  0x1f   : > { %751 = vmatprep.mubr.bf16.mxu0 %v1447_v51  ;;  %v1429_v57 = vld [vmem:[%s1903_s1 + $0x1d0] ss:$8 sps:$4 sm:$0xff]   ;;  %v1432_v59 = vld [vmem:[%s1903_s1 + $0x1e4] ss:$8 sps:$4 sm:$0xff]   ;;  %v1434_v60 = vld [vmem:[%s1903_s1 + $0xe0] ss:$8 sps:$4 sm:$0xff]  }
  0x20   : > { %667 = vmatpush1.bf16.msra.mxu1 %v1380_v22  ;;  %v1435_v61 = vld [vmem:[%s1903_s1 + $0x1e0] ss:$8 sps:$4 sm:$0xff]   ;;  %v1436_v62 = vld [vmem:[%s1903_s1 + $0xf4] ss:$8 sps:$4 sm:$0xff]   ;;  %v1440_v0 = vld [vmem:[%s1903_s1 + $0xf0] ss:$8 sps:$4 sm:$0xff]  }
  0x21   : > { %730 = vmatpush1.bf16.msra.mxu0 %v1381_v23  ;;  %668 = vmatprep.subr.bf16.mxu1 %v1382_v24  ;;  %v1438_v63 = vld [vmem:[%s1903_s1 + $0x1f4] ss:$8 sps:$4 sm:$0xff]   ;;  %v1441_v1 = vld [vmem:[%s1903_s1 + $0x1f0] ss:$8 sps:$4 sm:$0xff]   ;;  %p907_p8 = scmp.lt.s32.totalorder (%p1598_p4), %s906_s11, 6 }
  0x22   : > { %731 = vmatprep.subr.bf16.mxu0 %v1384_v25  ;;  %v1442_v2 = vld [vmem:[%s1745_s6] ss:$16 sps:$4 sm:$0xff]   ;;  %v1445_v3 = vld [vmem:[%s1745_s6 + $0x8] ss:$16 sps:$4 sm:$0xff]   ;;  %v1448_v4 = vld [vmem:[%s1745_s6 + $0x24] ss:$16 sps:$4 sm:$0xff]  }
  0x23   : > { %v1450_v5 = vld [vmem:[%s1745_s6 + $0x2c] ss:$16 sps:$4 sm:$0xff]   ;;  %v1452_v6 = vld [vmem:[%s1745_s6 + $0x20] ss:$16 sps:$4 sm:$0xff]   ;;  %v1453_v7 = vld [vmem:[%s1745_s6 + $0x28] ss:$16 sps:$4 sm:$0xff]  }
  0x24   : > { %669 = vmatpush1.bf16.msra.mxu1 %v1386_v26  ;;  %v1454_v8 = vld [vmem:[%s1745_s6 + $0x44] ss:$16 sps:$4 sm:$0xff]   ;;  %v1456_v9 = vld [vmem:[%s1745_s6 + $0x4c] ss:$16 sps:$4 sm:$0xff]   ;;  %v1458_v10 = vld [vmem:[%s1745_s6 + $0x40] ss:$16 sps:$4 sm:$0xff]  }
  0x25   : > { %732 = vmatpush1.bf16.msra.mxu0 %v1387_v27  ;;  %670 = vmatprep.subr.bf16.mxu1 %v1388_v28  ;;  %v1459_v11 = vld [vmem:[%s1745_s6 + $0x48] ss:$16 sps:$4 sm:$0xff]   ;;  %s175_s6 = sand.u32 1, %s1510_s12  }
  0x26   : > { %733 = vmatprep.subr.bf16.mxu0 %v1390_v29  ;;  %s1255_s10 = smul.u32 24, %s175_s6 }
  0x28   : > { %671 = vmatpush1.bf16.msra.mxu1 %v1392_v30  ;;  %s1832_s12 = scalar_lea.vmem [#allocation2], %s1255_s10  }
  0x29   : > { %734 = vmatpush1.bf16.msra.mxu0 %v1393_v31  ;;  %672 = vmatprep.subr.bf16.mxu1 %v1394_v32 }
  0x2a   : > { %735 = vmatprep.subr.bf16.mxu0 %v1396_v33 }
  0x2c   : > { %673 = vmatpush1.bf16.msra.mxu1 %v1398_v34 }
  0x2d   : > { %736 = vmatpush1.bf16.msra.mxu0 %v1399_v35  ;;  %674 = vmatprep.subr.bf16.mxu1 %v1400_v36 }
  0x2e   : > { %737 = vmatprep.subr.bf16.mxu0 %v1402_v37 }
  0x30   : > { %675 = vmatpush1.bf16.msra.mxu1 %v1404_v38 }
  0x31   : > { %738 = vmatpush1.bf16.msra.mxu0 %v1405_v39  ;;  %676 = vmatprep.subr.bf16.mxu1 %v1406_v40 }
  0x32   : > { %739 = vmatprep.subr.bf16.mxu0 %v1408_v41 }
  0x34   : > { %677 = vmatpush1.bf16.msra.mxu1 %v1410_v42 }
  0x35   : > { %740 = vmatpush1.bf16.msra.mxu0 %v1411_v43  ;;  %678 = vmatprep.subr.bf16.mxu1 %v1412_v44 }
  0x36   : > { %741 = vmatprep.subr.bf16.mxu0 %v1414_v45 }
  0x38   : > { %679 = vmatpush1.bf16.msra.mxu1 %v1416_v46 }
  0x39   : > { %742 = vmatpush1.bf16.msra.mxu0 %v1417_v47  ;;  %680 = vmatprep.subr.bf16.mxu1 %v1418_v48 }
  0x3a   : > { %743 = vmatprep.subr.bf16.mxu0 %v1420_v50 }
  0x3c   : > { %681 = vmatpush1.bf16.msra.mxu1 %v1422_v52 }
  0x3d   : > { %744 = vmatpush1.bf16.msra.mxu0 %v1423_v53  ;;  %682 = vmatprep.subr.bf16.mxu1 %v1424_v54  ;;  %v1216_v53 = vld [vmem:[%s1904_s2] ss:$0 sm:$0xff] }
  0x3e   : > { %745 = vmatprep.subr.bf16.mxu0 %v1426_v55 }
  0x40   : > { %683 = vmatpush1.bf16.msra.mxu1 %v1428_v56 }
  0x41   : > { %746 = vmatpush1.bf16.msra.mxu0 %v1429_v57  ;;  %684 = vmatprep.subr.bf16.mxu1 %v1430_v58 }
  0x42   : > { %747 = vmatprep.subr.bf16.mxu0 %v1432_v59 }
  0x44   : > { %685 = vmatpush1.bf16.msra.mxu1 %v1434_v60 }
  0x45   : > { %748 = vmatpush1.bf16.msra.mxu0 %v1435_v61  ;;  %686 = vmatprep.subr.bf16.mxu1 %v1436_v62 }
  0x46   : > { %749 = vmatprep.subr.bf16.mxu0 %v1438_v63 }
  0x48   : > { %687 = vmatpush1.bf16.msra.mxu1 %v1440_v0 }
  0x49   : > { %750 = vmatpush1.bf16.msra.mxu0 %v1441_v1 }
  0x4b   : > { %689 = vmatmul.mubr.bf16.vlgmr.msra.gmra.mrb[0].mxu1 %v1442_v2 }
  0x4c   : > { %752 = vmatmul.mubr.bf16.vlgmr.msra.gmra.mrb[0].mxu0 %v1445_v3  ;;  %698 = vmatprep.mubr.bf16.mxu1 %v1448_v4 }
  0x4d   : > { %761 = vmatprep.mubr.bf16.mxu0 %v1450_v5 }
  0x53   : > { %699 = vmatmul.mubr.bf16.gmra.mrb[4].mxu1 %v1452_v6 }
  0x54   : > { %762 = vmatmul.mubr.bf16.gmra.mrb[4].mxu0 %v1453_v7  ;;  %708 = vmatprep.mubr.bf16.mxu1 %v1454_v8 }
  0x55   : > { %771 = vmatprep.mubr.bf16.mxu0 %v1456_v9 }
  0x5b   : > { %709 = vmatmul.mubr.bf16.gmra.mrb[8].mxu1 %v1458_v10 }
  0x5c   : > { %772 = vmatmul.mubr.bf16.gmra.mrb[8].mxu0 %v1459_v11 }
 0x11e   : > { %v690_v12 = vpop.f32.mrb[0].mxu1 }
 0x11f   : > { %v753_v13 = vpop.f32.mrb[0].mxu0  ;;  %v692_v15 = vpop.f32.mrb[1].mxu1 }
 0x120   : > { %v754_v14 = vadd.f32 %v753_v13, %v690_v12  ;;  %v755_v16 = vpop.f32.mrb[1].mxu0  ;;  %v694_v18 = vpop.f32.mrb[2].mxu1 }
 0x121   : > { %v756_v17 = vadd.f32 %v755_v16, %v692_v15  ;;  %v757_v19 = vpop.f32.mrb[2].mxu0  ;;  %v696_v22 = vpop.f32.mrb[3].mxu1 }
 0x122   : > { %v758_v20 = vadd.f32 %v757_v19, %v694_v18  ;;  %v759_v21 = vpop.f32.mrb[3].mxu0  ;;  %788 = vrot.lane.b32.xlu0 %v754_v14, %s1552_s7 }
 0x123   : > { %v760_v23 = vadd.f32 %v759_v21, %v696_v22 }
 0x125   : > { %820 = vrot.lane.b32.xlu1 %v760_v23, %s1552_s7 }
 0x126   : > { %818 = vrot.lane.b32.xlu0 %v756_v17, %s1552_s7  ;;  %v700_v24 = vpop.f32.mrb[4].mxu1 }
 0x127   : > { %v763_v25 = vpop.f32.mrb[4].mxu0  ;;  %v702_v27 = vpop.f32.mrb[5].mxu1 }
 0x128   : > { %v764_v26 = vadd.f32 %v763_v25, %v700_v24  ;;  %v765_v28 = vpop.f32.mrb[5].mxu0  ;;  %v704_v30 = vpop.f32.mrb[6].mxu1 }
 0x129   : > { %v766_v29 = vadd.f32 %v765_v28, %v702_v27  ;;  %v767_v31 = vpop.f32.mrb[6].mxu0  ;;  %v706_v34 = vpop.f32.mrb[7].mxu1 }
 0x12a   : > { %v768_v32 = vadd.f32 %v767_v31, %v704_v30  ;;  %v769_v33 = vpop.f32.mrb[7].mxu0  ;;  %790 = vrot.lane.b32.xlu0 %v758_v20, %s1552_s7  ;;  %792 = vrot.lane.b32.xlu1 %v764_v26, %s1552_s7 }
 0x12b   : > { %v770_v35 = vadd.f32 %v769_v33, %v706_v34 }
 0x12e   : > { %822 = vrot.lane.b32.xlu0 %v766_v29, %s1552_s7  ;;  %794 = vrot.lane.b32.xlu1 %v768_v32, %s1552_s7  ;;  %v710_v36 = vpop.f32.mrb[8].mxu1 }
 0x12f   : > { %v773_v37 = vpop.f32.mrb[8].mxu0  ;;  %v712_v39 = vpop.f32.mrb[9].mxu1 }
 0x130   : > { %v774_v38 = vadd.f32 %v773_v37, %v710_v36  ;;  %v775_v40 = vpop.f32.mrb[9].mxu0  ;;  %v714_v42 = vpop.f32.mrb[10].mxu1 }
 0x131   : > { %v776_v41 = vadd.f32 %v775_v40, %v712_v39  ;;  %v777_v43 = vpop.f32.mrb[10].mxu0  ;;  %v716_v46 = vpop.f32.mrb[11].mxu1 }
 0x132   : > { %v778_v44 = vadd.f32 %v777_v43, %v714_v42  ;;  %v779_v45 = vpop.f32.mrb[11].mxu0  ;;  %824 = vrot.lane.b32.xlu1 %v770_v35, %s1552_s7  ;;  %796 = vrot.lane.b32.xlu0 %v774_v38, %s1552_s7 }
 0x133   : > { %v780_v47 = vadd.f32 %v779_v45, %v716_v46 }
 0x136   : > { %826 = vrot.lane.b32.xlu0 %v776_v41, %s1552_s7  ;;  %798 = vrot.lane.b32.xlu1 %v778_v44, %s1552_s7 }
 0x13a   : > { %828 = vrot.lane.b32.xlu1 %v780_v47, %s1552_s7 }
 0x194   : > { %v789_v48 = vpop.permute.xlu0 %788 }
 0x195   : > { %v806_v51 = vmax.f32 %v754_v14, %v789_v48 }
 0x197   : > { %v821_v49 = vpop.permute.xlu1 %820 }
 0x198   : > { %v819_v50 = vpop.permute.xlu0 %818  ;;  %v837_v57 = vmax.f32 %v760_v23, %v821_v49 }
 0x199   : > { %v836_v52 = vmax.f32 %v756_v17, %v819_v50 }
 0x19b   : > { %v842_v54 = vmax.f32 %v806_v51, %v836_v52 }
 0x19c   : > { %v791_v55 = vpop.permute.xlu0 %790  ;;  %v793_v56 = vpop.permute.xlu1 %792 }
 0x19d   : > { %v855_v58 = vadd.f32 %v1216_v53, %v842_v54  ;;  %v807_v59 = vmax.f32 %v758_v20, %v791_v55  ;;  %v808_v2 = vmax.f32 %v764_v26, %v793_v56 }
 0x19f   : > { %v861_v60 = vmax.f32 %v855_v58, 0.0  ;;  %v843_v61 = vmax.f32 %v807_v59, %v837_v57 }
 0x1a0   : > { %v823_v62 = vpop.permute.xlu0 %822  ;;  %v795_v63 = vpop.permute.xlu1 %794 }
 0x1a1   : > { %v1236_v0 = vpack.c.bf16 %v861_v60, %v861_v60  ;;  %v856_v1 = vadd.f32 %v1216_v53, %v843_v61  ;;  %v838_v3 = vmax.f32 %v766_v29, %v823_v62  ;;  %v809_v10 = vmax.f32 %v768_v32, %v795_v63 }
 0x1a3   : > { %892 = vst.msk [vmem:[%s1832_s12] sm:$0xf] %vm891_vm0, %v1236_v0  ;;  %v862_v4 = vmax.f32 %v856_v1, 0.0  ;;  %v844_v5 = vmax.f32 %v808_v2, %v838_v3 }
 0x1a4   : > { %v825_v6 = vpop.permute.xlu1 %824  ;;  %v797_v7 = vpop.permute.xlu0 %796 }
 0x1a5   : > { %v1237_v8 = vpack.c.bf16 %v862_v4, %v862_v4  ;;  %v857_v9 = vadd.f32 %v1216_v53, %v844_v5  ;;  %v839_v11 = vmax.f32 %v770_v35, %v825_v6  ;;  %v810_v18 = vmax.f32 %v774_v38, %v797_v7 }
 0x1a7   : > { %893 = vst.msk [vmem:[%s1832_s12 + $0x4] sm:$0xf] %vm891_vm0, %v1237_v8  ;;  %v863_v12 = vmax.f32 %v857_v9, 0.0  ;;  %v845_v13 = vmax.f32 %v809_v10, %v839_v11 }
 0x1a8   : > { %v827_v14 = vpop.permute.xlu0 %826  ;;  %v799_v15 = vpop.permute.xlu1 %798 }
 0x1a9   : > { %v1238_v16 = vpack.c.bf16 %v863_v12, %v863_v12  ;;  %v858_v17 = vadd.f32 %v1216_v53, %v845_v13  ;;  %v840_v19 = vmax.f32 %v776_v41, %v827_v14  ;;  %v811_v25 = vmax.f32 %v778_v44, %v799_v15 }
 0x1ab   : > { %894 = vst.msk [vmem:[%s1832_s12 + $0x8] sm:$0xf] %vm891_vm0, %v1238_v16  ;;  %v864_v20 = vmax.f32 %v858_v17, 0.0  ;;  %v846_v21 = vmax.f32 %v810_v18, %v840_v19 }
 0x1ac   : > { %v829_v22 = vpop.permute.xlu1 %828 }
 0x1ad   : > { %v1239_v23 = vpack.c.bf16 %v864_v20, %v864_v20  ;;  %v859_v24 = vadd.f32 %v1216_v53, %v846_v21  ;;  %v841_v26 = vmax.f32 %v780_v47, %v829_v22 }
 0x1af   : > { %895 = vst.msk [vmem:[%s1832_s12 + $0xc] sm:$0xf] %vm891_vm0, %v1239_v23  ;;  %v865_v27 = vmax.f32 %v859_v24, 0.0  ;;  %v847_v28 = vmax.f32 %v811_v25, %v841_v26 }
 0x1b1   : > { %v1240_v29 = vpack.c.bf16 %v865_v27, %v865_v27  ;;  %v860_v30 = vadd.f32 %v1216_v53, %v847_v28  ;;  %904 = sbr.rel (!%p1598_p4) target bundleno = 504 (0x1f8), region = 36 }
 0x1b3   : > { %896 = vst.msk [vmem:[%s1832_s12 + $0x10] sm:$0xf] %vm891_vm0, %v1240_v29  ;;  %v866_v31 = vmax.f32 %v860_v30, 0.0 }
 0x1b5   : > { %v1241_v32 = vpack.c.bf16 %v866_v31, %v866_v31 }
 0x1b7   : > { %897 = vst.msk [vmem:[%s1832_s12 + $0x14] sm:$0xf] %vm891_vm0, %v1241_v32 }
 0x1b8   : > { %s1914_s11 = smov (!%p907_p8, %s906_s11), 6 }
 0x1b9   : > { %s1223_s23 = sshll.u32 %s1914_s11, 6 }
 0x1ba   : > { %p1226_p9 = scmp.eq.s32.totalorder %s1223_s23, 0 }
 0x1bb   : > { %1460 = sdivrem.u32 (!%p1226_p9), %s1914_s11, 6 }
 0x1bc   : > { %915 = sbr.rel (%p1226_p9) target bundleno = 504 (0x1f8), region = 40 }
 0x1c4   : > { %s1859_s20 = spop.drf %1460 }
 0x1c5   : > { %p1227_p10 = scmp.le.s32.totalorder %s1859_s20, 0 }
 0x1c6   : > { %s1907_s15 = smov (!%p1227_p10), %s1853_s22  ;;  %s1908_s14 = smov (!%p1227_p10), %s1832_s12 }
 0x1c7   : > { %1090 = sbr.rel (%p1227_p10) target bundleno = 475 (0x1db), region = 112  ;;  %s1868_s24 = smov (!%p1227_p10), 0  }
 0x1c8   : > { %s1870_s25 = smov (!%p1227_p10), 0  }
 0x1ce LB: >> { %v932_v33 = vld [vmem:[%s1526_s14] sm:$0xf]  ;;  %v934_v34 = vld [vmem:[%s1526_s14 + $0x4] sm:$0xf]  ;;  %v936_v35 = vld [vmem:[%s1526_s14 + $0x8] sm:$0xf]  ;;  %s1534_s25 = sphi %s1870_s25, %s926_s25   ;;  %s1530_s24 = sphi %s1868_s24, %s1909_s24   ;;  %s1526_s14 = sphi %s1908_s14, %s949_s14   ;;  %s1522_s15 = sphi %s1907_s15, %s950_s15  }
 0x1cf   : >> { %933 = vst [vmem:[%s1522_s15] sm:$0xf] %v932_v33  ;;  %935 = vst [vmem:[%s1522_s15 + $0x4] sm:$0xf] %v934_v34  ;;  %v938_v36 = vld [vmem:[%s1526_s14 + $0xc] sm:$0xf]  ;;  %s944_s26 = sadd.s32 1, %s1530_s24 }
 0x1d0   : >> { %937 = vst [vmem:[%s1522_s15 + $0x8] sm:$0xf] %v936_v35  ;;  %v940_v37 = vld [vmem:[%s1526_s14 + $0x10] sm:$0xf]  ;;  %v942_v38 = vld [vmem:[%s1526_s14 + $0x14] sm:$0xf]  ;;  %p945_p11 = scmp.ge.s32.totalorder %s944_s26, %s1859_s20 }
 0x1d1   : >> { %939 = vst [vmem:[%s1522_s15 + $0xc] sm:$0xf] %v938_v36  ;;  %941 = vst [vmem:[%s1522_s15 + $0x10] sm:$0xf] %v940_v37  ;;  %s926_s25 = sadd.s32 1, %s1534_s25  }
 0x1d2   : >> { %943 = vst [vmem:[%s1522_s15 + $0x14] sm:$0xf] %v942_v38  ;;  %s1916_s26 = smov (%p945_p11, %s944_s26), 0  ;;  %p925_p12 = scmp.ge.s32.totalorder %s926_s25, %s1859_s20 }
 0x1d3   : >> { %s947_s27 = smul.u32 24, %s1916_s26  ;;  %s1909_s24 = smov %s1916_s26 }
 0x1d4   : > { %928 = sbr.rel (!%p925_p12) target bundleno = 462 (0x1ce), region = 118 }
 0x1d5   : >> { %s949_s14 = scalar_lea.vmem %s1832_s12, %s947_s27 [#allocation2]   ;;  %s950_s15 = scalar_lea.vmem %s1853_s22, %s947_s27  }
 0x1db PF: > { %1462 = sdivrem.u32 %s1914_s11, 6 }
 0x1dc   : > { %s1228_s28 = smul.u32 24, %s1859_s20 }
 0x1de   : > { %s955_s29 = scalar_lea.vmem %s1832_s12, %s1228_s28 [#allocation2]   ;;  %s957_s30 = scalar_lea.vmem %s1853_s22, %s1228_s28  }
 0x1e4   : > { %s1463_s4 = spop.drf %1462 }
 0x1e5   : > { %p1230_p13 = scmp.le.s32.totalorder %s1463_s4, 0 }
 0x1e6   : > { %s1536_s5 = smov (!%p1230_p13), %s957_s30   ;;  %s1540_s7 = smov (!%p1230_p13), %s955_s29  }
 0x1e7   : > { %1104 = sbr.rel (%p1230_p13) target bundleno = 504 (0x1f8), region = 123  ;;  %s1544_s6 = smov (!%p1230_p13), 0  }
 0x1e8   : > { %s1548_s8 = smov (!%p1230_p13), 0  }
 0x1ee LB: >> { %v967_v39 = vld [vmem:[%s1542_s7] sm:$0xf]  ;;  %s969_s9 = sadd.s32 1, %s1546_s6  ;;  %s961_s8 = sadd.s32 1, %s1550_s8   ;;  %s1550_s8 = sphi %s1548_s8, %s961_s8   ;;  %s1546_s6 = sphi %s1544_s6, %s1545_s6   ;;  %s1542_s7 = sphi %s1540_s7, %s974_s7   ;;  %s1538_s5 = sphi %s1536_s5, %s975_s5  }
 0x1ef   : >> { %968 = vst [vmem:[%s1538_s5] sm:$0xf] %v967_v39  ;;  %p970_p0 = scmp.ge.s32.totalorder %s969_s9, %s1463_s4  ;;  %p960_p1 = scmp.ge.s32.totalorder %s961_s8, %s1463_s4 }
 0x1f1   : >> { %s1918_s9 = smov (%p970_p0, %s969_s9), 0  ;;  %963 = sbr.rel (!%p960_p1) target bundleno = 494 (0x1ee), region = 129 }
 0x1f2   : >> { %s1231_s10 = sshll.u32 %s1918_s9, 2  ;;  %s1545_s6 = smov %s1918_s9  }
 0x1f3   : >> { %s974_s7 = scalar_lea.vmem %s955_s29, %s1231_s10 [#allocation2]   ;;  %s975_s5 = scalar_lea.vmem %s957_s30, %s1231_s10  }
 0x1f8 PF: > { %p10_p2 = scmp.ge.s32.totalorder %s1588_s16, 4   ;;  %s1910_s12 = smov %s1514_s13 }
 0x1f9   : > { %s1911_s13 = smov %s1596_s19  ;;  %s1912_s14 = smov %s1588_s16 }
 0x1fa   :  { %12 = sbr.rel (!%p10_p2) target bundleno = 2 (0x2), region = 140 }

// kernel: fashion_cnn_forward.5
= control target key start
LH: loop header
LB: loop body
LE: loop exit
PB: predicated region body
PF: predicated region fallthrough
CT: control target
= control target key end

     0   :  { %12 = vsyncpa [#allocation4], 0  ;;  %v918_v38 = vlaneseq  ;;  %v9062_v39 = vmov 1966171168   ;;  %vm9064_vm0 = vmmov 0   ;;  %s11699_s0 = inlined_call_operand.vmem [shape: bf16[2,2304], index: 0, kind: input, shape index: {}]   ;;  %s11700_s1 = inlined_call_operand.vmem [shape: bf16[2304,640], index: 1, kind: input, shape index: {}]   ;;  %s11701_s2 = inlined_call_operand.vmem [shape: f32[1,640], index: 2, kind: input, shape index: {}]   ;;  %s11702_s3 = inlined_call_operand.vmem [shape: bf16[640,128], index: 3, kind: input, shape index: {}]   ;;  %s11703_s4 = inlined_call_operand.vmem [shape: f32[1,128], index: 4, kind: input, shape index: {}]   ;;  %s11704_s5 = inlined_call_operand.vmem [shape: bf16[128,128], index: 5, kind: input, shape index: {}]   ;;  %s11705_s6 = inlined_call_operand.vmem [shape: f32[1,128], index: 6, kind: input, shape index: {}]   ;;  %s11706_s7 = inlined_call_operand.hbm [shape: f32[2,128], index: 7, kind: output, shape index: {}]  }
   0x1   :  { %v7954_v0 = vld [vmem:[%s11700_s1 + $0x4] ss:$20 sps:$4 sm:$0xff]   ;;  %v7956_v1 = vld [vmem:[%s11700_s1 + $0xc] ss:$20 sps:$4 sm:$0xff]   ;;  %v7959_v3 = vld [vmem:[%s11700_s1 + $0x8] ss:$20 sps:$4 sm:$0xff]   ;;  %v976_v40 = vunpack.c.l.s4 %v9062_v39 }
   0x2   :  { %v7958_v2 = vld [vmem:[%s11700_s1] ss:$20 sps:$4 sm:$0xff]   ;;  %5067 = vmatprep.subr.bf16.mxu0 %v7954_v0  ;;  %5454 = vmatprep.subr.bf16.mxu1 %v7956_v1  ;;  %v7964_v6 = vld [vmem:[%s11700_s1 + $0x28] ss:$20 sps:$4 sm:$0xff]   ;;  %v7965_v7 = vld [vmem:[%s11700_s1 + $0x30] ss:$20 sps:$4 sm:$0xff]  }
   0x3   :  { %v7960_v4 = vld [vmem:[%s11700_s1 + $0x2c] ss:$20 sps:$4 sm:$0xff]   ;;  %5068 = vmatpush1.bf16.msra.mxu0 %v7958_v2  ;;  %v7962_v5 = vld [vmem:[%s11700_s1 + $0x34] ss:$20 sps:$4 sm:$0xff]   ;;  %5455 = vmatpush1.bf16.msra.mxu1 %v7959_v3  ;;  %v7968_v9 = vld [vmem:[%s11700_s1 + $0x5c] ss:$20 sps:$4 sm:$0xff]   ;;  %v977_v47 = vunpack.c.0.s8 %v976_v40 }
   0x4   :  { %5069 = vmatprep.subr.bf16.mxu0 %v7960_v4  ;;  %5456 = vmatprep.subr.bf16.mxu1 %v7962_v5  ;;  %v7966_v8 = vld [vmem:[%s11700_s1 + $0x54] ss:$20 sps:$4 sm:$0xff]   ;;  %v7970_v10 = vld [vmem:[%s11700_s1 + $0x50] ss:$20 sps:$4 sm:$0xff]   ;;  %v7971_v11 = vld [vmem:[%s11700_s1 + $0x58] ss:$20 sps:$4 sm:$0xff]  }
   0x5   :  { %v7972_v12 = vld [vmem:[%s11700_s1 + $0x7c] ss:$20 sps:$4 sm:$0xff]   ;;  %v7974_v13 = vld [vmem:[%s11700_s1 + $0x84] ss:$20 sps:$4 sm:$0xff]   ;;  %v7977_v15 = vld [vmem:[%s11700_s1 + $0x80] ss:$20 sps:$4 sm:$0xff]  }
   0x6   :  { %v7976_v14 = vld [vmem:[%s11700_s1 + $0x78] ss:$20 sps:$4 sm:$0xff]   ;;  %v7982_v18 = vld [vmem:[%s11700_s1 + $0xa0] ss:$20 sps:$4 sm:$0xff]   ;;  %v7983_v19 = vld [vmem:[%s11700_s1 + $0xa8] ss:$20 sps:$4 sm:$0xff]  }
   0x7   :  { %5070 = vmatpush1.bf16.msra.mxu0 %v7964_v6  ;;  %5457 = vmatpush1.bf16.msra.mxu1 %v7965_v7  ;;  %v7978_v16 = vld [vmem:[%s11700_s1 + $0xa4] ss:$20 sps:$4 sm:$0xff]   ;;  %v7980_v17 = vld [vmem:[%s11700_s1 + $0xac] ss:$20 sps:$4 sm:$0xff]   ;;  %v7986_v21 = vld [vmem:[%s11700_s1 + $0xd4] ss:$20 sps:$4 sm:$0xff]  }
   0x8   :  { %5071 = vmatprep.subr.bf16.mxu0 %v7966_v8  ;;  %5458 = vmatprep.subr.bf16.mxu1 %v7968_v9  ;;  %v7984_v20 = vld [vmem:[%s11700_s1 + $0xcc] ss:$20 sps:$4 sm:$0xff]   ;;  %v7988_v22 = vld [vmem:[%s11700_s1 + $0xc8] ss:$20 sps:$4 sm:$0xff]   ;;  %v7989_v23 = vld [vmem:[%s11700_s1 + $0xd0] ss:$20 sps:$4 sm:$0xff]  }
   0x9   :  { %v7990_v24 = vld [vmem:[%s11700_s1 + $0xf4] ss:$20 sps:$4 sm:$0xff]   ;;  %v7992_v25 = vld [vmem:[%s11700_s1 + $0xfc] ss:$20 sps:$4 sm:$0xff]   ;;  %v7995_v27 = vld [vmem:[%s11700_s1 + $0xf8] ss:$20 sps:$4 sm:$0xff]  }
   0xa   :  { %v7994_v26 = vld [vmem:[%s11700_s1 + $0xf0] ss:$20 sps:$4 sm:$0xff]   ;;  %v8000_v30 = vld [vmem:[%s11700_s1 + $0x118] ss:$20 sps:$4 sm:$0xff]   ;;  %v8001_v31 = vld [vmem:[%s11700_s1 + $0x120] ss:$20 sps:$4 sm:$0xff]  }
   0xb   :  { %5072 = vmatpush1.bf16.msra.mxu0 %v7970_v10  ;;  %5459 = vmatpush1.bf16.msra.mxu1 %v7971_v11  ;;  %v7996_v28 = vld [vmem:[%s11700_s1 + $0x11c] ss:$20 sps:$4 sm:$0xff]   ;;  %v7998_v29 = vld [vmem:[%s11700_s1 + $0x124] ss:$20 sps:$4 sm:$0xff]   ;;  %v8004_v33 = vld [vmem:[%s11700_s1 + $0x14c] ss:$20 sps:$4 sm:$0xff]  }
   0xc   :  { %5073 = vmatprep.subr.bf16.mxu0 %v7972_v12  ;;  %5460 = vmatprep.subr.bf16.mxu1 %v7974_v13  ;;  %v8002_v32 = vld [vmem:[%s11700_s1 + $0x144] ss:$20 sps:$4 sm:$0xff]   ;;  %v8006_v34 = vld [vmem:[%s11700_s1 + $0x140] ss:$20 sps:$4 sm:$0xff]   ;;  %v8007_v35 = vld [vmem:[%s11700_s1 + $0x148] ss:$20 sps:$4 sm:$0xff]  }
   0xd   :  { %v8008_v36 = vld [vmem:[%s11700_s1 + $0x16c] ss:$20 sps:$4 sm:$0xff]   ;;  %v8010_v37 = vld [vmem:[%s11700_s1 + $0x174] ss:$20 sps:$4 sm:$0xff]   ;;  %v8013_v42 = vld [vmem:[%s11700_s1 + $0x170] ss:$20 sps:$4 sm:$0xff]  }
   0xe   :  { %v8012_v41 = vld [vmem:[%s11700_s1 + $0x168] ss:$20 sps:$4 sm:$0xff]   ;;  %v8018_v45 = vld [vmem:[%s11700_s1 + $0x190] ss:$20 sps:$4 sm:$0xff]   ;;  %v9237_v46 = vshrl.u32 %v918_v38, 7 }
   0xf   :  { %5074 = vmatpush1.bf16.msra.mxu0 %v7976_v14  ;;  %5461 = vmatpush1.bf16.msra.mxu1 %v7977_v15  ;;  %v8014_v43 = vld [vmem:[%s11700_s1 + $0x194] ss:$20 sps:$4 sm:$0xff]   ;;  %v8016_v44 = vld [vmem:[%s11700_s1 + $0x19c] ss:$20 sps:$4 sm:$0xff]   ;;  %v8019_v48 = vld [vmem:[%s11700_s1 + $0x198] ss:$20 sps:$4 sm:$0xff]  }
  0x10   :  { %5075 = vmatprep.subr.bf16.mxu0 %v7978_v16  ;;  %5462 = vmatprep.subr.bf16.mxu1 %v7980_v17  ;;  %v8020_v49 = vld [vmem:[%s11700_s1 + $0x1bc] ss:$20 sps:$4 sm:$0xff]   ;;  %v8022_v50 = vld [vmem:[%s11700_s1 + $0x1c4] ss:$20 sps:$4 sm:$0xff]   ;;  %v8025_v52 = vld [vmem:[%s11700_s1 + $0x1c0] ss:$20 sps:$4 sm:$0xff]   ;;  %v9258_v54 = vsub.s32 %v977_v47, %v9237_v46 }
  0x11   :  { %v8024_v51 = vld [vmem:[%s11700_s1 + $0x1b8] ss:$20 sps:$4 sm:$0xff]   ;;  %v8050_v56 = vld [vmem:[%s11699_s0] ss:$18 sps:$4 sm:$0xff]   ;;  %v8031_v1 = vld [vmem:[%s11700_s1 + $0x1e8] ss:$20 sps:$4 sm:$0xff]  }
  0x12   :  { %v8026_v53 = vld [vmem:[%s11700_s1 + $0x1e4] ss:$20 sps:$4 sm:$0xff]   ;;  %v8028_v55 = vld [vmem:[%s11700_s1 + $0x1ec] ss:$20 sps:$4 sm:$0xff]   ;;  %v981_v60 = vrot.slane %v8050_v56, %v9258_v54  ;;  %v8034_v3 = vld [vmem:[%s11700_s1 + $0x214] ss:$20 sps:$4 sm:$0xff]  }
  0x13   :  { %5076 = vmatpush1.bf16.msra.mxu0 %v7982_v18  ;;  %5463 = vmatpush1.bf16.msra.mxu1 %v7983_v19  ;;  %v8052_v57 = vld [vmem:[%s11699_s0 + $0x24] ss:$18 sps:$4 sm:$0xff]   ;;  %v8054_v58 = vld [vmem:[%s11699_s0 + $0x48] ss:$18 sps:$4 sm:$0xff]   ;;  %v8056_v59 = vld [vmem:[%s11699_s0 + $0x6c] ss:$18 sps:$4 sm:$0xff]  }
  0x14   :  { %5077 = vmatprep.subr.bf16.mxu0 %v7984_v20  ;;  %5464 = vmatprep.subr.bf16.mxu1 %v7986_v21  ;;  %v8030_v61 = vld [vmem:[%s11700_s1 + $0x1e0] ss:$20 sps:$4 sm:$0xff]   ;;  %v995_v62 = vrot.slane %v8052_v57, %v9258_v54  ;;  %v1009_v63 = vrot.slane %v8054_v58, %v9258_v54  ;;  %v1023_v0 = vrot.slane %v8056_v59, %v9258_v54  ;;  %v8036_v8 = vld [vmem:[%s11700_s1 + $0x208] ss:$20 sps:$4 sm:$0xff]   ;;  %v8037_v13 = vld [vmem:[%s11700_s1 + $0x210] ss:$20 sps:$4 sm:$0xff]  }
  0x15   :  { %v8032_v2 = vld [vmem:[%s11700_s1 + $0x20c] ss:$20 sps:$4 sm:$0xff]   ;;  %v8038_v14 = vld [vmem:[%s11700_s1 + $0x234] ss:$20 sps:$4 sm:$0xff]   ;;  %v8040_v15 = vld [vmem:[%s11700_s1 + $0x23c] ss:$20 sps:$4 sm:$0xff]  }
  0x16   :  { %v1032_v4 = vcombine.high %v981_v60, %v995_v62  ;;  %v1036_v5 = vcombine.high %v1009_v63, %v1023_v0  ;;  %v1031_v6 = vcombine.low %v981_v60, %v995_v62  ;;  %v1035_v7 = vcombine.low %v1009_v63, %v1023_v0  ;;  %v8042_v18 = vld [vmem:[%s11700_s1 + $0x230] ss:$20 sps:$4 sm:$0xff]   ;;  %v8043_v19 = vld [vmem:[%s11700_s1 + $0x238] ss:$20 sps:$4 sm:$0xff]   ;;  %v8103_v59 = vld [vmem:[%s11700_s1 + $0x3a0] ss:$20 sps:$4 sm:$0xff]  }
  0x17   :  { %5078 = vmatpush1.bf16.msra.mxu0 %v7988_v22  ;;  %5465 = vmatpush1.bf16.msra.mxu1 %v7989_v23  ;;  %v8044_v20 = vld [vmem:[%s11700_s1 + $0x25c] ss:$20 sps:$4 sm:$0xff]   ;;  %v8046_v21 = vld [vmem:[%s11700_s1 + $0x264] ss:$20 sps:$4 sm:$0xff]   ;;  %v8049_v23 = vld [vmem:[%s11700_s1 + $0x260] ss:$20 sps:$4 sm:$0xff]  }
  0x18   :  { %5079 = vmatprep.subr.bf16.mxu0 %v7990_v24  ;;  %5466 = vmatprep.subr.bf16.mxu1 %v7992_v25  ;;  %v1059_v9 = vrot.slane %v1032_v4, %v9258_v54  ;;  %v1087_v10 = vrot.slane %v1036_v5, %v9258_v54  ;;  %v1045_v11 = vrot.slane %v1031_v6, %v9258_v54  ;;  %v8048_v22 = vld [vmem:[%s11700_s1 + $0x258] ss:$20 sps:$4 sm:$0xff]   ;;  %v8078_v38 = vld [vmem:[%s11700_s1 + $0x2fc] ss:$20 sps:$4 sm:$0xff]   ;;  %v8106_v62 = vld [vmem:[%s11700_s1 + $0x3c0] ss:$20 sps:$4 sm:$0xff]  }
  0x19   :  { %v1073_v12 = vrot.slane %v1035_v7, %v9258_v54  ;;  %v8060_v24 = vld [vmem:[%s11700_s1 + $0x284] ss:$20 sps:$4 sm:$0xff]   ;;  %v8063_v25 = vld [vmem:[%s11700_s1 + $0x28c] ss:$20 sps:$4 sm:$0xff]   ;;  %v8102_v56 = vld [vmem:[%s11700_s1 + $0x39c] ss:$20 sps:$4 sm:$0xff]  }
  0x1a   :  { %v9307_v16 = vcombine.low %v1059_v9, %v1087_v10  ;;  %v8081_v39 = vld [vmem:[%s11700_s1 + $0x304] ss:$20 sps:$4 sm:$0xff]   ;;  %v8090_v47 = vld [vmem:[%s11700_s1 + $0x34c] ss:$20 sps:$4 sm:$0xff]   ;;  %v8109_v63 = vld [vmem:[%s11700_s1 + $0x3c8] ss:$20 sps:$4 sm:$0xff]  }
  0x1b   :  { %5080 = vmatpush1.bf16.msra.mxu0 %v7994_v26  ;;  %5467 = vmatpush1.bf16.msra.mxu1 %v7995_v27  ;;  %v9309_v17 = vcombine.high %v1045_v11, %v1073_v12  ;;  %v9337_v26 = vcombine.low %v1045_v11, %v1073_v12  ;;  %v8058_v27 = vld [vmem:[%s11700_s1 + $0x280] ss:$20 sps:$4 sm:$0xff]   ;;  %v8076_v40 = vld [vmem:[%s11700_s1 + $0x2f8] ss:$20 sps:$4 sm:$0xff]   ;;  %v8123_v5 = vld [vmem:[%s11700_s1 + $0x41c] ss:$20 sps:$4 sm:$0xff]  }
  0x1c   :  { %5081 = vmatprep.subr.bf16.mxu0 %v7996_v28  ;;  %5468 = vmatprep.subr.bf16.mxu1 %v7998_v29  ;;  %v8061_v28 = vld [vmem:[%s11700_s1 + $0x288] ss:$20 sps:$4 sm:$0xff]   ;;  %v8066_v29 = vld [vmem:[%s11700_s1 + $0x2ac] ss:$20 sps:$4 sm:$0xff]   ;;  %v8105_v57 = vld [vmem:[%s11700_s1 + $0x3a4] ss:$20 sps:$4 sm:$0xff]  }
  0x1d   :  { %5099 = vmatprep.mubr.bf16.mxu0 %v9307_v16  ;;  %5486 = vmatprep.mubr.bf16.mxu1 %v9307_v16  ;;  %v8100_v58 = vld [vmem:[%s11700_s1 + $0x398] ss:$20 sps:$4 sm:$0xff]   ;;  %v8120_v4 = vld [vmem:[%s11700_s1 + $0x414] ss:$20 sps:$4 sm:$0xff]   ;;  %v8118_v6 = vld [vmem:[%s11700_s1 + $0x410] ss:$20 sps:$4 sm:$0xff]  }
  0x1e   :  { %v8108_v60 = vld [vmem:[%s11700_s1 + $0x3c4] ss:$20 sps:$4 sm:$0xff]   ;;  %v8114_v0 = vld [vmem:[%s11700_s1 + $0x3ec] ss:$20 sps:$4 sm:$0xff]  }
  0x1f   :  { %5082 = vmatpush1.bf16.msra.mxu0 %v8000_v30  ;;  %5469 = vmatpush1.bf16.msra.mxu1 %v8001_v31  ;;  %v8069_v30 = vld [vmem:[%s11700_s1 + $0x2b4] ss:$20 sps:$4 sm:$0xff]   ;;  %v9351_v31 = vcombine.high %v1059_v9, %v1087_v10  ;;  %v8121_v7 = vld [vmem:[%s11700_s1 + $0x418] ss:$20 sps:$4 sm:$0xff]  }
  0x20   :  { %5083 = vmatprep.subr.bf16.mxu0 %v8002_v32  ;;  %5470 = vmatprep.subr.bf16.mxu1 %v8004_v33  ;;  %v8064_v32 = vld [vmem:[%s11700_s1 + $0x2a8] ss:$20 sps:$4 sm:$0xff]   ;;  %v8067_v33 = vld [vmem:[%s11700_s1 + $0x2b0] ss:$20 sps:$4 sm:$0xff]   ;;  %v8124_v10 = vld [vmem:[%s11700_s1 + $0x438] ss:$20 sps:$4 sm:$0xff]  }
  0x21   :  { %v8129_v9 = vld [vmem:[%s11700_s1 + $0x444] ss:$20 sps:$4 sm:$0xff]   ;;  %v8127_v11 = vld [vmem:[%s11700_s1 + $0x440] ss:$20 sps:$4 sm:$0xff]  }
  0x22   :  { %v8132_v12 = vld [vmem:[%s11700_s1 + $0x464] ss:$20 sps:$4 sm:$0xff]  }
  0x23   :  { %5084 = vmatpush1.bf16.msra.mxu0 %v8006_v34  ;;  %5471 = vmatpush1.bf16.msra.mxu1 %v8007_v35  ;;  %v8072_v34 = vld [vmem:[%s11700_s1 + $0x2d4] ss:$20 sps:$4 sm:$0xff]   ;;  %v8075_v35 = vld [vmem:[%s11700_s1 + $0x2dc] ss:$20 sps:$4 sm:$0xff]  }
  0x24   :  { %5085 = vmatprep.subr.bf16.mxu0 %v8008_v36  ;;  %5472 = vmatprep.subr.bf16.mxu1 %v8010_v37  ;;  %v8070_v36 = vld [vmem:[%s11700_s1 + $0x2d0] ss:$20 sps:$4 sm:$0xff]   ;;  %v8073_v37 = vld [vmem:[%s11700_s1 + $0x2d8] ss:$20 sps:$4 sm:$0xff]  }
  0x27   :  { %5086 = vmatpush1.bf16.msra.mxu0 %v8012_v41  ;;  %5473 = vmatpush1.bf16.msra.mxu1 %v8013_v42  ;;  %v8079_v41 = vld [vmem:[%s11700_s1 + $0x300] ss:$20 sps:$4 sm:$0xff]   ;;  %v8084_v42 = vld [vmem:[%s11700_s1 + $0x324] ss:$20 sps:$4 sm:$0xff]  }
  0x28   :  { %5087 = vmatprep.subr.bf16.mxu0 %v8014_v43  ;;  %5474 = vmatprep.subr.bf16.mxu1 %v8016_v44  ;;  %v8087_v43 = vld [vmem:[%s11700_s1 + $0x32c] ss:$20 sps:$4 sm:$0xff]  }
  0x29   :  { %v8082_v44 = vld [vmem:[%s11700_s1 + $0x320] ss:$20 sps:$4 sm:$0xff]  }
  0x2b   :  { %5088 = vmatpush1.bf16.msra.mxu0 %v8018_v45  ;;  %5475 = vmatpush1.bf16.msra.mxu1 %v8019_v48  ;;  %v8085_v45 = vld [vmem:[%s11700_s1 + $0x328] ss:$20 sps:$4 sm:$0xff]  }
  0x2c   :  { %5089 = vmatprep.subr.bf16.mxu0 %v8020_v49  ;;  %5476 = vmatprep.subr.bf16.mxu1 %v8022_v50  ;;  %v8093_v48 = vld [vmem:[%s11700_s1 + $0x354] ss:$20 sps:$4 sm:$0xff]   ;;  %v8091_v50 = vld [vmem:[%s11700_s1 + $0x350] ss:$20 sps:$4 sm:$0xff]  }
  0x2d   :  { %v8088_v49 = vld [vmem:[%s11700_s1 + $0x348] ss:$20 sps:$4 sm:$0xff]  }
  0x2f   :  { %5090 = vmatpush1.bf16.msra.mxu0 %v8024_v51  ;;  %5477 = vmatpush1.bf16.msra.mxu1 %v8025_v52  ;;  %v8096_v51 = vld [vmem:[%s11700_s1 + $0x374] ss:$20 sps:$4 sm:$0xff]   ;;  %v8099_v52 = vld [vmem:[%s11700_s1 + $0x37c] ss:$20 sps:$4 sm:$0xff]  }
  0x30   :  { %5091 = vmatprep.subr.bf16.mxu0 %v8026_v53  ;;  %5478 = vmatprep.subr.bf16.mxu1 %v8028_v55  ;;  %v8094_v53 = vld [vmem:[%s11700_s1 + $0x370] ss:$20 sps:$4 sm:$0xff]   ;;  %v8097_v55 = vld [vmem:[%s11700_s1 + $0x378] ss:$20 sps:$4 sm:$0xff]  }
  0x33   :  { %5092 = vmatpush1.bf16.msra.mxu0 %v8030_v61  ;;  %5479 = vmatpush1.bf16.msra.mxu1 %v8031_v1  ;;  %v8111_v61 = vld [vmem:[%s11700_s1 + $0x3cc] ss:$20 sps:$4 sm:$0xff]   ;;  %v8117_v1 = vld [vmem:[%s11700_s1 + $0x3f4] ss:$20 sps:$4 sm:$0xff]  }
  0x34   :  { %5093 = vmatprep.subr.bf16.mxu0 %v8032_v2  ;;  %5480 = vmatprep.subr.bf16.mxu1 %v8034_v3  ;;  %v8112_v2 = vld [vmem:[%s11700_s1 + $0x3e8] ss:$20 sps:$4 sm:$0xff]   ;;  %v8115_v3 = vld [vmem:[%s11700_s1 + $0x3f0] ss:$20 sps:$4 sm:$0xff]  }
  0x37   :  { %5094 = vmatpush1.bf16.msra.mxu0 %v8036_v8  ;;  %5481 = vmatpush1.bf16.msra.mxu1 %v8037_v13  ;;  %v8126_v8 = vld [vmem:[%s11700_s1 + $0x43c] ss:$20 sps:$4 sm:$0xff]   ;;  %v8135_v13 = vld [vmem:[%s11700_s1 + $0x46c] ss:$20 sps:$4 sm:$0xff]  }
  0x38   :  { %5095 = vmatprep.subr.bf16.mxu0 %v8038_v14  ;;  %5482 = vmatprep.subr.bf16.mxu1 %v8040_v15  ;;  %v8130_v14 = vld [vmem:[%s11700_s1 + $0x460] ss:$20 sps:$4 sm:$0xff]   ;;  %v8133_v15 = vld [vmem:[%s11700_s1 + $0x468] ss:$20 sps:$4 sm:$0xff]  }
  0x3b   :  { %5096 = vmatpush1.bf16.msra.mxu0 %v8042_v18  ;;  %5483 = vmatpush1.bf16.msra.mxu1 %v8043_v19  ;;  %v8138_v18 = vld [vmem:[%s11700_s1 + $0x48c] ss:$20 sps:$4 sm:$0xff]   ;;  %v8141_v19 = vld [vmem:[%s11700_s1 + $0x494] ss:$20 sps:$4 sm:$0xff]  }
  0x3c   :  { %5097 = vmatprep.subr.bf16.mxu0 %v8044_v20  ;;  %5484 = vmatprep.subr.bf16.mxu1 %v8046_v21  ;;  %v8136_v20 = vld [vmem:[%s11700_s1 + $0x488] ss:$20 sps:$4 sm:$0xff]   ;;  %v8139_v21 = vld [vmem:[%s11700_s1 + $0x490] ss:$20 sps:$4 sm:$0xff]  }
  0x3f   :  { %5098 = vmatpush1.bf16.msra.mxu0 %v8048_v22  ;;  %5485 = vmatpush1.bf16.msra.mxu1 %v8049_v23  ;;  %v8144_v22 = vld [vmem:[%s11700_s1 + $0x4b4] ss:$20 sps:$4 sm:$0xff]   ;;  %v8147_v23 = vld [vmem:[%s11700_s1 + $0x4bc] ss:$20 sps:$4 sm:$0xff]  }
  0x40   :  { %5110 = vmatprep.subr.bf16.mxu0 %v8060_v24  ;;  %5497 = vmatprep.subr.bf16.mxu1 %v8063_v25  ;;  %v8142_v24 = vld [vmem:[%s11700_s1 + $0x4b0] ss:$20 sps:$4 sm:$0xff]   ;;  %v8145_v25 = vld [vmem:[%s11700_s1 + $0x4b8] ss:$20 sps:$4 sm:$0xff]  }
  0x42   :  { %5100 = vmatmul.mubr.bf16.vlgmr.msra.gmra.mrb[0].mxu0 %v9337_v26  ;;  %5487 = vmatmul.mubr.bf16.vlgmr.msra.gmra.mrb[0].mxu1 %v9337_v26 }
  0x43   :  { %5111 = vmatpush1.bf16.msra.mxu0 %v8058_v27  ;;  %5498 = vmatpush1.bf16.msra.mxu1 %v8061_v28  ;;  %v8150_v27 = vld [vmem:[%s11700_s1 + $0x4dc] ss:$20 sps:$4 sm:$0xff]   ;;  %v8153_v28 = vld [vmem:[%s11700_s1 + $0x4e4] ss:$20 sps:$4 sm:$0xff]  }
  0x44   :  { %5112 = vmatprep.subr.bf16.mxu0 %v8066_v29  ;;  %5499 = vmatprep.subr.bf16.mxu1 %v8069_v30  ;;  %v8148_v29 = vld [vmem:[%s11700_s1 + $0x4d8] ss:$20 sps:$4 sm:$0xff]   ;;  %v8151_v30 = vld [vmem:[%s11700_s1 + $0x4e0] ss:$20 sps:$4 sm:$0xff]  }
  0x45   :  { %5142 = vmatprep.mubr.bf16.mxu0 %v9351_v31  ;;  %5529 = vmatprep.mubr.bf16.mxu1 %v9351_v31 }
  0x47   :  { %5113 = vmatpush1.bf16.msra.mxu0 %v8064_v32  ;;  %5500 = vmatpush1.bf16.msra.mxu1 %v8067_v33  ;;  %v8156_v32 = vld [vmem:[%s11700_s1 + $0x504] ss:$20 sps:$4 sm:$0xff]   ;;  %v8159_v33 = vld [vmem:[%s11700_s1 + $0x50c] ss:$20 sps:$4 sm:$0xff]  }
  0x48   :  { %5114 = vmatprep.subr.bf16.mxu0 %v8072_v34  ;;  %5501 = vmatprep.subr.bf16.mxu1 %v8075_v35  ;;  %v8154_v34 = vld [vmem:[%s11700_s1 + $0x500] ss:$20 sps:$4 sm:$0xff]   ;;  %v8157_v35 = vld [vmem:[%s11700_s1 + $0x508] ss:$20 sps:$4 sm:$0xff]  }
  0x4b   :  { %5115 = vmatpush1.bf16.msra.mxu0 %v8070_v36  ;;  %5502 = vmatpush1.bf16.msra.mxu1 %v8073_v37  ;;  %v8162_v36 = vld [vmem:[%s11700_s1 + $0x52c] ss:$20 sps:$4 sm:$0xff]   ;;  %v8160_v37 = vld [vmem:[%s11700_s1 + $0x528] ss:$20 sps:$4 sm:$0xff]  }
  0x4c   :  { %5116 = vmatprep.subr.bf16.mxu0 %v8078_v38  ;;  %5503 = vmatprep.subr.bf16.mxu1 %v8081_v39  ;;  %v8165_v38 = vld [vmem:[%s11700_s1 + $0x534] ss:$20 sps:$4 sm:$0xff]   ;;  %v8163_v39 = vld [vmem:[%s11700_s1 + $0x530] ss:$20 sps:$4 sm:$0xff]  }
  0x4f   :  { %5117 = vmatpush1.bf16.msra.mxu0 %v8076_v40  ;;  %5504 = vmatpush1.bf16.msra.mxu1 %v8079_v41  ;;  %v8168_v40 = vld [vmem:[%s11700_s1 + $0x554] ss:$20 sps:$4 sm:$0xff]  }
  0x50   :  { %5118 = vmatprep.subr.bf16.mxu0 %v8084_v42  ;;  %5505 = vmatprep.subr.bf16.mxu1 %v8087_v43  ;;  %v8250_v41 = vld [vmem:[%s11699_s0 + $0x4] ss:$18 sps:$4 sm:$0xff]   ;;  %v8251_v42 = vld [vmem:[%s11699_s0 + $0x28] ss:$18 sps:$4 sm:$0xff]   ;;  %v8252_v43 = vld [vmem:[%s11699_s0 + $0x4c] ss:$18 sps:$4 sm:$0xff]  }
  0x53   :  { %5119 = vmatpush1.bf16.msra.mxu0 %v8082_v44  ;;  %5506 = vmatpush1.bf16.msra.mxu1 %v8085_v45  ;;  %v8253_v44 = vld [vmem:[%s11699_s0 + $0x70] ss:$18 sps:$4 sm:$0xff]  }
  0x54   :  { %5120 = vmatprep.subr.bf16.mxu0 %v8090_v47  ;;  %5507 = vmatprep.subr.bf16.mxu1 %v8093_v48  ;;  %v8171_v45 = vld [vmem:[%s11700_s1 + $0x55c] ss:$20 sps:$4 sm:$0xff]   ;;  %v988_v47 = vrot.slane %v8250_v41, %v9258_v54  ;;  %v1002_v48 = vrot.slane %v8251_v42, %v9258_v54  ;;  %v8231_v41 = vld [vmem:[%s11700_s1 + $0x6ec] ss:$20 sps:$4 sm:$0xff]  }
  0x55   :  { %v8226_v42 = vld [vmem:[%s11700_s1 + $0x6e0] ss:$20 sps:$4 sm:$0xff]  }
  0x57   :  { %5121 = vmatpush1.bf16.msra.mxu0 %v8088_v49  ;;  %5508 = vmatpush1.bf16.msra.mxu1 %v8091_v50  ;;  %v1016_v49 = vrot.slane %v8252_v43, %v9258_v54  ;;  %v1030_v50 = vrot.slane %v8253_v44, %v9258_v54  ;;  %v8229_v43 = vld [vmem:[%s11700_s1 + $0x6e8] ss:$20 sps:$4 sm:$0xff]   ;;  %v8234_v44 = vld [vmem:[%s11700_s1 + $0x70c] ss:$20 sps:$4 sm:$0xff]  }
  0x58   :  { %5122 = vmatprep.subr.bf16.mxu0 %v8096_v51  ;;  %5509 = vmatprep.subr.bf16.mxu1 %v8099_v52  ;;  %v8166_v51 = vld [vmem:[%s11700_s1 + $0x550] ss:$20 sps:$4 sm:$0xff]   ;;  %v1034_v52 = vcombine.high %v988_v47, %v1002_v48 }
  0x5b   :  { %5123 = vmatpush1.bf16.msra.mxu0 %v8094_v53  ;;  %5510 = vmatpush1.bf16.msra.mxu1 %v8097_v55  ;;  %v1033_v53 = vcombine.low %v988_v47, %v1002_v48  ;;  %v8169_v55 = vld [vmem:[%s11700_s1 + $0x558] ss:$20 sps:$4 sm:$0xff]   ;;  %v8232_v47 = vld [vmem:[%s11700_s1 + $0x708] ss:$20 sps:$4 sm:$0xff]   ;;  %v8235_v48 = vld [vmem:[%s11700_s1 + $0x710] ss:$20 sps:$4 sm:$0xff]  }
  0x5c   :  { %5124 = vmatprep.subr.bf16.mxu0 %v8102_v56  ;;  %5511 = vmatprep.subr.bf16.mxu1 %v8105_v57  ;;  %v8174_v56 = vld [vmem:[%s11700_s1 + $0x57c] ss:$20 sps:$4 sm:$0xff]   ;;  %v1038_v57 = vcombine.high %v1016_v49, %v1030_v50 }
  0x5f   :  { %5125 = vmatpush1.bf16.msra.mxu0 %v8100_v58  ;;  %5512 = vmatpush1.bf16.msra.mxu1 %v8103_v59  ;;  %v1037_v58 = vcombine.low %v1016_v49, %v1030_v50  ;;  %v8177_v59 = vld [vmem:[%s11700_s1 + $0x584] ss:$20 sps:$4 sm:$0xff]   ;;  %v8240_v49 = vld [vmem:[%s11700_s1 + $0x734] ss:$20 sps:$4 sm:$0xff]   ;;  %v8243_v50 = vld [vmem:[%s11700_s1 + $0x73c] ss:$20 sps:$4 sm:$0xff]  }
  0x60   :  { %5126 = vmatprep.subr.bf16.mxu0 %v8108_v60  ;;  %5513 = vmatprep.subr.bf16.mxu1 %v8111_v61  ;;  %v9592_v60 = vrot.slane %v1034_v52, %v9258_v54  ;;  %v9595_v61 = vrot.slane %v1038_v57, %v9258_v54  ;;  %v8241_v52 = vld [vmem:[%s11700_s1 + $0x738] ss:$20 sps:$4 sm:$0xff]   ;;  %v8247_v57 = vld [vmem:[%s11700_s1 + $0x760] ss:$20 sps:$4 sm:$0xff]  }
  0x63   :  { %5127 = vmatpush1.bf16.msra.mxu0 %v8106_v62  ;;  %5514 = vmatpush1.bf16.msra.mxu1 %v8109_v63  ;;  %v8172_v62 = vld [vmem:[%s11700_s1 + $0x578] ss:$20 sps:$4 sm:$0xff]   ;;  %v9601_v63 = vrot.slane %v1033_v53, %v9258_v54  ;;  %v8246_v53 = vld [vmem:[%s11700_s1 + $0x75c] ss:$20 sps:$4 sm:$0xff]  }
  0x64   :  { %5128 = vmatprep.subr.bf16.mxu0 %v8114_v0  ;;  %5515 = vmatprep.subr.bf16.mxu1 %v8117_v1  ;;  %v9604_v0 = vrot.slane %v1037_v58, %v9258_v54  ;;  %v8175_v1 = vld [vmem:[%s11700_s1 + $0x580] ss:$20 sps:$4 sm:$0xff]   ;;  %v8256_v58 = vld [vmem:[%s11700_s1 + $0x784] ss:$20 sps:$4 sm:$0xff]  }
  0x67   :  { %5129 = vmatpush1.bf16.msra.mxu0 %v8112_v2  ;;  %5516 = vmatpush1.bf16.msra.mxu1 %v8115_v3  ;;  %v8180_v2 = vld [vmem:[%s11700_s1 + $0x5a4] ss:$20 sps:$4 sm:$0xff]   ;;  %v9614_v3 = vcombine.low %v9592_v60, %v9595_v61 }
  0x68   :  { %5130 = vmatprep.subr.bf16.mxu0 %v8120_v4  ;;  %5517 = vmatprep.subr.bf16.mxu1 %v8123_v5  ;;  %v8183_v4 = vld [vmem:[%s11700_s1 + $0x5ac] ss:$20 sps:$4 sm:$0xff]   ;;  %v9621_v5 = vcombine.high %v9601_v63, %v9604_v0 }
  0x6b   :  { %5131 = vmatpush1.bf16.msra.mxu0 %v8118_v6  ;;  %5518 = vmatpush1.bf16.msra.mxu1 %v8121_v7  ;;  %v8178_v6 = vld [vmem:[%s11700_s1 + $0x5a0] ss:$20 sps:$4 sm:$0xff]   ;;  %v8181_v7 = vld [vmem:[%s11700_s1 + $0x5a8] ss:$20 sps:$4 sm:$0xff]  }
  0x6c   :  { %5132 = vmatprep.subr.bf16.mxu0 %v8126_v8  ;;  %5519 = vmatprep.subr.bf16.mxu1 %v8129_v9  ;;  %v8186_v8 = vld [vmem:[%s11700_s1 + $0x5cc] ss:$20 sps:$4 sm:$0xff]   ;;  %v8189_v9 = vld [vmem:[%s11700_s1 + $0x5d4] ss:$20 sps:$4 sm:$0xff]  }
  0x6f   :  { %5133 = vmatpush1.bf16.msra.mxu0 %v8124_v10  ;;  %5520 = vmatpush1.bf16.msra.mxu1 %v8127_v11  ;;  %v8184_v10 = vld [vmem:[%s11700_s1 + $0x5c8] ss:$20 sps:$4 sm:$0xff]   ;;  %v8187_v11 = vld [vmem:[%s11700_s1 + $0x5d0] ss:$20 sps:$4 sm:$0xff]  }
  0x70   :  { %5134 = vmatprep.subr.bf16.mxu0 %v8132_v12  ;;  %5521 = vmatprep.subr.bf16.mxu1 %v8135_v13  ;;  %v8192_v12 = vld [vmem:[%s11700_s1 + $0x5f4] ss:$20 sps:$4 sm:$0xff]   ;;  %v8195_v13 = vld [vmem:[%s11700_s1 + $0x5fc] ss:$20 sps:$4 sm:$0xff]  }
  0x73   :  { %5135 = vmatpush1.bf16.msra.mxu0 %v8130_v14  ;;  %5522 = vmatpush1.bf16.msra.mxu1 %v8133_v15  ;;  %v8190_v14 = vld [vmem:[%s11700_s1 + $0x5f0] ss:$20 sps:$4 sm:$0xff]   ;;  %v8193_v15 = vld [vmem:[%s11700_s1 + $0x5f8] ss:$20 sps:$4 sm:$0xff]  }
  0x74   :  { %5136 = vmatprep.subr.bf16.mxu0 %v8138_v18  ;;  %5523 = vmatprep.subr.bf16.mxu1 %v8141_v19  ;;  %v8198_v18 = vld [vmem:[%s11700_s1 + $0x61c] ss:$20 sps:$4 sm:$0xff]   ;;  %v8201_v19 = vld [vmem:[%s11700_s1 + $0x624] ss:$20 sps:$4 sm:$0xff]  }
  0x77   :  { %5137 = vmatpush1.bf16.msra.mxu0 %v8136_v20  ;;  %5524 = vmatpush1.bf16.msra.mxu1 %v8139_v21  ;;  %v8196_v20 = vld [vmem:[%s11700_s1 + $0x618] ss:$20 sps:$4 sm:$0xff]   ;;  %v8199_v21 = vld [vmem:[%s11700_s1 + $0x620] ss:$20 sps:$4 sm:$0xff]  }
  0x78   :  { %5138 = vmatprep.subr.bf16.mxu0 %v8144_v22  ;;  %5525 = vmatprep.subr.bf16.mxu1 %v8147_v23  ;;  %v8204_v22 = vld [vmem:[%s11700_s1 + $0x644] ss:$20 sps:$4 sm:$0xff]   ;;  %v8207_v23 = vld [vmem:[%s11700_s1 + $0x64c] ss:$20 sps:$4 sm:$0xff]  }
  0x7b   :  { %5139 = vmatpush1.bf16.msra.mxu0 %v8142_v24  ;;  %5526 = vmatpush1.bf16.msra.mxu1 %v8145_v25  ;;  %v8202_v24 = vld [vmem:[%s11700_s1 + $0x640] ss:$20 sps:$4 sm:$0xff]   ;;  %v8205_v25 = vld [vmem:[%s11700_s1 + $0x648] ss:$20 sps:$4 sm:$0xff]  }
  0x7c   :  { %5140 = vmatprep.subr.bf16.mxu0 %v8150_v27  ;;  %5527 = vmatprep.subr.bf16.mxu1 %v8153_v28  ;;  %v8210_v27 = vld [vmem:[%s11700_s1 + $0x66c] ss:$20 sps:$4 sm:$0xff]   ;;  %v8213_v28 = vld [vmem:[%s11700_s1 + $0x674] ss:$20 sps:$4 sm:$0xff]  }
  0x7f   :  { %5141 = vmatpush1.bf16.msra.mxu0 %v8148_v29  ;;  %5528 = vmatpush1.bf16.msra.mxu1 %v8151_v30  ;;  %v8208_v29 = vld [vmem:[%s11700_s1 + $0x668] ss:$20 sps:$4 sm:$0xff]   ;;  %v8211_v30 = vld [vmem:[%s11700_s1 + $0x670] ss:$20 sps:$4 sm:$0xff]  }
  0x80   :  { %5153 = vmatprep.subr.bf16.mxu0 %v8156_v32  ;;  %5540 = vmatprep.subr.bf16.mxu1 %v8159_v33  ;;  %v8216_v32 = vld [vmem:[%s11700_s1 + $0x694] ss:$20 sps:$4 sm:$0xff]   ;;  %v8219_v33 = vld [vmem:[%s11700_s1 + $0x69c] ss:$20 sps:$4 sm:$0xff]  }
  0x82   :  { %5143 = vmatmul.mubr.bf16.vlgmr.msra.gmra.mrb[0].mxu0 %v9309_v17  ;;  %5530 = vmatmul.mubr.bf16.vlgmr.msra.gmra.mrb[0].mxu1 %v9309_v17 }
  0x83   :  { %5154 = vmatpush1.bf16.msra.mxu0 %v8154_v34  ;;  %5541 = vmatpush1.bf16.msra.mxu1 %v8157_v35  ;;  %v8214_v34 = vld [vmem:[%s11700_s1 + $0x690] ss:$20 sps:$4 sm:$0xff]   ;;  %v8217_v35 = vld [vmem:[%s11700_s1 + $0x698] ss:$20 sps:$4 sm:$0xff]  }
  0x84   :  { %5155 = vmatprep.subr.bf16.mxu0 %v8162_v36  ;;  %5542 = vmatprep.subr.bf16.mxu1 %v8165_v38  ;;  %v8222_v36 = vld [vmem:[%s11700_s1 + $0x6bc] ss:$20 sps:$4 sm:$0xff]   ;;  %v8220_v38 = vld [vmem:[%s11700_s1 + $0x6b8] ss:$20 sps:$4 sm:$0xff]  }
  0x85   :  { %5185 = vmatprep.mubr.bf16.mxu0 %v9614_v3  ;;  %5572 = vmatprep.mubr.bf16.mxu1 %v9614_v3 }
  0x87   :  { %5156 = vmatpush1.bf16.msra.mxu0 %v8160_v37  ;;  %5543 = vmatpush1.bf16.msra.mxu1 %v8163_v39  ;;  %v8225_v37 = vld [vmem:[%s11700_s1 + $0x6c4] ss:$20 sps:$4 sm:$0xff]   ;;  %v8223_v39 = vld [vmem:[%s11700_s1 + $0x6c0] ss:$20 sps:$4 sm:$0xff]  }
  0x88   :  { %5157 = vmatprep.subr.bf16.mxu0 %v8168_v40  ;;  %5544 = vmatprep.subr.bf16.mxu1 %v8171_v45  ;;  %v8228_v40 = vld [vmem:[%s11700_s1 + $0x6e4] ss:$20 sps:$4 sm:$0xff]   ;;  %v8237_v45 = vld [vmem:[%s11700_s1 + $0x714] ss:$20 sps:$4 sm:$0xff]  }
  0x8b   :  { %5158 = vmatpush1.bf16.msra.mxu0 %v8166_v51  ;;  %5545 = vmatpush1.bf16.msra.mxu1 %v8169_v55  ;;  %v8238_v51 = vld [vmem:[%s11700_s1 + $0x730] ss:$20 sps:$4 sm:$0xff]  }
  0x8c   :  { %5159 = vmatprep.subr.bf16.mxu0 %v8174_v56  ;;  %5546 = vmatprep.subr.bf16.mxu1 %v8177_v59  ;;  %v8249_v55 = vld [vmem:[%s11700_s1 + $0x764] ss:$20 sps:$4 sm:$0xff]   ;;  %v8259_v59 = vld [vmem:[%s11700_s1 + $0x78c] ss:$20 sps:$4 sm:$0xff]  }
  0x8d   :  { %v8244_v56 = vld [vmem:[%s11700_s1 + $0x758] ss:$20 sps:$4 sm:$0xff]  }
  0x8f   :  { %5160 = vmatpush1.bf16.msra.mxu0 %v8172_v62  ;;  %5547 = vmatpush1.bf16.msra.mxu1 %v8175_v1  ;;  %v9771_v62 = vcombine.low %v9601_v63, %v9604_v0  ;;  %v8254_v1 = vld [vmem:[%s11700_s1 + $0x780] ss:$20 sps:$4 sm:$0xff]   ;;  %v9787_v0 = vcombine.high %v9592_v60, %v9595_v61  ;;  %v8271_v61 = vld [vmem:[%s11700_s1 + $0x7dc] ss:$20 sps:$4 sm:$0xff]  }
  0x90   :  { %5161 = vmatprep.subr.bf16.mxu0 %v8180_v2  ;;  %5548 = vmatprep.subr.bf16.mxu1 %v8183_v4  ;;  %v8257_v2 = vld [vmem:[%s11700_s1 + $0x788] ss:$20 sps:$4 sm:$0xff]   ;;  %v8262_v4 = vld [vmem:[%s11700_s1 + $0x7ac] ss:$20 sps:$4 sm:$0xff]  }
  0x91   :  { %v8265_v63 = vld [vmem:[%s11700_s1 + $0x7b4] ss:$20 sps:$4 sm:$0xff]  }
  0x92   :  { %v8268_v60 = vld [vmem:[%s11700_s1 + $0x7d4] ss:$20 sps:$4 sm:$0xff]  }
  0x93   :  { %5162 = vmatpush1.bf16.msra.mxu0 %v8178_v6  ;;  %5549 = vmatpush1.bf16.msra.mxu1 %v8181_v7  ;;  %v8260_v6 = vld [vmem:[%s11700_s1 + $0x7a8] ss:$20 sps:$4 sm:$0xff]   ;;  %v8263_v7 = vld [vmem:[%s11700_s1 + $0x7b0] ss:$20 sps:$4 sm:$0xff]  }
  0x94   :  { %5163 = vmatprep.subr.bf16.mxu0 %v8186_v8  ;;  %5550 = vmatprep.subr.bf16.mxu1 %v8189_v9  ;;  %v8266_v8 = vld [vmem:[%s11700_s1 + $0x7d0] ss:$20 sps:$4 sm:$0xff]   ;;  %v8269_v9 = vld [vmem:[%s11700_s1 + $0x7d8] ss:$20 sps:$4 sm:$0xff]  }
  0x97   :  { %5164 = vmatpush1.bf16.msra.mxu0 %v8184_v10  ;;  %5551 = vmatpush1.bf16.msra.mxu1 %v8187_v11  ;;  %v8274_v10 = vld [vmem:[%s11700_s1 + $0x7fc] ss:$20 sps:$4 sm:$0xff]   ;;  %v8277_v11 = vld [vmem:[%s11700_s1 + $0x804] ss:$20 sps:$4 sm:$0xff]  }
  0x98   :  { %5165 = vmatprep.subr.bf16.mxu0 %v8192_v12  ;;  %5552 = vmatprep.subr.bf16.mxu1 %v8195_v13  ;;  %v8272_v12 = vld [vmem:[%s11700_s1 + $0x7f8] ss:$20 sps:$4 sm:$0xff]   ;;  %v8275_v13 = vld [vmem:[%s11700_s1 + $0x800] ss:$20 sps:$4 sm:$0xff]  }
  0x9b   :  { %5166 = vmatpush1.bf16.msra.mxu0 %v8190_v14  ;;  %5553 = vmatpush1.bf16.msra.mxu1 %v8193_v15  ;;  %v8280_v14 = vld [vmem:[%s11700_s1 + $0x824] ss:$20 sps:$4 sm:$0xff]   ;;  %v8283_v15 = vld [vmem:[%s11700_s1 + $0x82c] ss:$20 sps:$4 sm:$0xff]  }
  0x9c   :  { %5167 = vmatprep.subr.bf16.mxu0 %v8198_v18  ;;  %5554 = vmatprep.subr.bf16.mxu1 %v8201_v19  ;;  %v8278_v18 = vld [vmem:[%s11700_s1 + $0x820] ss:$20 sps:$4 sm:$0xff]   ;;  %v8281_v19 = vld [vmem:[%s11700_s1 + $0x828] ss:$20 sps:$4 sm:$0xff]  }
  0x9f   :  { %5168 = vmatpush1.bf16.msra.mxu0 %v8196_v20  ;;  %5555 = vmatpush1.bf16.msra.mxu1 %v8199_v21  ;;  %v8286_v20 = vld [vmem:[%s11700_s1 + $0x84c] ss:$20 sps:$4 sm:$0xff]   ;;  %v8289_v21 = vld [vmem:[%s11700_s1 + $0x854] ss:$20 sps:$4 sm:$0xff]  }
  0xa0   :  { %5169 = vmatprep.subr.bf16.mxu0 %v8204_v22  ;;  %5556 = vmatprep.subr.bf16.mxu1 %v8207_v23  ;;  %v8284_v22 = vld [vmem:[%s11700_s1 + $0x848] ss:$20 sps:$4 sm:$0xff]   ;;  %v8287_v23 = vld [vmem:[%s11700_s1 + $0x850] ss:$20 sps:$4 sm:$0xff]  }
  0xa3   :  { %5170 = vmatpush1.bf16.msra.mxu0 %v8202_v24  ;;  %5557 = vmatpush1.bf16.msra.mxu1 %v8205_v25  ;;  %v8292_v24 = vld [vmem:[%s11700_s1 + $0x874] ss:$20 sps:$4 sm:$0xff]   ;;  %v8295_v25 = vld [vmem:[%s11700_s1 + $0x87c] ss:$20 sps:$4 sm:$0xff]  }
  0xa4   :  { %5171 = vmatprep.subr.bf16.mxu0 %v8210_v27  ;;  %5558 = vmatprep.subr.bf16.mxu1 %v8213_v28  ;;  %v8290_v27 = vld [vmem:[%s11700_s1 + $0x870] ss:$20 sps:$4 sm:$0xff]   ;;  %v8293_v28 = vld [vmem:[%s11700_s1 + $0x878] ss:$20 sps:$4 sm:$0xff]  }
  0xa7   :  { %5172 = vmatpush1.bf16.msra.mxu0 %v8208_v29  ;;  %5559 = vmatpush1.bf16.msra.mxu1 %v8211_v30  ;;  %v8298_v29 = vld [vmem:[%s11700_s1 + $0x89c] ss:$20 sps:$4 sm:$0xff]   ;;  %v8296_v30 = vld [vmem:[%s11700_s1 + $0x898] ss:$20 sps:$4 sm:$0xff]  }
  0xa8   :  { %5173 = vmatprep.subr.bf16.mxu0 %v8216_v32  ;;  %5560 = vmatprep.subr.bf16.mxu1 %v8219_v33  ;;  %v8301_v32 = vld [vmem:[%s11700_s1 + $0x8a4] ss:$20 sps:$4 sm:$0xff]   ;;  %v8299_v33 = vld [vmem:[%s11700_s1 + $0x8a0] ss:$20 sps:$4 sm:$0xff]  }
  0xab   :  { %5174 = vmatpush1.bf16.msra.mxu0 %v8214_v34  ;;  %5561 = vmatpush1.bf16.msra.mxu1 %v8217_v35  ;;  %v8304_v34 = vld [vmem:[%s11700_s1 + $0x8c4] ss:$20 sps:$4 sm:$0xff]   ;;  %v8307_v35 = vld [vmem:[%s11700_s1 + $0x8cc] ss:$20 sps:$4 sm:$0xff]  }
  0xac   :  { %5175 = vmatprep.subr.bf16.mxu0 %v8222_v36  ;;  %5562 = vmatprep.subr.bf16.mxu1 %v8225_v37  ;;  %v8302_v36 = vld [vmem:[%s11700_s1 + $0x8c0] ss:$20 sps:$4 sm:$0xff]   ;;  %v8305_v37 = vld [vmem:[%s11700_s1 + $0x8c8] ss:$20 sps:$4 sm:$0xff]  }
  0xaf   :  { %5176 = vmatpush1.bf16.msra.mxu0 %v8220_v38  ;;  %5563 = vmatpush1.bf16.msra.mxu1 %v8223_v39  ;;  %v8310_v38 = vld [vmem:[%s11700_s1 + $0x8ec] ss:$20 sps:$4 sm:$0xff]   ;;  %v8313_v39 = vld [vmem:[%s11700_s1 + $0x8f4] ss:$20 sps:$4 sm:$0xff]  }
  0xb0   :  { %5177 = vmatprep.subr.bf16.mxu0 %v8228_v40  ;;  %5564 = vmatprep.subr.bf16.mxu1 %v8231_v41  ;;  %v8308_v40 = vld [vmem:[%s11700_s1 + $0x8e8] ss:$20 sps:$4 sm:$0xff]   ;;  %v8311_v41 = vld [vmem:[%s11700_s1 + $0x8f0] ss:$20 sps:$4 sm:$0xff]  }
  0xb3   :  { %5178 = vmatpush1.bf16.msra.mxu0 %v8226_v42  ;;  %5565 = vmatpush1.bf16.msra.mxu1 %v8229_v43  ;;  %v8316_v42 = vld [vmem:[%s11700_s1 + $0x914] ss:$20 sps:$4 sm:$0xff]   ;;  %v8319_v43 = vld [vmem:[%s11700_s1 + $0x91c] ss:$20 sps:$4 sm:$0xff]  }
  0xb4   :  { %5179 = vmatprep.subr.bf16.mxu0 %v8234_v44  ;;  %5566 = vmatprep.subr.bf16.mxu1 %v8237_v45  ;;  %v8314_v44 = vld [vmem:[%s11700_s1 + $0x910] ss:$20 sps:$4 sm:$0xff]   ;;  %v8317_v45 = vld [vmem:[%s11700_s1 + $0x918] ss:$20 sps:$4 sm:$0xff]  }
  0xb7   :  { %5180 = vmatpush1.bf16.msra.mxu0 %v8232_v47  ;;  %5567 = vmatpush1.bf16.msra.mxu1 %v8235_v48  ;;  %v8322_v47 = vld [vmem:[%s11700_s1 + $0x93c] ss:$20 sps:$4 sm:$0xff]   ;;  %v8325_v48 = vld [vmem:[%s11700_s1 + $0x944] ss:$20 sps:$4 sm:$0xff]  }
  0xb8   :  { %5181 = vmatprep.subr.bf16.mxu0 %v8240_v49  ;;  %5568 = vmatprep.subr.bf16.mxu1 %v8243_v50  ;;  %v8320_v49 = vld [vmem:[%s11700_s1 + $0x938] ss:$20 sps:$4 sm:$0xff]   ;;  %v8323_v50 = vld [vmem:[%s11700_s1 + $0x940] ss:$20 sps:$4 sm:$0xff]  }
  0xbb   :  { %5182 = vmatpush1.bf16.msra.mxu0 %v8238_v51  ;;  %5569 = vmatpush1.bf16.msra.mxu1 %v8241_v52  ;;  %v8328_v51 = vld [vmem:[%s11700_s1 + $0x964] ss:$20 sps:$4 sm:$0xff]   ;;  %v8326_v52 = vld [vmem:[%s11700_s1 + $0x960] ss:$20 sps:$4 sm:$0xff]  }
  0xbc   :  { %5183 = vmatprep.subr.bf16.mxu0 %v8246_v53  ;;  %5570 = vmatprep.subr.bf16.mxu1 %v8249_v55  ;;  %v8331_v53 = vld [vmem:[%s11700_s1 + $0x96c] ss:$20 sps:$4 sm:$0xff]   ;;  %v8329_v55 = vld [vmem:[%s11700_s1 + $0x968] ss:$20 sps:$4 sm:$0xff]  }
  0xbf   :  { %5184 = vmatpush1.bf16.msra.mxu0 %v8244_v56  ;;  %5571 = vmatpush1.bf16.msra.mxu1 %v8247_v57  ;;  %v8334_v56 = vld [vmem:[%s11700_s1 + $0x98c] ss:$20 sps:$4 sm:$0xff]   ;;  %v8337_v57 = vld [vmem:[%s11700_s1 + $0x994] ss:$20 sps:$4 sm:$0xff]  }
  0xc0   :  { %5196 = vmatprep.subr.bf16.mxu0 %v8256_v58  ;;  %5583 = vmatprep.subr.bf16.mxu1 %v8259_v59  ;;  %v8446_v58 = vld [vmem:[%s11699_s0 + $0x8] ss:$18 sps:$4 sm:$0xff]   ;;  %v8448_v59 = vld [vmem:[%s11699_s0 + $0x2c] ss:$18 sps:$4 sm:$0xff]  }
  0xc2   :  { %5186 = vmatmul.mubr.bf16.vlgmr.msra.gmra.mrb[0].mxu0 %v9771_v62  ;;  %5573 = vmatmul.mubr.bf16.vlgmr.msra.gmra.mrb[0].mxu1 %v9771_v62 }
  0xc3   :  { %5197 = vmatpush1.bf16.msra.mxu0 %v8254_v1  ;;  %5584 = vmatpush1.bf16.msra.mxu1 %v8257_v2  ;;  %v8450_v1 = vld [vmem:[%s11699_s0 + $0x50] ss:$18 sps:$4 sm:$0xff]   ;;  %v8452_v2 = vld [vmem:[%s11699_s0 + $0x74] ss:$18 sps:$4 sm:$0xff]  }
  0xc4   :  { %5198 = vmatprep.subr.bf16.mxu0 %v8262_v4  ;;  %5585 = vmatprep.subr.bf16.mxu1 %v8265_v63  ;;  %v8332_v4 = vld [vmem:[%s11700_s1 + $0x988] ss:$20 sps:$4 sm:$0xff]   ;;  %v8335_v63 = vld [vmem:[%s11700_s1 + $0x990] ss:$20 sps:$4 sm:$0xff]  }
  0xc5   :  { %5228 = vmatprep.mubr.bf16.mxu0 %v9787_v0  ;;  %5615 = vmatprep.mubr.bf16.mxu1 %v9787_v0 }
  0xc7   :  { %5199 = vmatpush1.bf16.msra.mxu0 %v8260_v6  ;;  %5586 = vmatpush1.bf16.msra.mxu1 %v8263_v7  ;;  %v8340_v6 = vld [vmem:[%s11700_s1 + $0x9b4] ss:$20 sps:$4 sm:$0xff]   ;;  %v8343_v7 = vld [vmem:[%s11700_s1 + $0x9bc] ss:$20 sps:$4 sm:$0xff]  }
  0xc8   :  { %5200 = vmatprep.subr.bf16.mxu0 %v8268_v60  ;;  %5587 = vmatprep.subr.bf16.mxu1 %v8271_v61  ;;  %v1117_v60 = vrot.slane %v8446_v58, %v9258_v54  ;;  %v1131_v61 = vrot.slane %v8448_v59, %v9258_v54  ;;  %v8391_v58 = vld [vmem:[%s11700_s1 + $0xafc] ss:$20 sps:$4 sm:$0xff]  }
  0xc9   :  { %v8386_v59 = vld [vmem:[%s11700_s1 + $0xaf0] ss:$20 sps:$4 sm:$0xff]  }
  0xcb   :  { %5201 = vmatpush1.bf16.msra.mxu0 %v8266_v8  ;;  %5588 = vmatpush1.bf16.msra.mxu1 %v8269_v9  ;;  %v1145_v8 = vrot.slane %v8450_v1, %v9258_v54  ;;  %v1159_v9 = vrot.slane %v8452_v2, %v9258_v54  ;;  %v8389_v1 = vld [vmem:[%s11700_s1 + $0xaf8] ss:$20 sps:$4 sm:$0xff]   ;;  %v8394_v2 = vld [vmem:[%s11700_s1 + $0xb1c] ss:$20 sps:$4 sm:$0xff]  }
  0xcc   :  { %5202 = vmatprep.subr.bf16.mxu0 %v8274_v10  ;;  %5589 = vmatprep.subr.bf16.mxu1 %v8277_v11  ;;  %v8338_v10 = vld [vmem:[%s11700_s1 + $0x9b0] ss:$20 sps:$4 sm:$0xff]   ;;  %v8341_v11 = vld [vmem:[%s11700_s1 + $0x9b8] ss:$20 sps:$4 sm:$0xff]  }
  0xcf   :  { %5203 = vmatpush1.bf16.msra.mxu0 %v8272_v12  ;;  %5590 = vmatpush1.bf16.msra.mxu1 %v8275_v13  ;;  %v8346_v12 = vld [vmem:[%s11700_s1 + $0x9dc] ss:$20 sps:$4 sm:$0xff]   ;;  %v8349_v13 = vld [vmem:[%s11700_s1 + $0x9e4] ss:$20 sps:$4 sm:$0xff]  }
  0xd0   :  { %5204 = vmatprep.subr.bf16.mxu0 %v8280_v14  ;;  %5591 = vmatprep.subr.bf16.mxu1 %v8283_v15  ;;  %v1168_v14 = vcombine.high %v1117_v60, %v1131_v61  ;;  %v1172_v15 = vcombine.high %v1145_v8, %v1159_v9 }
  0xd3   :  { %5205 = vmatpush1.bf16.msra.mxu0 %v8278_v18  ;;  %5592 = vmatpush1.bf16.msra.mxu1 %v8281_v19  ;;  %v8344_v18 = vld [vmem:[%s11700_s1 + $0x9d8] ss:$20 sps:$4 sm:$0xff]   ;;  %v1167_v19 = vcombine.low %v1117_v60, %v1131_v61  ;;  %v8398_v60 = vld [vmem:[%s11700_s1 + $0xb40] ss:$20 sps:$4 sm:$0xff]  }
  0xd4   :  { %5206 = vmatprep.subr.bf16.mxu0 %v8286_v20  ;;  %5593 = vmatprep.subr.bf16.mxu1 %v8289_v21  ;;  %v1171_v20 = vcombine.low %v1145_v8, %v1159_v9  ;;  %v8347_v21 = vld [vmem:[%s11700_s1 + $0x9e0] ss:$20 sps:$4 sm:$0xff]   ;;  %v8401_v8 = vld [vmem:[%s11700_s1 + $0xb48] ss:$20 sps:$4 sm:$0xff]  }
  0xd5   :  { %v8403_v61 = vld [vmem:[%s11700_s1 + $0xb4c] ss:$20 sps:$4 sm:$0xff]  }
  0xd6   :  { %v8406_v9 = vld [vmem:[%s11700_s1 + $0xb6c] ss:$20 sps:$4 sm:$0xff]  }
  0xd7   :  { %5207 = vmatpush1.bf16.msra.mxu0 %v8284_v22  ;;  %5594 = vmatpush1.bf16.msra.mxu1 %v8287_v23  ;;  %v8352_v22 = vld [vmem:[%s11700_s1 + $0xa04] ss:$20 sps:$4 sm:$0xff]   ;;  %v8355_v23 = vld [vmem:[%s11700_s1 + $0xa0c] ss:$20 sps:$4 sm:$0xff]  }
  0xd8   :  { %5208 = vmatprep.subr.bf16.mxu0 %v8292_v24  ;;  %5595 = vmatprep.subr.bf16.mxu1 %v8295_v25  ;;  %v1195_v24 = vrot.slane %v1168_v14, %v9258_v54  ;;  %v1223_v25 = vrot.slane %v1172_v15, %v9258_v54  ;;  %v8410_v14 = vld [vmem:[%s11700_s1 + $0xb90] ss:$20 sps:$4 sm:$0xff]  }
  0xd9   :  { %v8415_v15 = vld [vmem:[%s11700_s1 + $0xb9c] ss:$20 sps:$4 sm:$0xff]  }
  0xdb   :  { %5209 = vmatpush1.bf16.msra.mxu0 %v8290_v27  ;;  %5596 = vmatpush1.bf16.msra.mxu1 %v8293_v28  ;;  %v8350_v27 = vld [vmem:[%s11700_s1 + $0xa00] ss:$20 sps:$4 sm:$0xff]   ;;  %v9995_v28 = vrot.slane %v1167_v19, %v9258_v54  ;;  %v8418_v19 = vld [vmem:[%s11700_s1 + $0xbbc] ss:$20 sps:$4 sm:$0xff]  }
  0xdc   :  { %5210 = vmatprep.subr.bf16.mxu0 %v8298_v29  ;;  %5597 = vmatprep.subr.bf16.mxu1 %v8301_v32  ;;  %v9998_v29 = vrot.slane %v1171_v20, %v9258_v54  ;;  %v8358_v32 = vld [vmem:[%s11700_s1 + $0xa2c] ss:$20 sps:$4 sm:$0xff]  }
  0xdd   :  { %v8416_v20 = vld [vmem:[%s11700_s1 + $0xbb8] ss:$20 sps:$4 sm:$0xff]  }
  0xdf   :  { %5211 = vmatpush1.bf16.msra.mxu0 %v8296_v30  ;;  %5598 = vmatpush1.bf16.msra.mxu1 %v8299_v33  ;;  %v8353_v30 = vld [vmem:[%s11700_s1 + $0xa08] ss:$20 sps:$4 sm:$0xff]   ;;  %v10006_v33 = vcombine.high %v1195_v24, %v1223_v25 }
  0xe0   :  { %5212 = vmatprep.subr.bf16.mxu0 %v8304_v34  ;;  %5599 = vmatprep.subr.bf16.mxu1 %v8307_v35  ;;  %v8361_v34 = vld [vmem:[%s11700_s1 + $0xa34] ss:$20 sps:$4 sm:$0xff]   ;;  %v10011_v35 = vcombine.low %v1195_v24, %v1223_v25  ;;  %v8427_v25 = vld [vmem:[%s11700_s1 + $0xbec] ss:$20 sps:$4 sm:$0xff]  }
  0xe1   :  { %v8422_v24 = vld [vmem:[%s11700_s1 + $0xbe0] ss:$20 sps:$4 sm:$0xff]  }
  0xe3   :  { %5213 = vmatpush1.bf16.msra.mxu0 %v8302_v36  ;;  %5600 = vmatpush1.bf16.msra.mxu1 %v8305_v37  ;;  %v10015_v36 = vcombine.high %v9995_v28, %v9998_v29  ;;  %v8356_v37 = vld [vmem:[%s11700_s1 + $0xa28] ss:$20 sps:$4 sm:$0xff]  }
  0xe4   :  { %5214 = vmatprep.subr.bf16.mxu0 %v8310_v38  ;;  %5601 = vmatprep.subr.bf16.mxu1 %v8313_v39  ;;  %v8359_v38 = vld [vmem:[%s11700_s1 + $0xa30] ss:$20 sps:$4 sm:$0xff]   ;;  %v8364_v39 = vld [vmem:[%s11700_s1 + $0xa54] ss:$20 sps:$4 sm:$0xff]  }
  0xe7   :  { %5215 = vmatpush1.bf16.msra.mxu0 %v8308_v40  ;;  %5602 = vmatpush1.bf16.msra.mxu1 %v8311_v41  ;;  %v8367_v40 = vld [vmem:[%s11700_s1 + $0xa5c] ss:$20 sps:$4 sm:$0xff]  }
  0xe8   :  { %5216 = vmatprep.subr.bf16.mxu0 %v8316_v42  ;;  %5603 = vmatprep.subr.bf16.mxu1 %v8319_v43  ;;  %v8362_v41 = vld [vmem:[%s11700_s1 + $0xa50] ss:$20 sps:$4 sm:$0xff]   ;;  %v8365_v42 = vld [vmem:[%s11700_s1 + $0xa58] ss:$20 sps:$4 sm:$0xff]  }
  0xe9   :  { %v8370_v43 = vld [vmem:[%s11700_s1 + $0xa7c] ss:$20 sps:$4 sm:$0xff]  }
  0xeb   :  { %5217 = vmatpush1.bf16.msra.mxu0 %v8314_v44  ;;  %5604 = vmatpush1.bf16.msra.mxu1 %v8317_v45  ;;  %v8373_v44 = vld [vmem:[%s11700_s1 + $0xa84] ss:$20 sps:$4 sm:$0xff]  }
  0xec   :  { %5218 = vmatprep.subr.bf16.mxu0 %v8322_v47  ;;  %5605 = vmatprep.subr.bf16.mxu1 %v8325_v48  ;;  %v8368_v45 = vld [vmem:[%s11700_s1 + $0xa78] ss:$20 sps:$4 sm:$0xff]   ;;  %v8371_v47 = vld [vmem:[%s11700_s1 + $0xa80] ss:$20 sps:$4 sm:$0xff]  }
  0xed   :  { %v8376_v48 = vld [vmem:[%s11700_s1 + $0xaa4] ss:$20 sps:$4 sm:$0xff]  }
  0xef   :  { %5219 = vmatpush1.bf16.msra.mxu0 %v8320_v49  ;;  %5606 = vmatpush1.bf16.msra.mxu1 %v8323_v50  ;;  %v8379_v49 = vld [vmem:[%s11700_s1 + $0xaac] ss:$20 sps:$4 sm:$0xff]  }
  0xf0   :  { %5220 = vmatprep.subr.bf16.mxu0 %v8328_v51  ;;  %5607 = vmatprep.subr.bf16.mxu1 %v8331_v53  ;;  %v8374_v50 = vld [vmem:[%s11700_s1 + $0xaa0] ss:$20 sps:$4 sm:$0xff]   ;;  %v8377_v51 = vld [vmem:[%s11700_s1 + $0xaa8] ss:$20 sps:$4 sm:$0xff]  }
  0xf1   :  { %v8385_v53 = vld [vmem:[%s11700_s1 + $0xad4] ss:$20 sps:$4 sm:$0xff]  }
  0xf3   :  { %5221 = vmatpush1.bf16.msra.mxu0 %v8326_v52  ;;  %5608 = vmatpush1.bf16.msra.mxu1 %v8329_v55  ;;  %v8382_v52 = vld [vmem:[%s11700_s1 + $0xacc] ss:$20 sps:$4 sm:$0xff]   ;;  %v8380_v55 = vld [vmem:[%s11700_s1 + $0xac8] ss:$20 sps:$4 sm:$0xff]  }
  0xf4   :  { %5222 = vmatprep.subr.bf16.mxu0 %v8334_v56  ;;  %5609 = vmatprep.subr.bf16.mxu1 %v8337_v57  ;;  %v8383_v56 = vld [vmem:[%s11700_s1 + $0xad0] ss:$20 sps:$4 sm:$0xff]   ;;  %v8388_v57 = vld [vmem:[%s11700_s1 + $0xaf4] ss:$20 sps:$4 sm:$0xff]  }
  0xf7   :  { %5223 = vmatpush1.bf16.msra.mxu0 %v8332_v4  ;;  %5610 = vmatpush1.bf16.msra.mxu1 %v8335_v63  ;;  %v8397_v4 = vld [vmem:[%s11700_s1 + $0xb24] ss:$20 sps:$4 sm:$0xff]  }
  0xf8   :  { %5224 = vmatprep.subr.bf16.mxu0 %v8340_v6  ;;  %5611 = vmatprep.subr.bf16.mxu1 %v8343_v7  ;;  %v8392_v63 = vld [vmem:[%s11700_s1 + $0xb18] ss:$20 sps:$4 sm:$0xff]   ;;  %v8395_v6 = vld [vmem:[%s11700_s1 + $0xb20] ss:$20 sps:$4 sm:$0xff]  }
  0xf9   :  { %v8400_v7 = vld [vmem:[%s11700_s1 + $0xb44] ss:$20 sps:$4 sm:$0xff]  }
  0xfb   :  { %5225 = vmatpush1.bf16.msra.mxu0 %v8338_v10  ;;  %5612 = vmatpush1.bf16.msra.mxu1 %v8341_v11  ;;  %v8404_v10 = vld [vmem:[%s11700_s1 + $0xb68] ss:$20 sps:$4 sm:$0xff]  }
  0xfc   :  { %5226 = vmatprep.subr.bf16.mxu0 %v8346_v12  ;;  %5613 = vmatprep.subr.bf16.mxu1 %v8349_v13  ;;  %v8409_v11 = vld [vmem:[%s11700_s1 + $0xb74] ss:$20 sps:$4 sm:$0xff]   ;;  %v8407_v12 = vld [vmem:[%s11700_s1 + $0xb70] ss:$20 sps:$4 sm:$0xff]  }
  0xfd   :  { %v8412_v13 = vld [vmem:[%s11700_s1 + $0xb94] ss:$20 sps:$4 sm:$0xff]  }
  0xff   :  { %5227 = vmatpush1.bf16.msra.mxu0 %v8344_v18  ;;  %5614 = vmatpush1.bf16.msra.mxu1 %v8347_v21  ;;  %v8413_v18 = vld [vmem:[%s11700_s1 + $0xb98] ss:$20 sps:$4 sm:$0xff]  }
 0x100   :  { %5239 = vmatprep.subr.bf16.mxu0 %v8352_v22  ;;  %5626 = vmatprep.subr.bf16.mxu1 %v8355_v23  ;;  %v8421_v21 = vld [vmem:[%s11700_s1 + $0xbc4] ss:$20 sps:$4 sm:$0xff]   ;;  %v8419_v22 = vld [vmem:[%s11700_s1 + $0xbc0] ss:$20 sps:$4 sm:$0xff]  }
 0x101   :  { %v8424_v23 = vld [vmem:[%s11700_s1 + $0xbe4] ss:$20 sps:$4 sm:$0xff]  }
 0x102   :  { %5229 = vmatmul.mubr.bf16.vlgmr.msra.gmra.mrb[0].mxu0 %v9621_v5  ;;  %5616 = vmatmul.mubr.bf16.vlgmr.msra.gmra.mrb[0].mxu1 %v9621_v5 }
 0x103   :  { %5240 = vmatpush1.bf16.msra.mxu0 %v8350_v27  ;;  %5627 = vmatpush1.bf16.msra.mxu1 %v8353_v30  ;;  %v8425_v27 = vld [vmem:[%s11700_s1 + $0xbe8] ss:$20 sps:$4 sm:$0xff]   ;;  %v8430_v30 = vld [vmem:[%s11700_s1 + $0xc0c] ss:$20 sps:$4 sm:$0xff]  }
 0x104   :  { %5241 = vmatprep.subr.bf16.mxu0 %v8358_v32  ;;  %5628 = vmatprep.subr.bf16.mxu1 %v8361_v34  ;;  %v8428_v32 = vld [vmem:[%s11700_s1 + $0xc08] ss:$20 sps:$4 sm:$0xff]  }
 0x105   :  { %5271 = vmatprep.mubr.bf16.mxu0 %v10011_v35  ;;  %5658 = vmatprep.mubr.bf16.mxu1 %v10011_v35  ;;  %v8433_v34 = vld [vmem:[%s11700_s1 + $0xc14] ss:$20 sps:$4 sm:$0xff]  }
 0x107   :  { %5242 = vmatpush1.bf16.msra.mxu0 %v8356_v37  ;;  %5629 = vmatpush1.bf16.msra.mxu1 %v8359_v38  ;;  %v8431_v37 = vld [vmem:[%s11700_s1 + $0xc10] ss:$20 sps:$4 sm:$0xff]   ;;  %v8436_v38 = vld [vmem:[%s11700_s1 + $0xc34] ss:$20 sps:$4 sm:$0xff]  }
 0x108   :  { %5243 = vmatprep.subr.bf16.mxu0 %v8364_v39  ;;  %5630 = vmatprep.subr.bf16.mxu1 %v8367_v40  ;;  %v8434_v39 = vld [vmem:[%s11700_s1 + $0xc30] ss:$20 sps:$4 sm:$0xff]  }
 0x109   :  { %v8439_v40 = vld [vmem:[%s11700_s1 + $0xc3c] ss:$20 sps:$4 sm:$0xff]  }
 0x10b   :  { %5244 = vmatpush1.bf16.msra.mxu0 %v8362_v41  ;;  %5631 = vmatpush1.bf16.msra.mxu1 %v8365_v42  ;;  %v8437_v41 = vld [vmem:[%s11700_s1 + $0xc38] ss:$20 sps:$4 sm:$0xff]   ;;  %v8442_v42 = vld [vmem:[%s11700_s1 + $0xc5c] ss:$20 sps:$4 sm:$0xff]  }
 0x10c   :  { %5245 = vmatprep.subr.bf16.mxu0 %v8370_v43  ;;  %5632 = vmatprep.subr.bf16.mxu1 %v8373_v44  ;;  %v8445_v43 = vld [vmem:[%s11700_s1 + $0xc64] ss:$20 sps:$4 sm:$0xff]  }
 0x10d   :  { %v8440_v44 = vld [vmem:[%s11700_s1 + $0xc58] ss:$20 sps:$4 sm:$0xff]  }
 0x10f   :  { %5246 = vmatpush1.bf16.msra.mxu0 %v8368_v45  ;;  %5633 = vmatpush1.bf16.msra.mxu1 %v8371_v47  ;;  %v8443_v45 = vld [vmem:[%s11700_s1 + $0xc60] ss:$20 sps:$4 sm:$0xff]   ;;  %v8456_v47 = vld [vmem:[%s11700_s1 + $0xc84] ss:$20 sps:$4 sm:$0xff]  }
 0x110   :  { %5247 = vmatprep.subr.bf16.mxu0 %v8376_v48  ;;  %5634 = vmatprep.subr.bf16.mxu1 %v8379_v49  ;;  %v8454_v48 = vld [vmem:[%s11700_s1 + $0xc80] ss:$20 sps:$4 sm:$0xff]  }
 0x111   :  { %v8459_v49 = vld [vmem:[%s11700_s1 + $0xc8c] ss:$20 sps:$4 sm:$0xff]  }
 0x113   :  { %5248 = vmatpush1.bf16.msra.mxu0 %v8374_v50  ;;  %5635 = vmatpush1.bf16.msra.mxu1 %v8377_v51  ;;  %v10206_v50 = vcombine.low %v9995_v28, %v9998_v29  ;;  %v8457_v51 = vld [vmem:[%s11700_s1 + $0xc88] ss:$20 sps:$4 sm:$0xff]   ;;  %v8463_v29 = vld [vmem:[%s11700_s1 + $0xcb0] ss:$20 sps:$4 sm:$0xff]  }
 0x114   :  { %5249 = vmatprep.subr.bf16.mxu0 %v8382_v52  ;;  %5636 = vmatprep.subr.bf16.mxu1 %v8385_v53  ;;  %v8462_v52 = vld [vmem:[%s11700_s1 + $0xcac] ss:$20 sps:$4 sm:$0xff]   ;;  %v8460_v53 = vld [vmem:[%s11700_s1 + $0xca8] ss:$20 sps:$4 sm:$0xff]  }
 0x115   :  { %v8465_v28 = vld [vmem:[%s11700_s1 + $0xcb4] ss:$20 sps:$4 sm:$0xff]  }
 0x117   :  { %5250 = vmatpush1.bf16.msra.mxu0 %v8380_v55  ;;  %5637 = vmatpush1.bf16.msra.mxu1 %v8383_v56  ;;  %v8468_v55 = vld [vmem:[%s11700_s1 + $0xcd4] ss:$20 sps:$4 sm:$0xff]   ;;  %v8466_v56 = vld [vmem:[%s11700_s1 + $0xcd0] ss:$20 sps:$4 sm:$0xff]  }
 0x118   :  { %5251 = vmatprep.subr.bf16.mxu0 %v8388_v57  ;;  %5638 = vmatprep.subr.bf16.mxu1 %v8391_v58  ;;  %v8471_v57 = vld [vmem:[%s11700_s1 + $0xcdc] ss:$20 sps:$4 sm:$0xff]   ;;  %v8469_v58 = vld [vmem:[%s11700_s1 + $0xcd8] ss:$20 sps:$4 sm:$0xff]  }
 0x11b   :  { %5252 = vmatpush1.bf16.msra.mxu0 %v8386_v59  ;;  %5639 = vmatpush1.bf16.msra.mxu1 %v8389_v1  ;;  %v8474_v59 = vld [vmem:[%s11700_s1 + $0xcfc] ss:$20 sps:$4 sm:$0xff]   ;;  %v8472_v1 = vld [vmem:[%s11700_s1 + $0xcf8] ss:$20 sps:$4 sm:$0xff]  }
 0x11c   :  { %5253 = vmatprep.subr.bf16.mxu0 %v8394_v2  ;;  %5640 = vmatprep.subr.bf16.mxu1 %v8397_v4  ;;  %v8477_v2 = vld [vmem:[%s11700_s1 + $0xd04] ss:$20 sps:$4 sm:$0xff]   ;;  %v8475_v4 = vld [vmem:[%s11700_s1 + $0xd00] ss:$20 sps:$4 sm:$0xff]  }
 0x11f   :  { %5254 = vmatpush1.bf16.msra.mxu0 %v8392_v63  ;;  %5641 = vmatpush1.bf16.msra.mxu1 %v8395_v6  ;;  %v8480_v63 = vld [vmem:[%s11700_s1 + $0xd24] ss:$20 sps:$4 sm:$0xff]   ;;  %v8478_v6 = vld [vmem:[%s11700_s1 + $0xd20] ss:$20 sps:$4 sm:$0xff]  }
 0x120   :  { %5255 = vmatprep.subr.bf16.mxu0 %v8400_v7  ;;  %5642 = vmatprep.subr.bf16.mxu1 %v8403_v61  ;;  %v8483_v7 = vld [vmem:[%s11700_s1 + $0xd2c] ss:$20 sps:$4 sm:$0xff]  }
 0x121   :  { %v8486_v61 = vld [vmem:[%s11700_s1 + $0xd4c] ss:$20 sps:$4 sm:$0xff]  }
 0x123   :  { %5256 = vmatpush1.bf16.msra.mxu0 %v8398_v60  ;;  %5643 = vmatpush1.bf16.msra.mxu1 %v8401_v8  ;;  %v8481_v60 = vld [vmem:[%s11700_s1 + $0xd28] ss:$20 sps:$4 sm:$0xff]  }
 0x124   :  { %5257 = vmatprep.subr.bf16.mxu0 %v8406_v9  ;;  %5644 = vmatprep.subr.bf16.mxu1 %v8409_v11  ;;  %v8484_v8 = vld [vmem:[%s11700_s1 + $0xd48] ss:$20 sps:$4 sm:$0xff]  }
 0x125   :  { %v8489_v9 = vld [vmem:[%s11700_s1 + $0xd54] ss:$20 sps:$4 sm:$0xff]  }
 0x126   :  { %v8492_v11 = vld [vmem:[%s11700_s1 + $0xd74] ss:$20 sps:$4 sm:$0xff]  }
 0x127   :  { %5258 = vmatpush1.bf16.msra.mxu0 %v8404_v10  ;;  %5645 = vmatpush1.bf16.msra.mxu1 %v8407_v12  ;;  %v8487_v10 = vld [vmem:[%s11700_s1 + $0xd50] ss:$20 sps:$4 sm:$0xff]  }
 0x128   :  { %5259 = vmatprep.subr.bf16.mxu0 %v8412_v13  ;;  %5646 = vmatprep.subr.bf16.mxu1 %v8415_v15  ;;  %v8490_v12 = vld [vmem:[%s11700_s1 + $0xd70] ss:$20 sps:$4 sm:$0xff]  }
 0x129   :  { %v8495_v13 = vld [vmem:[%s11700_s1 + $0xd7c] ss:$20 sps:$4 sm:$0xff]  }
 0x12a   :  { %v8498_v15 = vld [vmem:[%s11700_s1 + $0xd9c] ss:$20 sps:$4 sm:$0xff]  }
 0x12b   :  { %5260 = vmatpush1.bf16.msra.mxu0 %v8410_v14  ;;  %5647 = vmatpush1.bf16.msra.mxu1 %v8413_v18  ;;  %v8493_v14 = vld [vmem:[%s11700_s1 + $0xd78] ss:$20 sps:$4 sm:$0xff]  }
 0x12c   :  { %5261 = vmatprep.subr.bf16.mxu0 %v8418_v19  ;;  %5648 = vmatprep.subr.bf16.mxu1 %v8421_v21  ;;  %v8496_v18 = vld [vmem:[%s11700_s1 + $0xd98] ss:$20 sps:$4 sm:$0xff]  }
 0x12d   :  { %v8501_v19 = vld [vmem:[%s11700_s1 + $0xda4] ss:$20 sps:$4 sm:$0xff]  }
 0x12e   :  { %v8504_v21 = vld [vmem:[%s11700_s1 + $0xdc4] ss:$20 sps:$4 sm:$0xff]  }
 0x12f   :  { %5262 = vmatpush1.bf16.msra.mxu0 %v8416_v20  ;;  %5649 = vmatpush1.bf16.msra.mxu1 %v8419_v22  ;;  %v8499_v20 = vld [vmem:[%s11700_s1 + $0xda0] ss:$20 sps:$4 sm:$0xff]  }
 0x130   :  { %5263 = vmatprep.subr.bf16.mxu0 %v8424_v23  ;;  %5650 = vmatprep.subr.bf16.mxu1 %v8427_v25  ;;  %v8502_v22 = vld [vmem:[%s11700_s1 + $0xdc0] ss:$20 sps:$4 sm:$0xff]  }
 0x131   :  { %v8507_v23 = vld [vmem:[%s11700_s1 + $0xdcc] ss:$20 sps:$4 sm:$0xff]  }
 0x132   :  { %v8510_v25 = vld [vmem:[%s11700_s1 + $0xdec] ss:$20 sps:$4 sm:$0xff]  }
 0x133   :  { %5264 = vmatpush1.bf16.msra.mxu0 %v8422_v24  ;;  %5651 = vmatpush1.bf16.msra.mxu1 %v8425_v27  ;;  %v8505_v24 = vld [vmem:[%s11700_s1 + $0xdc8] ss:$20 sps:$4 sm:$0xff]  }
 0x134   :  { %5265 = vmatprep.subr.bf16.mxu0 %v8430_v30  ;;  %5652 = vmatprep.subr.bf16.mxu1 %v8433_v34  ;;  %v8508_v27 = vld [vmem:[%s11700_s1 + $0xde8] ss:$20 sps:$4 sm:$0xff]  }
 0x135   :  { %v8513_v30 = vld [vmem:[%s11700_s1 + $0xdf4] ss:$20 sps:$4 sm:$0xff]  }
 0x136   :  { %v8516_v34 = vld [vmem:[%s11700_s1 + $0xe14] ss:$20 sps:$4 sm:$0xff]  }
 0x137   :  { %5266 = vmatpush1.bf16.msra.mxu0 %v8428_v32  ;;  %5653 = vmatpush1.bf16.msra.mxu1 %v8431_v37  ;;  %v8511_v32 = vld [vmem:[%s11700_s1 + $0xdf0] ss:$20 sps:$4 sm:$0xff]  }
 0x138   :  { %5267 = vmatprep.subr.bf16.mxu0 %v8436_v38  ;;  %5654 = vmatprep.subr.bf16.mxu1 %v8439_v40  ;;  %v8514_v37 = vld [vmem:[%s11700_s1 + $0xe10] ss:$20 sps:$4 sm:$0xff]  }
 0x139   :  { %v8519_v38 = vld [vmem:[%s11700_s1 + $0xe1c] ss:$20 sps:$4 sm:$0xff]  }
 0x13a   :  { %v8522_v40 = vld [vmem:[%s11700_s1 + $0xe3c] ss:$20 sps:$4 sm:$0xff]  }
 0x13b   :  { %5268 = vmatpush1.bf16.msra.mxu0 %v8434_v39  ;;  %5655 = vmatpush1.bf16.msra.mxu1 %v8437_v41  ;;  %v8517_v39 = vld [vmem:[%s11700_s1 + $0xe18] ss:$20 sps:$4 sm:$0xff]  }
 0x13c   :  { %5269 = vmatprep.subr.bf16.mxu0 %v8442_v42  ;;  %5656 = vmatprep.subr.bf16.mxu1 %v8445_v43  ;;  %v8520_v41 = vld [vmem:[%s11700_s1 + $0xe38] ss:$20 sps:$4 sm:$0xff]   ;;  %v8523_v43 = vld [vmem:[%s11700_s1 + $0xe40] ss:$20 sps:$4 sm:$0xff]  }
 0x13d   :  { %v8525_v42 = vld [vmem:[%s11700_s1 + $0xe44] ss:$20 sps:$4 sm:$0xff]  }
 0x13f   :  { %5270 = vmatpush1.bf16.msra.mxu0 %v8440_v44  ;;  %5657 = vmatpush1.bf16.msra.mxu1 %v8443_v45  ;;  %v8528_v44 = vld [vmem:[%s11700_s1 + $0xe64] ss:$20 sps:$4 sm:$0xff]   ;;  %v8526_v45 = vld [vmem:[%s11700_s1 + $0xe60] ss:$20 sps:$4 sm:$0xff]  }
 0x140   :  { %5282 = vmatprep.subr.bf16.mxu0 %v8456_v47  ;;  %5669 = vmatprep.subr.bf16.mxu1 %v8459_v49  ;;  %v8531_v47 = vld [vmem:[%s11700_s1 + $0xe6c] ss:$20 sps:$4 sm:$0xff]  }
 0x141   :  { %v8534_v49 = vld [vmem:[%s11700_s1 + $0xe8c] ss:$20 sps:$4 sm:$0xff]  }
 0x142   :  { %5272 = vmatmul.mubr.bf16.vlgmr.msra.gmra.mrb[0].mxu0 %v10206_v50  ;;  %5659 = vmatmul.mubr.bf16.vlgmr.msra.gmra.mrb[0].mxu1 %v10206_v50 }
 0x143   :  { %5283 = vmatpush1.bf16.msra.mxu0 %v8454_v48  ;;  %5670 = vmatpush1.bf16.msra.mxu1 %v8457_v51  ;;  %v8529_v48 = vld [vmem:[%s11700_s1 + $0xe68] ss:$20 sps:$4 sm:$0xff]  }
 0x144   :  { %5284 = vmatprep.subr.bf16.mxu0 %v8462_v52  ;;  %5671 = vmatprep.subr.bf16.mxu1 %v8465_v28  ;;  %v8537_v51 = vld [vmem:[%s11700_s1 + $0xe94] ss:$20 sps:$4 sm:$0xff]   ;;  %v8646_v52 = vld [vmem:[%s11699_s0 + $0xc] ss:$18 sps:$4 sm:$0xff]  }
 0x145   :  { %5314 = vmatprep.mubr.bf16.mxu0 %v10006_v33  ;;  %5701 = vmatprep.mubr.bf16.mxu1 %v10006_v33  ;;  %v8648_v28 = vld [vmem:[%s11699_s0 + $0x54] ss:$18 sps:$4 sm:$0xff]  }
 0x147   :  { %5285 = vmatpush1.bf16.msra.mxu0 %v8460_v53  ;;  %5672 = vmatpush1.bf16.msra.mxu1 %v8463_v29  ;;  %v8647_v53 = vld [vmem:[%s11699_s0 + $0x30] ss:$18 sps:$4 sm:$0xff]   ;;  %v8532_v29 = vld [vmem:[%s11700_s1 + $0xe88] ss:$20 sps:$4 sm:$0xff]  }
 0x148   :  { %5286 = vmatprep.subr.bf16.mxu0 %v8468_v55  ;;  %5673 = vmatprep.subr.bf16.mxu1 %v8471_v57  ;;  %v8649_v55 = vld [vmem:[%s11699_s0 + $0x78] ss:$18 sps:$4 sm:$0xff]  }
 0x149   :  { %v8540_v57 = vld [vmem:[%s11700_s1 + $0xeb4] ss:$20 sps:$4 sm:$0xff]  }
 0x14b   :  { %5287 = vmatpush1.bf16.msra.mxu0 %v8466_v56  ;;  %5674 = vmatpush1.bf16.msra.mxu1 %v8469_v58  ;;  %v8535_v56 = vld [vmem:[%s11700_s1 + $0xe90] ss:$20 sps:$4 sm:$0xff]  }
 0x14c   :  { %5288 = vmatprep.subr.bf16.mxu0 %v8474_v59  ;;  %5675 = vmatprep.subr.bf16.mxu1 %v8477_v2  ;;  %v8538_v58 = vld [vmem:[%s11700_s1 + $0xeb0] ss:$20 sps:$4 sm:$0xff]   ;;  %v1138_v2 = vrot.slane %v8647_v53, %v9258_v54  ;;  %v8585_v53 = vld [vmem:[%s11700_s1 + $0xfd4] ss:$20 sps:$4 sm:$0xff]  }
 0x14d   :  { %v8543_v59 = vld [vmem:[%s11700_s1 + $0xebc] ss:$20 sps:$4 sm:$0xff]  }
 0x14f   :  { %5289 = vmatpush1.bf16.msra.mxu0 %v8472_v1  ;;  %5676 = vmatpush1.bf16.msra.mxu1 %v8475_v4  ;;  %v1124_v1 = vrot.slane %v8646_v52, %v9258_v54  ;;  %v1152_v4 = vrot.slane %v8648_v28, %v9258_v54  ;;  %v8580_v52 = vld [vmem:[%s11700_s1 + $0xfc8] ss:$20 sps:$4 sm:$0xff]   ;;  %v8583_v28 = vld [vmem:[%s11700_s1 + $0xfd0] ss:$20 sps:$4 sm:$0xff]  }
 0x150   :  { %5290 = vmatprep.subr.bf16.mxu0 %v8480_v63  ;;  %5677 = vmatprep.subr.bf16.mxu1 %v8483_v7  ;;  %v1166_v63 = vrot.slane %v8649_v55, %v9258_v54  ;;  %v8546_v7 = vld [vmem:[%s11700_s1 + $0xedc] ss:$20 sps:$4 sm:$0xff]  }
 0x151   :  { %v8586_v55 = vld [vmem:[%s11700_s1 + $0xff0] ss:$20 sps:$4 sm:$0xff]  }
 0x153   :  { %5291 = vmatpush1.bf16.msra.mxu0 %v8478_v6  ;;  %5678 = vmatpush1.bf16.msra.mxu1 %v8481_v60  ;;  %v8541_v6 = vld [vmem:[%s11700_s1 + $0xeb8] ss:$20 sps:$4 sm:$0xff]  }
 0x154   :  { %5292 = vmatprep.subr.bf16.mxu0 %v8486_v61  ;;  %5679 = vmatprep.subr.bf16.mxu1 %v8489_v9  ;;  %v8544_v60 = vld [vmem:[%s11700_s1 + $0xed8] ss:$20 sps:$4 sm:$0xff]   ;;  %v1174_v9 = vcombine.high %v1152_v4, %v1166_v63 }
 0x155   :  { %v8549_v61 = vld [vmem:[%s11700_s1 + $0xee4] ss:$20 sps:$4 sm:$0xff]  }
 0x157   :  { %5293 = vmatpush1.bf16.msra.mxu0 %v8484_v8  ;;  %5680 = vmatpush1.bf16.msra.mxu1 %v8487_v10  ;;  %v1170_v8 = vcombine.high %v1124_v1, %v1138_v2  ;;  %v1169_v10 = vcombine.low %v1124_v1, %v1138_v2  ;;  %v8597_v1 = vld [vmem:[%s11700_s1 + $0x1024] ss:$20 sps:$4 sm:$0xff]   ;;  %v8595_v2 = vld [vmem:[%s11700_s1 + $0x1020] ss:$20 sps:$4 sm:$0xff]  }
 0x158   :  { %5294 = vmatprep.subr.bf16.mxu0 %v8492_v11  ;;  %5681 = vmatprep.subr.bf16.mxu1 %v8495_v13  ;;  %v1173_v11 = vcombine.low %v1152_v4, %v1166_v63  ;;  %v8552_v13 = vld [vmem:[%s11700_s1 + $0xf04] ss:$20 sps:$4 sm:$0xff]   ;;  %v8598_v63 = vld [vmem:[%s11700_s1 + $0x1040] ss:$20 sps:$4 sm:$0xff]  }
 0x159   :  { %v8600_v4 = vld [vmem:[%s11700_s1 + $0x1044] ss:$20 sps:$4 sm:$0xff]  }
 0x15b   :  { %5295 = vmatpush1.bf16.msra.mxu0 %v8490_v12  ;;  %5682 = vmatpush1.bf16.msra.mxu1 %v8493_v14  ;;  %v8547_v12 = vld [vmem:[%s11700_s1 + $0xee0] ss:$20 sps:$4 sm:$0xff]  }
 0x15c   :  { %5296 = vmatprep.subr.bf16.mxu0 %v8498_v15  ;;  %5683 = vmatprep.subr.bf16.mxu1 %v8501_v19  ;;  %v8550_v14 = vld [vmem:[%s11700_s1 + $0xf00] ss:$20 sps:$4 sm:$0xff]   ;;  %v1230_v19 = vrot.slane %v1174_v9, %v9258_v54  ;;  %v8607_v9 = vld [vmem:[%s11700_s1 + $0x1070] ss:$20 sps:$4 sm:$0xff]  }
 0x15d   :  { %v8555_v15 = vld [vmem:[%s11700_s1 + $0xf0c] ss:$20 sps:$4 sm:$0xff]  }
 0x15f   :  { %5297 = vmatpush1.bf16.msra.mxu0 %v8496_v18  ;;  %5684 = vmatpush1.bf16.msra.mxu1 %v8499_v20  ;;  %v1202_v18 = vrot.slane %v1170_v8, %v9258_v54  ;;  %v10423_v20 = vrot.slane %v1169_v10, %v9258_v54  ;;  %v8609_v8 = vld [vmem:[%s11700_s1 + $0x1074] ss:$20 sps:$4 sm:$0xff]  }
 0x160   :  { %5298 = vmatprep.subr.bf16.mxu0 %v8504_v21  ;;  %5685 = vmatprep.subr.bf16.mxu1 %v8507_v23  ;;  %v10426_v21 = vrot.slane %v1173_v11, %v9258_v54  ;;  %v8558_v23 = vld [vmem:[%s11700_s1 + $0xf2c] ss:$20 sps:$4 sm:$0xff]   ;;  %v8612_v10 = vld [vmem:[%s11700_s1 + $0x1094] ss:$20 sps:$4 sm:$0xff]   ;;  %v8610_v11 = vld [vmem:[%s11700_s1 + $0x1090] ss:$20 sps:$4 sm:$0xff]  }
 0x163   :  { %5299 = vmatpush1.bf16.msra.mxu0 %v8502_v22  ;;  %5686 = vmatpush1.bf16.msra.mxu1 %v8505_v24  ;;  %v8553_v22 = vld [vmem:[%s11700_s1 + $0xf08] ss:$20 sps:$4 sm:$0xff]   ;;  %v10434_v24 = vcombine.high %v1202_v18, %v1230_v19 }
 0x164   :  { %5300 = vmatprep.subr.bf16.mxu0 %v8510_v25  ;;  %5687 = vmatprep.subr.bf16.mxu1 %v8513_v30  ;;  %v8556_v25 = vld [vmem:[%s11700_s1 + $0xf28] ss:$20 sps:$4 sm:$0xff]   ;;  %v10442_v30 = vcombine.low %v1202_v18, %v1230_v19  ;;  %v8621_v18 = vld [vmem:[%s11700_s1 + $0x10c4] ss:$20 sps:$4 sm:$0xff]   ;;  %v8619_v19 = vld [vmem:[%s11700_s1 + $0x10c0] ss:$20 sps:$4 sm:$0xff]  }
 0x167   :  { %5301 = vmatpush1.bf16.msra.mxu0 %v8508_v27  ;;  %5688 = vmatpush1.bf16.msra.mxu1 %v8511_v32  ;;  %v8561_v27 = vld [vmem:[%s11700_s1 + $0xf34] ss:$20 sps:$4 sm:$0xff]   ;;  %v10446_v32 = vcombine.high %v10423_v20, %v10426_v21 }
 0x168   :  { %5302 = vmatprep.subr.bf16.mxu0 %v8516_v34  ;;  %5689 = vmatprep.subr.bf16.mxu1 %v8519_v38  ;;  %v8559_v34 = vld [vmem:[%s11700_s1 + $0xf30] ss:$20 sps:$4 sm:$0xff]  }
 0x169   :  { %v8562_v38 = vld [vmem:[%s11700_s1 + $0xf50] ss:$20 sps:$4 sm:$0xff]  }
 0x16b   :  { %5303 = vmatpush1.bf16.msra.mxu0 %v8514_v37  ;;  %5690 = vmatpush1.bf16.msra.mxu1 %v8517_v39  ;;  %v8564_v37 = vld [vmem:[%s11700_s1 + $0xf54] ss:$20 sps:$4 sm:$0xff]   ;;  %v8567_v39 = vld [vmem:[%s11700_s1 + $0xf5c] ss:$20 sps:$4 sm:$0xff]  }
 0x16c   :  { %5304 = vmatprep.subr.bf16.mxu0 %v8522_v40  ;;  %5691 = vmatprep.subr.bf16.mxu1 %v8525_v42  ;;  %v8565_v40 = vld [vmem:[%s11700_s1 + $0xf58] ss:$20 sps:$4 sm:$0xff]  }
 0x16d   :  { %v8568_v42 = vld [vmem:[%s11700_s1 + $0xf78] ss:$20 sps:$4 sm:$0xff]  }
 0x16f   :  { %5305 = vmatpush1.bf16.msra.mxu0 %v8520_v41  ;;  %5692 = vmatpush1.bf16.msra.mxu1 %v8523_v43  ;;  %v8570_v41 = vld [vmem:[%s11700_s1 + $0xf7c] ss:$20 sps:$4 sm:$0xff]   ;;  %v8573_v43 = vld [vmem:[%s11700_s1 + $0xf84] ss:$20 sps:$4 sm:$0xff]  }
 0x170   :  { %5306 = vmatprep.subr.bf16.mxu0 %v8528_v44  ;;  %5693 = vmatprep.subr.bf16.mxu1 %v8531_v47  ;;  %v8571_v44 = vld [vmem:[%s11700_s1 + $0xf80] ss:$20 sps:$4 sm:$0xff]  }
 0x171   :  { %v8574_v47 = vld [vmem:[%s11700_s1 + $0xfa0] ss:$20 sps:$4 sm:$0xff]  }
 0x173   :  { %5307 = vmatpush1.bf16.msra.mxu0 %v8526_v45  ;;  %5694 = vmatpush1.bf16.msra.mxu1 %v8529_v48  ;;  %v8576_v45 = vld [vmem:[%s11700_s1 + $0xfa4] ss:$20 sps:$4 sm:$0xff]   ;;  %v8579_v48 = vld [vmem:[%s11700_s1 + $0xfac] ss:$20 sps:$4 sm:$0xff]  }
 0x174   :  { %5308 = vmatprep.subr.bf16.mxu0 %v8534_v49  ;;  %5695 = vmatprep.subr.bf16.mxu1 %v8537_v51  ;;  %v8577_v49 = vld [vmem:[%s11700_s1 + $0xfa8] ss:$20 sps:$4 sm:$0xff]   ;;  %v8582_v51 = vld [vmem:[%s11700_s1 + $0xfcc] ss:$20 sps:$4 sm:$0xff]  }
 0x177   :  { %5309 = vmatpush1.bf16.msra.mxu0 %v8532_v29  ;;  %5696 = vmatpush1.bf16.msra.mxu1 %v8535_v56  ;;  %v8588_v29 = vld [vmem:[%s11700_s1 + $0xff4] ss:$20 sps:$4 sm:$0xff]   ;;  %v8591_v56 = vld [vmem:[%s11700_s1 + $0xffc] ss:$20 sps:$4 sm:$0xff]  }
 0x178   :  { %5310 = vmatprep.subr.bf16.mxu0 %v8540_v57  ;;  %5697 = vmatprep.subr.bf16.mxu1 %v8543_v59  ;;  %v8589_v57 = vld [vmem:[%s11700_s1 + $0xff8] ss:$20 sps:$4 sm:$0xff]  }
 0x179   :  { %v8592_v59 = vld [vmem:[%s11700_s1 + $0x1018] ss:$20 sps:$4 sm:$0xff]  }
 0x17b   :  { %5311 = vmatpush1.bf16.msra.mxu0 %v8538_v58  ;;  %5698 = vmatpush1.bf16.msra.mxu1 %v8541_v6  ;;  %v8594_v58 = vld [vmem:[%s11700_s1 + $0x101c] ss:$20 sps:$4 sm:$0xff]   ;;  %v8603_v6 = vld [vmem:[%s11700_s1 + $0x104c] ss:$20 sps:$4 sm:$0xff]  }
 0x17c   :  { %5312 = vmatprep.subr.bf16.mxu0 %v8546_v7  ;;  %5699 = vmatprep.subr.bf16.mxu1 %v8549_v61  ;;  %v8601_v7 = vld [vmem:[%s11700_s1 + $0x1048] ss:$20 sps:$4 sm:$0xff]  }
 0x17d   :  { %v8604_v61 = vld [vmem:[%s11700_s1 + $0x1068] ss:$20 sps:$4 sm:$0xff]  }
 0x17f   :  { %5313 = vmatpush1.bf16.msra.mxu0 %v8544_v60  ;;  %5700 = vmatpush1.bf16.msra.mxu1 %v8547_v12  ;;  %v8606_v60 = vld [vmem:[%s11700_s1 + $0x106c] ss:$20 sps:$4 sm:$0xff]   ;;  %v8615_v12 = vld [vmem:[%s11700_s1 + $0x109c] ss:$20 sps:$4 sm:$0xff]  }
 0x180   :  { %5325 = vmatprep.subr.bf16.mxu0 %v8552_v13  ;;  %5712 = vmatprep.subr.bf16.mxu1 %v8555_v15  ;;  %v8613_v13 = vld [vmem:[%s11700_s1 + $0x1098] ss:$20 sps:$4 sm:$0xff]  }
 0x181   :  { %v8616_v15 = vld [vmem:[%s11700_s1 + $0x10b8] ss:$20 sps:$4 sm:$0xff]  }
 0x182   :  { %5315 = vmatmul.mubr.bf16.vlgmr.msra.gmra.mrb[0].mxu0 %v10015_v36  ;;  %5702 = vmatmul.mubr.bf16.vlgmr.msra.gmra.mrb[0].mxu1 %v10015_v36 }
 0x183   :  { %5326 = vmatpush1.bf16.msra.mxu0 %v8550_v14  ;;  %5713 = vmatpush1.bf16.msra.mxu1 %v8553_v22  ;;  %v8618_v14 = vld [vmem:[%s11700_s1 + $0x10bc] ss:$20 sps:$4 sm:$0xff]   ;;  %v8624_v22 = vld [vmem:[%s11700_s1 + $0x10e4] ss:$20 sps:$4 sm:$0xff]  }
 0x184   :  { %5327 = vmatprep.subr.bf16.mxu0 %v8558_v23  ;;  %5714 = vmatprep.subr.bf16.mxu1 %v8561_v27  ;;  %v8622_v23 = vld [vmem:[%s11700_s1 + $0x10e0] ss:$20 sps:$4 sm:$0xff]   ;;  %v8625_v27 = vld [vmem:[%s11700_s1 + $0x10e8] ss:$20 sps:$4 sm:$0xff]  }
 0x185   :  { %5357 = vmatprep.mubr.bf16.mxu0 %v10442_v30  ;;  %5744 = vmatprep.mubr.bf16.mxu1 %v10442_v30 }
 0x187   :  { %5328 = vmatpush1.bf16.msra.mxu0 %v8556_v25  ;;  %5715 = vmatpush1.bf16.msra.mxu1 %v8559_v34  ;;  %v8627_v25 = vld [vmem:[%s11700_s1 + $0x10ec] ss:$20 sps:$4 sm:$0xff]  }
 0x188   :  { %5329 = vmatprep.subr.bf16.mxu0 %v8564_v37  ;;  %5716 = vmatprep.subr.bf16.mxu1 %v8567_v39  ;;  %v8630_v34 = vld [vmem:[%s11700_s1 + $0x110c] ss:$20 sps:$4 sm:$0xff]   ;;  %v8628_v37 = vld [vmem:[%s11700_s1 + $0x1108] ss:$20 sps:$4 sm:$0xff]   ;;  %v8631_v39 = vld [vmem:[%s11700_s1 + $0x1110] ss:$20 sps:$4 sm:$0xff]  }
 0x18b   :  { %5330 = vmatpush1.bf16.msra.mxu0 %v8562_v38  ;;  %5717 = vmatpush1.bf16.msra.mxu1 %v8565_v40  ;;  %v8633_v38 = vld [vmem:[%s11700_s1 + $0x1114] ss:$20 sps:$4 sm:$0xff]  }
 0x18c   :  { %5331 = vmatprep.subr.bf16.mxu0 %v8570_v41  ;;  %5718 = vmatprep.subr.bf16.mxu1 %v8573_v43  ;;  %v8636_v40 = vld [vmem:[%s11700_s1 + $0x1134] ss:$20 sps:$4 sm:$0xff]   ;;  %v8634_v41 = vld [vmem:[%s11700_s1 + $0x1130] ss:$20 sps:$4 sm:$0xff]   ;;  %v8637_v43 = vld [vmem:[%s11700_s1 + $0x1138] ss:$20 sps:$4 sm:$0xff]  }
 0x18f   :  { %5332 = vmatpush1.bf16.msra.mxu0 %v8568_v42  ;;  %5719 = vmatpush1.bf16.msra.mxu1 %v8571_v44  ;;  %v8639_v42 = vld [vmem:[%s11700_s1 + $0x113c] ss:$20 sps:$4 sm:$0xff]  }
 0x190   :  { %5333 = vmatprep.subr.bf16.mxu0 %v8576_v45  ;;  %5720 = vmatprep.subr.bf16.mxu1 %v8579_v48  ;;  %v8642_v44 = vld [vmem:[%s11700_s1 + $0x115c] ss:$20 sps:$4 sm:$0xff]   ;;  %v8645_v45 = vld [vmem:[%s11700_s1 + $0x1164] ss:$20 sps:$4 sm:$0xff]   ;;  %v8643_v48 = vld [vmem:[%s11700_s1 + $0x1160] ss:$20 sps:$4 sm:$0xff]  }
 0x193   :  { %5334 = vmatpush1.bf16.msra.mxu0 %v8574_v47  ;;  %5721 = vmatpush1.bf16.msra.mxu1 %v8577_v49  ;;  %v8640_v47 = vld [vmem:[%s11700_s1 + $0x1158] ss:$20 sps:$4 sm:$0xff]  }
 0x194   :  { %5335 = vmatprep.subr.bf16.mxu0 %v8582_v51  ;;  %5722 = vmatprep.subr.bf16.mxu1 %v8585_v53  ;;  %v8652_v49 = vld [vmem:[%s11700_s1 + $0x1184] ss:$20 sps:$4 sm:$0xff]   ;;  %v8650_v51 = vld [vmem:[%s11700_s1 + $0x1180] ss:$20 sps:$4 sm:$0xff]   ;;  %v8653_v53 = vld [vmem:[%s11700_s1 + $0x1188] ss:$20 sps:$4 sm:$0xff]  }
 0x197   :  { %5336 = vmatpush1.bf16.msra.mxu0 %v8580_v52  ;;  %5723 = vmatpush1.bf16.msra.mxu1 %v8583_v28  ;;  %v8655_v52 = vld [vmem:[%s11700_s1 + $0x118c] ss:$20 sps:$4 sm:$0xff]   ;;  %v10637_v28 = vcombine.low %v10423_v20, %v10426_v21  ;;  %v8656_v20 = vld [vmem:[%s11700_s1 + $0x11a8] ss:$20 sps:$4 sm:$0xff]   ;;  %v8659_v21 = vld [vmem:[%s11700_s1 + $0x11b0] ss:$20 sps:$4 sm:$0xff]  }
 0x198   :  { %5337 = vmatprep.subr.bf16.mxu0 %v8588_v29  ;;  %5724 = vmatprep.subr.bf16.mxu1 %v8591_v56  ;;  %v8658_v29 = vld [vmem:[%s11700_s1 + $0x11ac] ss:$20 sps:$4 sm:$0xff]   ;;  %v8664_v56 = vld [vmem:[%s11700_s1 + $0x11d4] ss:$20 sps:$4 sm:$0xff]  }
 0x19b   :  { %5338 = vmatpush1.bf16.msra.mxu0 %v8586_v55  ;;  %5725 = vmatpush1.bf16.msra.mxu1 %v8589_v57  ;;  %v8661_v55 = vld [vmem:[%s11700_s1 + $0x11b4] ss:$20 sps:$4 sm:$0xff]   ;;  %v8667_v57 = vld [vmem:[%s11700_s1 + $0x11dc] ss:$20 sps:$4 sm:$0xff]  }
 0x19c   :  { %5339 = vmatprep.subr.bf16.mxu0 %v8594_v58  ;;  %5726 = vmatprep.subr.bf16.mxu1 %v8597_v1  ;;  %v8662_v58 = vld [vmem:[%s11700_s1 + $0x11d0] ss:$20 sps:$4 sm:$0xff]  }
 0x19d   :  { %v8670_v1 = vld [vmem:[%s11700_s1 + $0x11fc] ss:$20 sps:$4 sm:$0xff]  }
 0x19f   :  { %5340 = vmatpush1.bf16.msra.mxu0 %v8592_v59  ;;  %5727 = vmatpush1.bf16.msra.mxu1 %v8595_v2  ;;  %v8665_v59 = vld [vmem:[%s11700_s1 + $0x11d8] ss:$20 sps:$4 sm:$0xff]  }
 0x1a0   :  { %5341 = vmatprep.subr.bf16.mxu0 %v8600_v4  ;;  %5728 = vmatprep.subr.bf16.mxu1 %v8603_v6  ;;  %v8673_v2 = vld [vmem:[%s11700_s1 + $0x1204] ss:$20 sps:$4 sm:$0xff]  }
 0x1a1   :  { %v8668_v4 = vld [vmem:[%s11700_s1 + $0x11f8] ss:$20 sps:$4 sm:$0xff]  }
 0x1a2   :  { %v8676_v6 = vld [vmem:[%s11700_s1 + $0x1224] ss:$20 sps:$4 sm:$0xff]  }
 0x1a3   :  { %5342 = vmatpush1.bf16.msra.mxu0 %v8598_v63  ;;  %5729 = vmatpush1.bf16.msra.mxu1 %v8601_v7  ;;  %v8671_v63 = vld [vmem:[%s11700_s1 + $0x1200] ss:$20 sps:$4 sm:$0xff]  }
 0x1a4   :  { %5343 = vmatprep.subr.bf16.mxu0 %v8606_v60  ;;  %5730 = vmatprep.subr.bf16.mxu1 %v8609_v8  ;;  %v8679_v7 = vld [vmem:[%s11700_s1 + $0x122c] ss:$20 sps:$4 sm:$0xff]  }
 0x1a5   :  { %v8674_v60 = vld [vmem:[%s11700_s1 + $0x1220] ss:$20 sps:$4 sm:$0xff]  }
 0x1a6   :  { %v8682_v8 = vld [vmem:[%s11700_s1 + $0x124c] ss:$20 sps:$4 sm:$0xff]  }
 0x1a7   :  { %5344 = vmatpush1.bf16.msra.mxu0 %v8604_v61  ;;  %5731 = vmatpush1.bf16.msra.mxu1 %v8607_v9  ;;  %v8677_v61 = vld [vmem:[%s11700_s1 + $0x1228] ss:$20 sps:$4 sm:$0xff]  }
 0x1a8   :  { %5345 = vmatprep.subr.bf16.mxu0 %v8612_v10  ;;  %5732 = vmatprep.subr.bf16.mxu1 %v8615_v12  ;;  %v8685_v9 = vld [vmem:[%s11700_s1 + $0x1254] ss:$20 sps:$4 sm:$0xff]  }
 0x1a9   :  { %v8680_v10 = vld [vmem:[%s11700_s1 + $0x1248] ss:$20 sps:$4 sm:$0xff]  }
 0x1aa   :  { %v8688_v12 = vld [vmem:[%s11700_s1 + $0x1274] ss:$20 sps:$4 sm:$0xff]  }
 0x1ab   :  { %5346 = vmatpush1.bf16.msra.mxu0 %v8610_v11  ;;  %5733 = vmatpush1.bf16.msra.mxu1 %v8613_v13  ;;  %v8683_v11 = vld [vmem:[%s11700_s1 + $0x1250] ss:$20 sps:$4 sm:$0xff]  }
 0x1ac   :  { %5347 = vmatprep.subr.bf16.mxu0 %v8618_v14  ;;  %5734 = vmatprep.subr.bf16.mxu1 %v8621_v18  ;;  %v8691_v13 = vld [vmem:[%s11700_s1 + $0x127c] ss:$20 sps:$4 sm:$0xff]  }
 0x1ad   :  { %v8686_v14 = vld [vmem:[%s11700_s1 + $0x1270] ss:$20 sps:$4 sm:$0xff]  }
 0x1ae   :  { %v8694_v18 = vld [vmem:[%s11700_s1 + $0x129c] ss:$20 sps:$4 sm:$0xff]  }
 0x1af   :  { %5348 = vmatpush1.bf16.msra.mxu0 %v8616_v15  ;;  %5735 = vmatpush1.bf16.msra.mxu1 %v8619_v19  ;;  %v8689_v15 = vld [vmem:[%s11700_s1 + $0x1278] ss:$20 sps:$4 sm:$0xff]  }
 0x1b0   :  { %5349 = vmatprep.subr.bf16.mxu0 %v8624_v22  ;;  %5736 = vmatprep.subr.bf16.mxu1 %v8627_v25  ;;  %v8697_v19 = vld [vmem:[%s11700_s1 + $0x12a4] ss:$20 sps:$4 sm:$0xff]  }
 0x1b1   :  { %v8692_v22 = vld [vmem:[%s11700_s1 + $0x1298] ss:$20 sps:$4 sm:$0xff]  }
 0x1b2   :  { %v8700_v25 = vld [vmem:[%s11700_s1 + $0x12c4] ss:$20 sps:$4 sm:$0xff]  }
 0x1b3   :  { %5350 = vmatpush1.bf16.msra.mxu0 %v8622_v23  ;;  %5737 = vmatpush1.bf16.msra.mxu1 %v8625_v27  ;;  %v8695_v23 = vld [vmem:[%s11700_s1 + $0x12a0] ss:$20 sps:$4 sm:$0xff]  }
 0x1b4   :  { %5351 = vmatprep.subr.bf16.mxu0 %v8630_v34  ;;  %5738 = vmatprep.subr.bf16.mxu1 %v8633_v38  ;;  %v8703_v27 = vld [vmem:[%s11700_s1 + $0x12cc] ss:$20 sps:$4 sm:$0xff]  }
 0x1b5   :  { %v8698_v34 = vld [vmem:[%s11700_s1 + $0x12c0] ss:$20 sps:$4 sm:$0xff]  }
 0x1b6   :  { %v8706_v38 = vld [vmem:[%s11700_s1 + $0x12ec] ss:$20 sps:$4 sm:$0xff]  }
 0x1b7   :  { %5352 = vmatpush1.bf16.msra.mxu0 %v8628_v37  ;;  %5739 = vmatpush1.bf16.msra.mxu1 %v8631_v39  ;;  %v8701_v37 = vld [vmem:[%s11700_s1 + $0x12c8] ss:$20 sps:$4 sm:$0xff]  }
 0x1b8   :  { %5353 = vmatprep.subr.bf16.mxu0 %v8636_v40  ;;  %5740 = vmatprep.subr.bf16.mxu1 %v8639_v42  ;;  %v8709_v39 = vld [vmem:[%s11700_s1 + $0x12f4] ss:$20 sps:$4 sm:$0xff]  }
 0x1b9   :  { %v8704_v40 = vld [vmem:[%s11700_s1 + $0x12e8] ss:$20 sps:$4 sm:$0xff]  }
 0x1ba   :  { %v8712_v42 = vld [vmem:[%s11700_s1 + $0x1314] ss:$20 sps:$4 sm:$0xff]  }
 0x1bb   :  { %5354 = vmatpush1.bf16.msra.mxu0 %v8634_v41  ;;  %5741 = vmatpush1.bf16.msra.mxu1 %v8637_v43  ;;  %v8707_v41 = vld [vmem:[%s11700_s1 + $0x12f0] ss:$20 sps:$4 sm:$0xff]  }
 0x1bc   :  { %5355 = vmatprep.subr.bf16.mxu0 %v8642_v44  ;;  %5742 = vmatprep.subr.bf16.mxu1 %v8645_v45  ;;  %v8715_v43 = vld [vmem:[%s11700_s1 + $0x131c] ss:$20 sps:$4 sm:$0xff]   ;;  %v8713_v45 = vld [vmem:[%s11700_s1 + $0x1318] ss:$20 sps:$4 sm:$0xff]  }
 0x1bd   :  { %v8710_v44 = vld [vmem:[%s11700_s1 + $0x1310] ss:$20 sps:$4 sm:$0xff]  }
 0x1bf   :  { %5356 = vmatpush1.bf16.msra.mxu0 %v8640_v47  ;;  %5743 = vmatpush1.bf16.msra.mxu1 %v8643_v48  ;;  %v8718_v47 = vld [vmem:[%s11700_s1 + $0x133c] ss:$20 sps:$4 sm:$0xff]   ;;  %v8721_v48 = vld [vmem:[%s11700_s1 + $0x1344] ss:$20 sps:$4 sm:$0xff]  }
 0x1c0   :  { %5368 = vmatprep.subr.bf16.mxu0 %v8652_v49  ;;  %5755 = vmatprep.subr.bf16.mxu1 %v8655_v52  ;;  %v8716_v49 = vld [vmem:[%s11700_s1 + $0x1338] ss:$20 sps:$4 sm:$0xff]  }
 0x1c1   :  { %v8724_v52 = vld [vmem:[%s11700_s1 + $0x1364] ss:$20 sps:$4 sm:$0xff]  }
 0x1c2   :  { %5358 = vmatmul.mubr.bf16.vlgmr.msra.gmra.mrb[0].mxu0 %v10637_v28  ;;  %5745 = vmatmul.mubr.bf16.vlgmr.msra.gmra.mrb[0].mxu1 %v10637_v28 }
 0x1c3   :  { %5369 = vmatpush1.bf16.msra.mxu0 %v8650_v51  ;;  %5756 = vmatpush1.bf16.msra.mxu1 %v8653_v53  ;;  %v8719_v51 = vld [vmem:[%s11700_s1 + $0x1340] ss:$20 sps:$4 sm:$0xff]  }
 0x1c4   :  { %5370 = vmatprep.subr.bf16.mxu0 %v8658_v29  ;;  %5757 = vmatprep.subr.bf16.mxu1 %v8661_v55  ;;  %v8727_v53 = vld [vmem:[%s11700_s1 + $0x136c] ss:$20 sps:$4 sm:$0xff]   ;;  %v8725_v55 = vld [vmem:[%s11700_s1 + $0x1368] ss:$20 sps:$4 sm:$0xff]  }
 0x1c5   :  { %5400 = vmatprep.mubr.bf16.mxu0 %v10434_v24  ;;  %5787 = vmatprep.mubr.bf16.mxu1 %v10434_v24  ;;  %v8722_v29 = vld [vmem:[%s11700_s1 + $0x1360] ss:$20 sps:$4 sm:$0xff]  }
 0x1c7   :  { %5371 = vmatpush1.bf16.msra.mxu0 %v8656_v20  ;;  %5758 = vmatpush1.bf16.msra.mxu1 %v8659_v21  ;;  %v8730_v20 = vld [vmem:[%s11700_s1 + $0x138c] ss:$20 sps:$4 sm:$0xff]   ;;  %v8733_v21 = vld [vmem:[%s11700_s1 + $0x1394] ss:$20 sps:$4 sm:$0xff]  }
 0x1c8   :  { %5372 = vmatprep.subr.bf16.mxu0 %v8664_v56  ;;  %5759 = vmatprep.subr.bf16.mxu1 %v8667_v57  ;;  %v8842_v56 = vld [vmem:[%s11699_s0 + $0x10] ss:$18 sps:$4 sm:$0x33]   ;;  %v8843_v57 = vld [vmem:[%s11699_s0 + $0x34] ss:$18 sps:$4 sm:$0x33]  }
 0x1cb   :  { %5373 = vmatpush1.bf16.msra.mxu0 %v8662_v58  ;;  %5760 = vmatpush1.bf16.msra.mxu1 %v8665_v59  ;;  %v8844_v58 = vld [vmem:[%s11699_s0 + $0x58] ss:$18 sps:$4 sm:$0x33]   ;;  %v8845_v59 = vld [vmem:[%s11699_s0 + $0x7c] ss:$18 sps:$4 sm:$0x33]  }
 0x1cc   :  { %5374 = vmatprep.subr.bf16.mxu0 %v8670_v1  ;;  %5761 = vmatprep.subr.bf16.mxu1 %v8673_v2  ;;  %v8728_v1 = vld [vmem:[%s11700_s1 + $0x1388] ss:$20 sps:$4 sm:$0xff]   ;;  %v8731_v2 = vld [vmem:[%s11700_s1 + $0x1390] ss:$20 sps:$4 sm:$0xff]  }
 0x1cf   :  { %5375 = vmatpush1.bf16.msra.mxu0 %v8668_v4  ;;  %5762 = vmatpush1.bf16.msra.mxu1 %v8671_v63  ;;  %v8736_v4 = vld [vmem:[%s11700_s1 + $0x13b4] ss:$20 sps:$4 sm:$0xff]   ;;  %v8739_v63 = vld [vmem:[%s11700_s1 + $0x13bc] ss:$20 sps:$4 sm:$0xff]  }
 0x1d0   :  { %5376 = vmatprep.subr.bf16.mxu0 %v8676_v6  ;;  %5763 = vmatprep.subr.bf16.mxu1 %v8679_v7  ;;  %v10818_v6 = vrot.slane %v8842_v56, %v9258_v54  ;;  %v10821_v7 = vrot.slane %v8843_v57, %v9258_v54  ;;  %v8779_v56 = vld [vmem:[%s11700_s1 + $0x14d0] ss:$20 sps:$4 sm:$0xff]   ;;  %v8784_v57 = vld [vmem:[%s11700_s1 + $0x14f4] ss:$20 sps:$4 sm:$0xff]  }
 0x1d3   :  { %5377 = vmatpush1.bf16.msra.mxu0 %v8674_v60  ;;  %5764 = vmatpush1.bf16.msra.mxu1 %v8677_v61  ;;  %v10824_v60 = vrot.slane %v8844_v58, %v9258_v54  ;;  %v10827_v61 = vrot.slane %v8845_v59, %v9258_v54  ;;  %v8787_v58 = vld [vmem:[%s11700_s1 + $0x14fc] ss:$20 sps:$4 sm:$0xff]  }
 0x1d4   :  { %5378 = vmatprep.subr.bf16.mxu0 %v8682_v8  ;;  %5765 = vmatprep.subr.bf16.mxu1 %v8685_v9  ;;  %v8734_v8 = vld [vmem:[%s11700_s1 + $0x13b0] ss:$20 sps:$4 sm:$0xff]   ;;  %v8737_v9 = vld [vmem:[%s11700_s1 + $0x13b8] ss:$20 sps:$4 sm:$0xff]  }
 0x1d5   :  { %v8782_v59 = vld [vmem:[%s11700_s1 + $0x14f0] ss:$20 sps:$4 sm:$0xff]  }
 0x1d7   :  { %5379 = vmatpush1.bf16.msra.mxu0 %v8680_v10  ;;  %5766 = vmatpush1.bf16.msra.mxu1 %v8683_v11  ;;  %v8742_v10 = vld [vmem:[%s11700_s1 + $0x13dc] ss:$20 sps:$4 sm:$0xff]   ;;  %v8745_v11 = vld [vmem:[%s11700_s1 + $0x13e4] ss:$20 sps:$4 sm:$0xff]  }
 0x1d8   :  { %5380 = vmatprep.subr.bf16.mxu0 %v8688_v12  ;;  %5767 = vmatprep.subr.bf16.mxu1 %v8691_v13  ;;  %v1272_v12 = vcombine.high %v10818_v6, %v10821_v7  ;;  %v1274_v13 = vcombine.high %v10824_v60, %v10827_v61 }
 0x1db   :  { %5381 = vmatpush1.bf16.msra.mxu0 %v8686_v14  ;;  %5768 = vmatpush1.bf16.msra.mxu1 %v8689_v15  ;;  %v8740_v14 = vld [vmem:[%s11700_s1 + $0x13d8] ss:$20 sps:$4 sm:$0xff]   ;;  %v8743_v15 = vld [vmem:[%s11700_s1 + $0x13e0] ss:$20 sps:$4 sm:$0xff]  }
 0x1dc   :  { %5382 = vmatprep.subr.bf16.mxu0 %v8694_v18  ;;  %5769 = vmatprep.subr.bf16.mxu1 %v8697_v19  ;;  %v8748_v18 = vld [vmem:[%s11700_s1 + $0x1404] ss:$20 sps:$4 sm:$0xff]   ;;  %v8751_v19 = vld [vmem:[%s11700_s1 + $0x140c] ss:$20 sps:$4 sm:$0xff]  }
 0x1df   :  { %5383 = vmatpush1.bf16.msra.mxu0 %v8692_v22  ;;  %5770 = vmatpush1.bf16.msra.mxu1 %v8695_v23  ;;  %v8746_v22 = vld [vmem:[%s11700_s1 + $0x1400] ss:$20 sps:$4 sm:$0xff]   ;;  %v1288_v23 = vrot.slane %v1272_v12, %v9258_v54  ;;  %v8797_v12 = vld [vmem:[%s11700_s1 + $0x1548] ss:$20 sps:$4 sm:$0xff]  }
 0x1e0   :  { %5384 = vmatprep.subr.bf16.mxu0 %v8700_v25  ;;  %5771 = vmatprep.subr.bf16.mxu1 %v8703_v27  ;;  %v1302_v25 = vrot.slane %v1274_v13, %v9258_v54  ;;  %v8749_v27 = vld [vmem:[%s11700_s1 + $0x1408] ss:$20 sps:$4 sm:$0xff]   ;;  %v8802_v13 = vld [vmem:[%s11700_s1 + $0x156c] ss:$20 sps:$4 sm:$0xff]  }
 0x1e3   :  { %5385 = vmatpush1.bf16.msra.mxu0 %v8698_v34  ;;  %5772 = vmatpush1.bf16.msra.mxu1 %v8701_v37  ;;  %v8754_v34 = vld [vmem:[%s11700_s1 + $0x142c] ss:$20 sps:$4 sm:$0xff]   ;;  %v8757_v37 = vld [vmem:[%s11700_s1 + $0x1434] ss:$20 sps:$4 sm:$0xff]  }
 0x1e4   :  { %5386 = vmatprep.subr.bf16.mxu0 %v8706_v38  ;;  %5773 = vmatprep.subr.bf16.mxu1 %v8709_v39  ;;  %v10871_v38 = vcombine.low %v1288_v23, %v1302_v25  ;;  %v8752_v39 = vld [vmem:[%s11700_s1 + $0x1428] ss:$20 sps:$4 sm:$0xff]   ;;  %v8806_v23 = vld [vmem:[%s11700_s1 + $0x1590] ss:$20 sps:$4 sm:$0xff]   ;;  %v8809_v25 = vld [vmem:[%s11700_s1 + $0x1598] ss:$20 sps:$4 sm:$0xff]  }
 0x1e7   :  { %5387 = vmatpush1.bf16.msra.mxu0 %v8704_v40  ;;  %5774 = vmatpush1.bf16.msra.mxu1 %v8707_v41  ;;  %v8755_v40 = vld [vmem:[%s11700_s1 + $0x1430] ss:$20 sps:$4 sm:$0xff]   ;;  %v8760_v41 = vld [vmem:[%s11700_s1 + $0x1454] ss:$20 sps:$4 sm:$0xff]  }
 0x1e8   :  { %5388 = vmatprep.subr.bf16.mxu0 %v8712_v42  ;;  %5775 = vmatprep.subr.bf16.mxu1 %v8715_v43  ;;  %v8763_v42 = vld [vmem:[%s11700_s1 + $0x145c] ss:$20 sps:$4 sm:$0xff]  }
 0x1e9   :  { %v8758_v43 = vld [vmem:[%s11700_s1 + $0x1450] ss:$20 sps:$4 sm:$0xff]  }
 0x1eb   :  { %5389 = vmatpush1.bf16.msra.mxu0 %v8710_v44  ;;  %5776 = vmatpush1.bf16.msra.mxu1 %v8713_v45  ;;  %v8761_v44 = vld [vmem:[%s11700_s1 + $0x1458] ss:$20 sps:$4 sm:$0xff]   ;;  %v8766_v45 = vld [vmem:[%s11700_s1 + $0x147c] ss:$20 sps:$4 sm:$0xff]  }
 0x1ec   :  { %5390 = vmatprep.subr.bf16.mxu0 %v8718_v47  ;;  %5777 = vmatprep.subr.bf16.mxu1 %v8721_v48  ;;  %v8769_v47 = vld [vmem:[%s11700_s1 + $0x1484] ss:$20 sps:$4 sm:$0xff]  }
 0x1ed   :  { %v8764_v48 = vld [vmem:[%s11700_s1 + $0x1478] ss:$20 sps:$4 sm:$0xff]  }
 0x1ef   :  { %5391 = vmatpush1.bf16.msra.mxu0 %v8716_v49  ;;  %5778 = vmatpush1.bf16.msra.mxu1 %v8719_v51  ;;  %v8767_v49 = vld [vmem:[%s11700_s1 + $0x1480] ss:$20 sps:$4 sm:$0xff]   ;;  %v8772_v51 = vld [vmem:[%s11700_s1 + $0x14a4] ss:$20 sps:$4 sm:$0xff]  }
 0x1f0   :  { %5392 = vmatprep.subr.bf16.mxu0 %v8724_v52  ;;  %5779 = vmatprep.subr.bf16.mxu1 %v8727_v53  ;;  %v8775_v52 = vld [vmem:[%s11700_s1 + $0x14ac] ss:$20 sps:$4 sm:$0xff]  }
 0x1f1   :  { %v8770_v53 = vld [vmem:[%s11700_s1 + $0x14a0] ss:$20 sps:$4 sm:$0xff]  }
 0x1f3   :  { %5393 = vmatpush1.bf16.msra.mxu0 %v8722_v29  ;;  %5780 = vmatpush1.bf16.msra.mxu1 %v8725_v55  ;;  %v8773_v29 = vld [vmem:[%s11700_s1 + $0x14a8] ss:$20 sps:$4 sm:$0xff]   ;;  %v8778_v55 = vld [vmem:[%s11700_s1 + $0x14cc] ss:$20 sps:$4 sm:$0xff]  }
 0x1f4   :  { %5394 = vmatprep.subr.bf16.mxu0 %v8730_v20  ;;  %5781 = vmatprep.subr.bf16.mxu1 %v8733_v21  ;;  %v8781_v20 = vld [vmem:[%s11700_s1 + $0x14d4] ss:$20 sps:$4 sm:$0xff]  }
 0x1f5   :  { %v8776_v21 = vld [vmem:[%s11700_s1 + $0x14c8] ss:$20 sps:$4 sm:$0xff]  }
 0x1f7   :  { %5395 = vmatpush1.bf16.msra.mxu0 %v8728_v1  ;;  %5782 = vmatpush1.bf16.msra.mxu1 %v8731_v2  ;;  %v8785_v1 = vld [vmem:[%s11700_s1 + $0x14f8] ss:$20 sps:$4 sm:$0xff]   ;;  %v8790_v2 = vld [vmem:[%s11700_s1 + $0x151c] ss:$20 sps:$4 sm:$0xff]  }
 0x1f8   :  { %5396 = vmatprep.subr.bf16.mxu0 %v8736_v4  ;;  %5783 = vmatprep.subr.bf16.mxu1 %v8739_v63  ;;  %v8793_v4 = vld [vmem:[%s11700_s1 + $0x1524] ss:$20 sps:$4 sm:$0xff]  }
 0x1f9   :  { %v8788_v63 = vld [vmem:[%s11700_s1 + $0x1518] ss:$20 sps:$4 sm:$0xff]  }
 0x1fb   :  { %5397 = vmatpush1.bf16.msra.mxu0 %v8734_v8  ;;  %5784 = vmatpush1.bf16.msra.mxu1 %v8737_v9  ;;  %v8791_v8 = vld [vmem:[%s11700_s1 + $0x1520] ss:$20 sps:$4 sm:$0xff]   ;;  %v8796_v9 = vld [vmem:[%s11700_s1 + $0x1544] ss:$20 sps:$4 sm:$0xff]  }
 0x1fc   :  { %5398 = vmatprep.subr.bf16.mxu0 %v8742_v10  ;;  %5785 = vmatprep.subr.bf16.mxu1 %v8745_v11  ;;  %v8799_v10 = vld [vmem:[%s11700_s1 + $0x154c] ss:$20 sps:$4 sm:$0xff]  }
 0x1fd   :  { %v8794_v11 = vld [vmem:[%s11700_s1 + $0x1540] ss:$20 sps:$4 sm:$0xff]  }
 0x1ff   :  { %5399 = vmatpush1.bf16.msra.mxu0 %v8740_v14  ;;  %5786 = vmatpush1.bf16.msra.mxu1 %v8743_v15  ;;  %v8805_v14 = vld [vmem:[%s11700_s1 + $0x1574] ss:$20 sps:$4 sm:$0xff]  }
 0x200   :  { %5411 = vmatprep.subr.bf16.mxu0 %v8748_v18  ;;  %5798 = vmatprep.subr.bf16.mxu1 %v8751_v19  ;;  %v8800_v15 = vld [vmem:[%s11700_s1 + $0x1568] ss:$20 sps:$4 sm:$0xff]   ;;  %v8803_v18 = vld [vmem:[%s11700_s1 + $0x1570] ss:$20 sps:$4 sm:$0xff]  }
 0x201   :  { %v8808_v19 = vld [vmem:[%s11700_s1 + $0x1594] ss:$20 sps:$4 sm:$0xff]  }
 0x202   :  { %5401 = vmatmul.mubr.bf16.vlgmr.msra.gmra.mrb[0].mxu0 %v10446_v32  ;;  %5788 = vmatmul.mubr.bf16.vlgmr.msra.gmra.mrb[0].mxu1 %v10446_v32 }
 0x203   :  { %5412 = vmatpush1.bf16.msra.mxu0 %v8746_v22  ;;  %5799 = vmatpush1.bf16.msra.mxu1 %v8749_v27  ;;  %v8811_v22 = vld [vmem:[%s11700_s1 + $0x159c] ss:$20 sps:$4 sm:$0xff]  }
 0x204   :  { %5413 = vmatprep.subr.bf16.mxu0 %v8754_v34  ;;  %5800 = vmatprep.subr.bf16.mxu1 %v8757_v37  ;;  %v8814_v27 = vld [vmem:[%s11700_s1 + $0x15bc] ss:$20 sps:$4 sm:$0xff]   ;;  %v8817_v34 = vld [vmem:[%s11700_s1 + $0x15c4] ss:$20 sps:$4 sm:$0xff]  }
 0x205   :  { %5443 = vmatprep.mubr.bf16.mxu0 %v10871_v38  ;;  %5830 = vmatprep.mubr.bf16.mxu1 %v10871_v38  ;;  %v8812_v37 = vld [vmem:[%s11700_s1 + $0x15b8] ss:$20 sps:$4 sm:$0xff]  }
 0x207   :  { %5414 = vmatpush1.bf16.msra.mxu0 %v8752_v39  ;;  %5801 = vmatpush1.bf16.msra.mxu1 %v8755_v40  ;;  %v8815_v39 = vld [vmem:[%s11700_s1 + $0x15c0] ss:$20 sps:$4 sm:$0xff]   ;;  %v8820_v40 = vld [vmem:[%s11700_s1 + $0x15e4] ss:$20 sps:$4 sm:$0xff]  }
 0x208   :  { %5415 = vmatprep.subr.bf16.mxu0 %v8760_v41  ;;  %5802 = vmatprep.subr.bf16.mxu1 %v8763_v42  ;;  %v8823_v41 = vld [vmem:[%s11700_s1 + $0x15ec] ss:$20 sps:$4 sm:$0xff]  }
 0x209   :  { %v8818_v42 = vld [vmem:[%s11700_s1 + $0x15e0] ss:$20 sps:$4 sm:$0xff]  }
 0x20b   :  { %5416 = vmatpush1.bf16.msra.mxu0 %v8758_v43  ;;  %5803 = vmatpush1.bf16.msra.mxu1 %v8761_v44  ;;  %v8821_v43 = vld [vmem:[%s11700_s1 + $0x15e8] ss:$20 sps:$4 sm:$0xff]   ;;  %v8826_v44 = vld [vmem:[%s11700_s1 + $0x160c] ss:$20 sps:$4 sm:$0xff]  }
 0x20c   :  { %5417 = vmatprep.subr.bf16.mxu0 %v8766_v45  ;;  %5804 = vmatprep.subr.bf16.mxu1 %v8769_v47  ;;  %v8829_v45 = vld [vmem:[%s11700_s1 + $0x1614] ss:$20 sps:$4 sm:$0xff]  }
 0x20d   :  { %v8824_v47 = vld [vmem:[%s11700_s1 + $0x1608] ss:$20 sps:$4 sm:$0xff]  }
 0x20f   :  { %5418 = vmatpush1.bf16.msra.mxu0 %v8764_v48  ;;  %5805 = vmatpush1.bf16.msra.mxu1 %v8767_v49  ;;  %v8827_v48 = vld [vmem:[%s11700_s1 + $0x1610] ss:$20 sps:$4 sm:$0xff]   ;;  %v8832_v49 = vld [vmem:[%s11700_s1 + $0x1634] ss:$20 sps:$4 sm:$0xff]  }
 0x210   :  { %5419 = vmatprep.subr.bf16.mxu0 %v8772_v51  ;;  %5806 = vmatprep.subr.bf16.mxu1 %v8775_v52  ;;  %v8835_v51 = vld [vmem:[%s11700_s1 + $0x163c] ss:$20 sps:$4 sm:$0xff]   ;;  %v1271_v52 = vcombine.low %v10818_v6, %v10821_v7  ;;  %v8841_v6 = vld [vmem:[%s11700_s1 + $0x1664] ss:$20 sps:$4 sm:$0xff]  }
 0x212   :  { %v1281_v7 = vrot.slane %v1271_v52, %v9258_v54  ;;  %v8884_v52 = vld [vmem:[%s11700_s1 + $0x8f8] ss:$20 sps:$4 sm:$0xff]  }
 0x213   :  { %5420 = vmatpush1.bf16.msra.mxu0 %v8770_v53  ;;  %5807 = vmatpush1.bf16.msra.mxu1 %v8773_v29  ;;  %v1273_v53 = vcombine.low %v10824_v60, %v10827_v61  ;;  %v8830_v29 = vld [vmem:[%s11700_s1 + $0x1630] ss:$20 sps:$4 sm:$0xff]   ;;  %v8836_v61 = vld [vmem:[%s11700_s1 + $0x1658] ss:$20 sps:$4 sm:$0xff]  }
 0x214   :  { %5421 = vmatprep.subr.bf16.mxu0 %v8778_v55  ;;  %5808 = vmatprep.subr.bf16.mxu1 %v8781_v20  ;;  %v8833_v55 = vld [vmem:[%s11700_s1 + $0x1638] ss:$20 sps:$4 sm:$0xff]   ;;  %v8838_v20 = vld [vmem:[%s11700_s1 + $0x165c] ss:$20 sps:$4 sm:$0xff]  }
 0x215   :  { %v1295_v60 = vrot.slane %v1273_v53, %v9258_v54  ;;  %v8848_v54 = vld [vmem:[%s11700_s1 + $0x3d0] ss:$20 sps:$4 sm:$0xff]   ;;  %v8883_v53 = vld [vmem:[%s11700_s1 + $0x538] ss:$20 sps:$4 sm:$0xff]  }
 0x217   :  { %5422 = vmatpush1.bf16.msra.mxu0 %v8776_v21  ;;  %5809 = vmatpush1.bf16.msra.mxu1 %v8779_v56  ;;  %v8839_v21 = vld [vmem:[%s11700_s1 + $0x1660] ss:$20 sps:$4 sm:$0xff]   ;;  %v8846_v56 = vld [vmem:[%s11700_s1 + $0x150] ss:$20 sps:$4 sm:$0xff]  }
 0x218   :  { %5423 = vmatprep.subr.bf16.mxu0 %v8784_v57  ;;  %5810 = vmatprep.subr.bf16.mxu1 %v8787_v58  ;;  %v11063_v57 = vcombine.low %v1281_v7, %v1295_v60  ;;  %v8847_v58 = vld [vmem:[%s11700_s1 + $0x10] ss:$20 sps:$4 sm:$0xff]   ;;  %v8893_v7 = vld [vmem:[%s11700_s1 + $0x808] ss:$20 sps:$4 sm:$0xff]  }
 0x219   :  { %v8894_v60 = vld [vmem:[%s11700_s1 + $0x6f0] ss:$20 sps:$4 sm:$0xff]  }
 0x21b   :  { %5424 = vmatpush1.bf16.msra.mxu0 %v8782_v59  ;;  %5811 = vmatpush1.bf16.msra.mxu1 %v8785_v1  ;;  %v8849_v59 = vld [vmem:[%s11700_s1 + $0x290] ss:$20 sps:$4 sm:$0xff]   ;;  %v8850_v1 = vld [vmem:[%s11700_s1 + $0x178] ss:$20 sps:$4 sm:$0xff]  }
 0x21c   :  { %5425 = vmatprep.subr.bf16.mxu0 %v8790_v2  ;;  %5812 = vmatprep.subr.bf16.mxu1 %v8793_v4  ;;  %v8852_v2 = vld [vmem:[%s11700_s1 + $0x3f8] ss:$20 sps:$4 sm:$0xff]  }
 0x21d   :  { %v8851_v4 = vld [vmem:[%s11700_s1 + $0x38] ss:$20 sps:$4 sm:$0xff]  }
 0x21f   :  { %5426 = vmatpush1.bf16.msra.mxu0 %v8788_v63  ;;  %5813 = vmatpush1.bf16.msra.mxu1 %v8791_v8  ;;  %v8853_v63 = vld [vmem:[%s11700_s1 + $0x2b8] ss:$20 sps:$4 sm:$0xff]   ;;  %v8854_v8 = vld [vmem:[%s11700_s1 + $0x1a0] ss:$20 sps:$4 sm:$0xff]  }
 0x220   :  { %5427 = vmatprep.subr.bf16.mxu0 %v8796_v9  ;;  %5814 = vmatprep.subr.bf16.mxu1 %v8799_v10  ;;  %v8856_v9 = vld [vmem:[%s11700_s1 + $0x420] ss:$20 sps:$4 sm:$0xff]  }
 0x221   :  { %v8855_v10 = vld [vmem:[%s11700_s1 + $0x60] ss:$20 sps:$4 sm:$0xff]  }
 0x223   :  { %5428 = vmatpush1.bf16.msra.mxu0 %v8794_v11  ;;  %5815 = vmatpush1.bf16.msra.mxu1 %v8797_v12  ;;  %v8857_v11 = vld [vmem:[%s11700_s1 + $0x2e0] ss:$20 sps:$4 sm:$0xff]   ;;  %v8858_v12 = vld [vmem:[%s11700_s1 + $0x1c8] ss:$20 sps:$4 sm:$0xff]  }
 0x224   :  { %5429 = vmatprep.subr.bf16.mxu0 %v8802_v13  ;;  %5816 = vmatprep.subr.bf16.mxu1 %v8805_v14  ;;  %v8861_v13 = vld [vmem:[%s11700_s1 + $0x308] ss:$20 sps:$4 sm:$0xff]   ;;  %v8862_v14 = vld [vmem:[%s11700_s1 + $0x1f0] ss:$20 sps:$4 sm:$0xff]  }
 0x227   :  { %5430 = vmatpush1.bf16.msra.mxu0 %v8800_v15  ;;  %5817 = vmatpush1.bf16.msra.mxu1 %v8803_v18  ;;  %v8864_v15 = vld [vmem:[%s11700_s1 + $0x470] ss:$20 sps:$4 sm:$0xff]  }
 0x228   :  { %5431 = vmatprep.subr.bf16.mxu0 %v8808_v19  ;;  %5818 = vmatprep.subr.bf16.mxu1 %v8811_v22  ;;  %v8863_v18 = vld [vmem:[%s11700_s1 + $0xb0] ss:$20 sps:$4 sm:$0xff]   ;;  %v8866_v22 = vld [vmem:[%s11700_s1 + $0x218] ss:$20 sps:$4 sm:$0xff]  }
 0x229   :  { %v8865_v19 = vld [vmem:[%s11700_s1 + $0x330] ss:$20 sps:$4 sm:$0xff]  }
 0x22b   :  { %5432 = vmatpush1.bf16.msra.mxu0 %v8806_v23  ;;  %5819 = vmatpush1.bf16.msra.mxu1 %v8809_v25  ;;  %v8868_v23 = vld [vmem:[%s11700_s1 + $0x498] ss:$20 sps:$4 sm:$0xff]  }
 0x22c   :  { %5433 = vmatprep.subr.bf16.mxu0 %v8814_v27  ;;  %5820 = vmatprep.subr.bf16.mxu1 %v8817_v34  ;;  %v8867_v25 = vld [vmem:[%s11700_s1 + $0xd8] ss:$20 sps:$4 sm:$0xff]   ;;  %v8870_v34 = vld [vmem:[%s11700_s1 + $0x240] ss:$20 sps:$4 sm:$0xff]  }
 0x22d   :  { %v8869_v27 = vld [vmem:[%s11700_s1 + $0x358] ss:$20 sps:$4 sm:$0xff]  }
 0x22f   :  { %5434 = vmatpush1.bf16.msra.mxu0 %v8812_v37  ;;  %5821 = vmatpush1.bf16.msra.mxu1 %v8815_v39  ;;  %v8872_v37 = vld [vmem:[%s11700_s1 + $0x4c0] ss:$20 sps:$4 sm:$0xff]  }
 0x230   :  { %5435 = vmatprep.subr.bf16.mxu0 %v8820_v40  ;;  %5822 = vmatprep.subr.bf16.mxu1 %v8823_v41  ;;  %v8871_v39 = vld [vmem:[%s11700_s1 + $0x100] ss:$20 sps:$4 sm:$0xff]   ;;  %v8874_v41 = vld [vmem:[%s11700_s1 + $0x268] ss:$20 sps:$4 sm:$0xff]  }
 0x231   :  { %v8873_v40 = vld [vmem:[%s11700_s1 + $0x380] ss:$20 sps:$4 sm:$0xff]  }
 0x233   :  { %5436 = vmatpush1.bf16.msra.mxu0 %v8818_v42  ;;  %5823 = vmatpush1.bf16.msra.mxu1 %v8821_v43  ;;  %v8876_v42 = vld [vmem:[%s11700_s1 + $0x4e8] ss:$20 sps:$4 sm:$0xff]  }
 0x234   :  { %5437 = vmatprep.subr.bf16.mxu0 %v8826_v44  ;;  %5824 = vmatprep.subr.bf16.mxu1 %v8829_v45  ;;  %v8875_v43 = vld [vmem:[%s11700_s1 + $0x128] ss:$20 sps:$4 sm:$0xff]   ;;  %v8878_v45 = vld [vmem:[%s11700_s1 + $0x650] ss:$20 sps:$4 sm:$0xff]  }
 0x235   :  { %v8877_v44 = vld [vmem:[%s11700_s1 + $0x3a8] ss:$20 sps:$4 sm:$0xff]  }
 0x237   :  { %5438 = vmatpush1.bf16.msra.mxu0 %v8824_v47  ;;  %5825 = vmatpush1.bf16.msra.mxu1 %v8827_v48  ;;  %v8880_v47 = vld [vmem:[%s11700_s1 + $0x8d0] ss:$20 sps:$4 sm:$0xff]  }
 0x238   :  { %5439 = vmatprep.subr.bf16.mxu0 %v8832_v49  ;;  %5826 = vmatprep.subr.bf16.mxu1 %v8835_v51  ;;  %v8879_v48 = vld [vmem:[%s11700_s1 + $0x510] ss:$20 sps:$4 sm:$0xff]   ;;  %v8882_v51 = vld [vmem:[%s11700_s1 + $0x678] ss:$20 sps:$4 sm:$0xff]  }
 0x239   :  { %v8881_v49 = vld [vmem:[%s11700_s1 + $0x790] ss:$20 sps:$4 sm:$0xff]  }
 0x23b   :  { %5440 = vmatpush1.bf16.msra.mxu0 %v8830_v29  ;;  %5827 = vmatpush1.bf16.msra.mxu1 %v8833_v55  ;;  %v8885_v29 = vld [vmem:[%s11700_s1 + $0x7b8] ss:$20 sps:$4 sm:$0xff]   ;;  %v8886_v55 = vld [vmem:[%s11700_s1 + $0x6a0] ss:$20 sps:$4 sm:$0xff]  }
 0x23c   :  { %5441 = vmatprep.subr.bf16.mxu0 %v8838_v20  ;;  %5828 = vmatprep.subr.bf16.mxu1 %v8841_v6  ;;  %v8889_v20 = vld [vmem:[%s11700_s1 + $0x7e0] ss:$20 sps:$4 sm:$0xff]   ;;  %v8890_v6 = vld [vmem:[%s11700_s1 + $0x6c8] ss:$20 sps:$4 sm:$0xff]  }
 0x23f   :  { %5442 = vmatpush1.bf16.msra.mxu0 %v8836_v61  ;;  %5829 = vmatpush1.bf16.msra.mxu1 %v8839_v21  ;;  %v8896_v61 = vld [vmem:[%s11700_s1 + $0x970] ss:$20 sps:$4 sm:$0xff]  }
 0x240   :  { %7576 = vmatprep.subr.bf16.mxu0 %v8846_v56  ;;  %7598 = vmatprep.subr.bf16.mxu1 %v8848_v54  ;;  %v8895_v21 = vld [vmem:[%s11700_s1 + $0x5b0] ss:$20 sps:$4 sm:$0xff]   ;;  %v8898_v54 = vld [vmem:[%s11700_s1 + $0x718] ss:$20 sps:$4 sm:$0xff]  }
 0x241   :  { %v8897_v56 = vld [vmem:[%s11700_s1 + $0x830] ss:$20 sps:$4 sm:$0xff]  }
 0x242   :  { %5444 = vmatmul.mubr.bf16.vlgmr.msra.gmra.mrb[0].mxu0 %v11063_v57  ;;  %5831 = vmatmul.mubr.bf16.vlgmr.msra.gmra.mrb[0].mxu1 %v11063_v57 }
 0x243   :  { %7577 = vmatpush3.bf16.msra.mxu0 %v8847_v58  ;;  %7599 = vmatpush3.bf16.msra.mxu1 %v8849_v59  ;;  %v8900_v58 = vld [vmem:[%s11700_s1 + $0x998] ss:$20 sps:$4 sm:$0xff]  }
 0x244   :  { %7578 = vmatprep.subr.bf16.mxu0 %v8850_v1  ;;  %7600 = vmatprep.subr.bf16.mxu1 %v8852_v2  ;;  %v8899_v59 = vld [vmem:[%s11700_s1 + $0x5d8] ss:$20 sps:$4 sm:$0xff]   ;;  %v8902_v2 = vld [vmem:[%s11700_s1 + $0x740] ss:$20 sps:$4 sm:$0xff]  }
 0x245   :  { %5873 = vmatprep.mubr.bf16.mxu0 %v9307_v16  ;;  %5914 = vmatprep.mubr.bf16.mxu1 %v9351_v31  ;;  %v8860_v16 = vld [vmem:[%s11700_s1 + $0x448] ss:$20 sps:$4 sm:$0xff]   ;;  %v8901_v1 = vld [vmem:[%s11700_s1 + $0x858] ss:$20 sps:$4 sm:$0xff]  }
 0x246   :  { %v8859_v31 = vld [vmem:[%s11700_s1 + $0x88] ss:$20 sps:$4 sm:$0xff]  }
 0x247   :  { %7579 = vmatpush3.bf16.msra.mxu0 %v8851_v4  ;;  %7601 = vmatpush3.bf16.msra.mxu1 %v8853_v63  ;;  %v8904_v4 = vld [vmem:[%s11700_s1 + $0x9c0] ss:$20 sps:$4 sm:$0xff]  }
 0x248   :  { %7580 = vmatprep.subr.bf16.mxu0 %v8854_v8  ;;  %7602 = vmatprep.subr.bf16.mxu1 %v8856_v9  ;;  %v8903_v63 = vld [vmem:[%s11700_s1 + $0x600] ss:$20 sps:$4 sm:$0xff]   ;;  %v8906_v9 = vld [vmem:[%s11700_s1 + $0x768] ss:$20 sps:$4 sm:$0xff]  }
 0x249   :  { %v8905_v8 = vld [vmem:[%s11700_s1 + $0x880] ss:$20 sps:$4 sm:$0xff]  }
 0x24b   :  { %7581 = vmatpush3.bf16.msra.mxu0 %v8855_v10  ;;  %7603 = vmatpush3.bf16.msra.mxu1 %v8857_v11  ;;  %v8908_v10 = vld [vmem:[%s11700_s1 + $0x9e8] ss:$20 sps:$4 sm:$0xff]  }
 0x24c   :  { %7582 = vmatprep.subr.bf16.mxu0 %v8858_v12  ;;  %7604 = vmatprep.subr.bf16.mxu1 %v8860_v16  ;;  %v8907_v11 = vld [vmem:[%s11700_s1 + $0x628] ss:$20 sps:$4 sm:$0xff]   ;;  %v8910_v16 = vld [vmem:[%s11700_s1 + $0xb50] ss:$20 sps:$4 sm:$0xff]  }
 0x24d   :  { %v8909_v12 = vld [vmem:[%s11700_s1 + $0x8a8] ss:$20 sps:$4 sm:$0xff]  }
 0x24f   :  { %7583 = vmatpush3.bf16.msra.mxu0 %v8859_v31  ;;  %7605 = vmatpush3.bf16.msra.mxu1 %v8861_v13  ;;  %v8912_v31 = vld [vmem:[%s11700_s1 + $0xdd0] ss:$20 sps:$4 sm:$0xff]  }
 0x250   :  { %7584 = vmatprep.subr.bf16.mxu0 %v8862_v14  ;;  %7606 = vmatprep.subr.bf16.mxu1 %v8864_v15  ;;  %v8911_v13 = vld [vmem:[%s11700_s1 + $0xa10] ss:$20 sps:$4 sm:$0xff]   ;;  %v8914_v15 = vld [vmem:[%s11700_s1 + $0xb78] ss:$20 sps:$4 sm:$0xff]  }
 0x251   :  { %v8913_v14 = vld [vmem:[%s11700_s1 + $0xc90] ss:$20 sps:$4 sm:$0xff]  }
 0x253   :  { %7585 = vmatpush3.bf16.msra.mxu0 %v8863_v18  ;;  %7607 = vmatpush3.bf16.msra.mxu1 %v8865_v19  ;;  %v8916_v18 = vld [vmem:[%s11700_s1 + $0xdf8] ss:$20 sps:$4 sm:$0xff]  }
 0x254   :  { %7586 = vmatprep.subr.bf16.mxu0 %v8866_v22  ;;  %7608 = vmatprep.subr.bf16.mxu1 %v8868_v23  ;;  %v8915_v19 = vld [vmem:[%s11700_s1 + $0xa38] ss:$20 sps:$4 sm:$0xff]   ;;  %v8918_v23 = vld [vmem:[%s11700_s1 + $0xba0] ss:$20 sps:$4 sm:$0xff]  }
 0x255   :  { %v8917_v22 = vld [vmem:[%s11700_s1 + $0xcb8] ss:$20 sps:$4 sm:$0xff]  }
 0x257   :  { %7587 = vmatpush3.bf16.msra.mxu0 %v8867_v25  ;;  %7609 = vmatpush3.bf16.msra.mxu1 %v8869_v27  ;;  %v8921_v25 = vld [vmem:[%s11700_s1 + $0xce0] ss:$20 sps:$4 sm:$0xff]   ;;  %v8922_v27 = vld [vmem:[%s11700_s1 + $0xbc8] ss:$20 sps:$4 sm:$0xff]  }
 0x258   :  { %7588 = vmatprep.subr.bf16.mxu0 %v8870_v34  ;;  %7610 = vmatprep.subr.bf16.mxu1 %v8872_v37  ;;  %v8925_v34 = vld [vmem:[%s11700_s1 + $0xd08] ss:$20 sps:$4 sm:$0xff]   ;;  %v8926_v37 = vld [vmem:[%s11700_s1 + $0xbf0] ss:$20 sps:$4 sm:$0xff]  }
 0x25b   :  { %7589 = vmatpush3.bf16.msra.mxu0 %v8871_v39  ;;  %7611 = vmatpush3.bf16.msra.mxu1 %v8873_v40  ;;  %v8928_v39 = vld [vmem:[%s11700_s1 + $0xe70] ss:$20 sps:$4 sm:$0xff]  }
 0x25c   :  { %7590 = vmatprep.subr.bf16.mxu0 %v8874_v41  ;;  %7612 = vmatprep.subr.bf16.mxu1 %v8876_v42  ;;  %v8927_v40 = vld [vmem:[%s11700_s1 + $0xab0] ss:$20 sps:$4 sm:$0xff]   ;;  %v8930_v42 = vld [vmem:[%s11700_s1 + $0xc18] ss:$20 sps:$4 sm:$0xff]  }
 0x25d   :  { %v8929_v41 = vld [vmem:[%s11700_s1 + $0xd30] ss:$20 sps:$4 sm:$0xff]  }
 0x25f   :  { %7591 = vmatpush3.bf16.msra.mxu0 %v8875_v43  ;;  %7613 = vmatpush3.bf16.msra.mxu1 %v8877_v44  ;;  %v8932_v43 = vld [vmem:[%s11700_s1 + $0xe98] ss:$20 sps:$4 sm:$0xff]  }
 0x260   :  { %7620 = vmatprep.subr.bf16.mxu0 %v8878_v45  ;;  %7642 = vmatprep.subr.bf16.mxu1 %v8880_v47  ;;  %v8931_v44 = vld [vmem:[%s11700_s1 + $0xad8] ss:$20 sps:$4 sm:$0xff]   ;;  %v8934_v47 = vld [vmem:[%s11700_s1 + $0xc40] ss:$20 sps:$4 sm:$0xff]  }
 0x261   :  { %v8933_v45 = vld [vmem:[%s11700_s1 + $0xd58] ss:$20 sps:$4 sm:$0xff]  }
 0x262   :  { %5874 = vmatmul.mubr.bf16.vlgmr.msra.gmra.mrb[4].mxu0 %v9337_v26  ;;  %5915 = vmatmul.mubr.bf16.vlgmr.msra.gmra.mrb[4].mxu1 %v9309_v17  ;;  %v8888_v26 = vld [vmem:[%s11700_s1 + $0x920] ss:$20 sps:$4 sm:$0xff]  }
 0x263   :  { %7621 = vmatpush3.bf16.msra.mxu0 %v8879_v48  ;;  %7643 = vmatpush3.bf16.msra.mxu1 %v8881_v49  ;;  %v8887_v17 = vld [vmem:[%s11700_s1 + $0x560] ss:$20 sps:$4 sm:$0xff]  }
 0x264   :  { %7622 = vmatprep.subr.bf16.mxu0 %v8882_v51  ;;  %7644 = vmatprep.subr.bf16.mxu1 %v8884_v52  ;;  %v8936_v48 = vld [vmem:[%s11700_s1 + $0xec0] ss:$20 sps:$4 sm:$0xff]   ;;  %v8938_v52 = vld [vmem:[%s11700_s1 + $0xc68] ss:$20 sps:$4 sm:$0xff]  }
 0x265   :  { %5955 = vmatprep.mubr.bf16.mxu0 %v9614_v3  ;;  %5996 = vmatprep.mubr.bf16.mxu1 %v9787_v0  ;;  %v8892_v3 = vld [vmem:[%s11700_s1 + $0x948] ss:$20 sps:$4 sm:$0xff]   ;;  %v8935_v49 = vld [vmem:[%s11700_s1 + $0xb00] ss:$20 sps:$4 sm:$0xff]  }
 0x266   :  { %v8891_v0 = vld [vmem:[%s11700_s1 + $0x588] ss:$20 sps:$4 sm:$0xff]   ;;  %v8937_v51 = vld [vmem:[%s11700_s1 + $0xd80] ss:$20 sps:$4 sm:$0xff]  }
 0x267   :  { %7623 = vmatpush3.bf16.msra.mxu0 %v8883_v53  ;;  %7645 = vmatpush3.bf16.msra.mxu1 %v8885_v29  ;;  %v8940_v53 = vld [vmem:[%s11700_s1 + $0xee8] ss:$20 sps:$4 sm:$0xff]  }
 0x268   :  { %7624 = vmatprep.subr.bf16.mxu0 %v8886_v55  ;;  %7646 = vmatprep.subr.bf16.mxu1 %v8888_v26  ;;  %v8939_v29 = vld [vmem:[%s11700_s1 + $0xb28] ss:$20 sps:$4 sm:$0xff]   ;;  %v8942_v26 = vld [vmem:[%s11700_s1 + $0x1050] ss:$20 sps:$4 sm:$0xff]  }
 0x269   :  { %v8941_v55 = vld [vmem:[%s11700_s1 + $0xda8] ss:$20 sps:$4 sm:$0xff]  }
 0x26b   :  { %7625 = vmatpush3.bf16.msra.mxu0 %v8887_v17  ;;  %7647 = vmatpush3.bf16.msra.mxu1 %v8889_v20  ;;  %v8944_v17 = vld [vmem:[%s11700_s1 + $0x12d0] ss:$20 sps:$4 sm:$0xff]  }
 0x26c   :  { %7626 = vmatprep.subr.bf16.mxu0 %v8890_v6  ;;  %7648 = vmatprep.subr.bf16.mxu1 %v8892_v3  ;;  %v8943_v20 = vld [vmem:[%s11700_s1 + $0xf10] ss:$20 sps:$4 sm:$0xff]   ;;  %v8946_v3 = vld [vmem:[%s11700_s1 + $0x1078] ss:$20 sps:$4 sm:$0xff]  }
 0x26d   :  { %v8945_v6 = vld [vmem:[%s11700_s1 + $0x1190] ss:$20 sps:$4 sm:$0xff]  }
 0x26f   :  { %7627 = vmatpush3.bf16.msra.mxu0 %v8891_v0  ;;  %7649 = vmatpush3.bf16.msra.mxu1 %v8893_v7  ;;  %v8948_v0 = vld [vmem:[%s11700_s1 + $0x12f8] ss:$20 sps:$4 sm:$0xff]  }
 0x270   :  { %7628 = vmatprep.subr.bf16.mxu0 %v8894_v60  ;;  %7650 = vmatprep.subr.bf16.mxu1 %v8896_v61  ;;  %v8947_v7 = vld [vmem:[%s11700_s1 + $0xf38] ss:$20 sps:$4 sm:$0xff]   ;;  %v8950_v61 = vld [vmem:[%s11700_s1 + $0x10a0] ss:$20 sps:$4 sm:$0xff]  }
 0x271   :  { %v8949_v60 = vld [vmem:[%s11700_s1 + $0x11b8] ss:$20 sps:$4 sm:$0xff]  }
 0x273   :  { %7629 = vmatpush3.bf16.msra.mxu0 %v8895_v21  ;;  %7651 = vmatpush3.bf16.msra.mxu1 %v8897_v56  ;;  %v8953_v21 = vld [vmem:[%s11700_s1 + $0x11e0] ss:$20 sps:$4 sm:$0xff]   ;;  %v8954_v56 = vld [vmem:[%s11700_s1 + $0x10c8] ss:$20 sps:$4 sm:$0xff]  }
 0x274   :  { %7630 = vmatprep.subr.bf16.mxu0 %v8898_v54  ;;  %7652 = vmatprep.subr.bf16.mxu1 %v8900_v58  ;;  %v8957_v54 = vld [vmem:[%s11700_s1 + $0x1208] ss:$20 sps:$4 sm:$0xff]   ;;  %v8958_v58 = vld [vmem:[%s11700_s1 + $0x10f0] ss:$20 sps:$4 sm:$0xff]  }
 0x277   :  { %7631 = vmatpush3.bf16.msra.mxu0 %v8899_v59  ;;  %7653 = vmatpush3.bf16.msra.mxu1 %v8901_v1  ;;  %v8960_v59 = vld [vmem:[%s11700_s1 + $0x1370] ss:$20 sps:$4 sm:$0xff]  }
 0x278   :  { %7632 = vmatprep.subr.bf16.mxu0 %v8902_v2  ;;  %7654 = vmatprep.subr.bf16.mxu1 %v8904_v4  ;;  %v8959_v1 = vld [vmem:[%s11700_s1 + $0xfb0] ss:$20 sps:$4 sm:$0xff]   ;;  %v8962_v4 = vld [vmem:[%s11700_s1 + $0x1118] ss:$20 sps:$4 sm:$0xff]  }
 0x279   :  { %v8961_v2 = vld [vmem:[%s11700_s1 + $0x1230] ss:$20 sps:$4 sm:$0xff]  }
 0x27b   :  { %7633 = vmatpush3.bf16.msra.mxu0 %v8903_v63  ;;  %7655 = vmatpush3.bf16.msra.mxu1 %v8905_v8  ;;  %v8964_v63 = vld [vmem:[%s11700_s1 + $0x1398] ss:$20 sps:$4 sm:$0xff]  }
 0x27c   :  { %7634 = vmatprep.subr.bf16.mxu0 %v8906_v9  ;;  %7656 = vmatprep.subr.bf16.mxu1 %v8908_v10  ;;  %v8963_v8 = vld [vmem:[%s11700_s1 + $0xfd8] ss:$20 sps:$4 sm:$0xff]   ;;  %v8966_v10 = vld [vmem:[%s11700_s1 + $0x1140] ss:$20 sps:$4 sm:$0xff]  }
 0x27d   :  { %v8965_v9 = vld [vmem:[%s11700_s1 + $0x1258] ss:$20 sps:$4 sm:$0xff]  }
 0x27f   :  { %7635 = vmatpush3.bf16.msra.mxu0 %v8907_v11  ;;  %7657 = vmatpush3.bf16.msra.mxu1 %v8909_v12  ;;  %v8968_v11 = vld [vmem:[%s11700_s1 + $0x13c0] ss:$20 sps:$4 sm:$0xff]  }
 0x280   :  { %7664 = vmatprep.subr.bf16.mxu0 %v8910_v16  ;;  %7686 = vmatprep.subr.bf16.mxu1 %v8912_v31  ;;  %v8967_v12 = vld [vmem:[%s11700_s1 + $0x1000] ss:$20 sps:$4 sm:$0xff]   ;;  %v8970_v31 = vld [vmem:[%s11700_s1 + $0x1168] ss:$20 sps:$4 sm:$0xff]  }
 0x281   :  { %v8969_v16 = vld [vmem:[%s11700_s1 + $0x1280] ss:$20 sps:$4 sm:$0xff]  }
 0x282   :  { %5956 = vmatmul.mubr.bf16.vlgmr.msra.gmra.mrb[8].mxu0 %v9771_v62  ;;  %5997 = vmatmul.mubr.bf16.vlgmr.msra.gmra.mrb[8].mxu1 %v9621_v5  ;;  %v8920_v62 = vld [vmem:[%s11700_s1 + $0xe20] ss:$20 sps:$4 sm:$0xff]  }
 0x283   :  { %7665 = vmatpush3.bf16.msra.mxu0 %v8911_v13  ;;  %7687 = vmatpush3.bf16.msra.mxu1 %v8913_v14  ;;  %v8919_v5 = vld [vmem:[%s11700_s1 + $0xa60] ss:$20 sps:$4 sm:$0xff]   ;;  %v8972_v13 = vld [vmem:[%s11700_s1 + $0x13e8] ss:$20 sps:$4 sm:$0xff]  }
 0x284   :  { %7666 = vmatprep.subr.bf16.mxu0 %v8914_v15  ;;  %7688 = vmatprep.subr.bf16.mxu1 %v8916_v18  ;;  %v8971_v14 = vld [vmem:[%s11700_s1 + $0x1028] ss:$20 sps:$4 sm:$0xff]   ;;  %v8974_v18 = vld [vmem:[%s11700_s1 + $0x1550] ss:$20 sps:$4 sm:$0xff]  }
 0x285   :  { %6037 = vmatprep.mubr.bf16.mxu0 %v10011_v35  ;;  %6078 = vmatprep.mubr.bf16.mxu1 %v10006_v33  ;;  %v8924_v33 = vld [vmem:[%s11700_s1 + $0xe48] ss:$20 sps:$4 sm:$0xff]  }
 0x286   :  { %v8923_v35 = vld [vmem:[%s11700_s1 + $0xa88] ss:$20 sps:$4 sm:$0xff]  }
 0x287   :  { %7667 = vmatpush3.bf16.msra.mxu0 %v8915_v19  ;;  %7689 = vmatpush3.bf16.msra.mxu1 %v8917_v22  ;;  %v8973_v15 = vld [vmem:[%s11700_s1 + $0x12a8] ss:$20 sps:$4 sm:$0xff]   ;;  %v8990_v19 = vld [vmem:[%s11702_s3 + $0x40] sm:$0xff]  }
 0x288   :  { %7668 = vmatprep.subr.bf16.mxu0 %v8918_v23  ;;  %7690 = vmatprep.subr.bf16.mxu1 %v8920_v62  ;;  %v8975_v22 = vld [vmem:[%s11700_s1 + $0x1410] ss:$20 sps:$4 sm:$0xff]   ;;  %v8976_v23 = vld [vmem:[%s11700_s1 + $0x1578] ss:$20 sps:$4 sm:$0xff]  }
 0x289   :  { %v8992_v62 = vld [vmem:[%s11702_s3] sm:$0xff]  }
 0x28b   :  { %7669 = vmatpush3.bf16.msra.mxu0 %v8919_v5  ;;  %7691 = vmatpush3.bf16.msra.mxu1 %v8921_v25  ;;  %v8994_v5 = vld [vmem:[%s11702_s3 + $0x48] sm:$0xff]  }
 0x28c   :  { %7670 = vmatprep.subr.bf16.mxu0 %v8922_v27  ;;  %7692 = vmatprep.subr.bf16.mxu1 %v8924_v33  ;;  %v8977_v25 = vld [vmem:[%s11700_s1 + $0x1438] ss:$20 sps:$4 sm:$0xff]   ;;  %v8978_v27 = vld [vmem:[%s11700_s1 + $0x15a0] ss:$20 sps:$4 sm:$0xff]  }
 0x28d   :  { %v8979_v33 = vld [vmem:[%s11700_s1 + $0x1460] ss:$20 sps:$4 sm:$0xff]  }
 0x28f   :  { %7671 = vmatpush3.bf16.msra.mxu0 %v8923_v35  ;;  %7693 = vmatpush3.bf16.msra.mxu1 %v8925_v34  ;;  %v9000_v35 = vld [vmem:[%s11702_s3 + $0x10] sm:$0xff]   ;;  %v9002_v34 = vld [vmem:[%s11702_s3 + $0x58] sm:$0xff]  }
 0x290   :  { %7672 = vmatprep.subr.bf16.mxu0 %v8926_v37  ;;  %7694 = vmatprep.subr.bf16.mxu1 %v8928_v39  ;;  %v8981_v37 = vld [vmem:[%s11700_s1 + $0x1488] ss:$20 sps:$4 sm:$0xff]   ;;  %v8982_v39 = vld [vmem:[%s11700_s1 + $0x15f0] ss:$20 sps:$4 sm:$0xff]  }
 0x293   :  { %7673 = vmatpush3.bf16.msra.mxu0 %v8927_v40  ;;  %7695 = vmatpush3.bf16.msra.mxu1 %v8929_v41  ;;  %v9004_v40 = vld [vmem:[%s11702_s3 + $0x18] sm:$0xff]   ;;  %v9006_v41 = vld [vmem:[%s11702_s3 + $0x60] sm:$0xff]  }
 0x294   :  { %7674 = vmatprep.subr.bf16.mxu0 %v8930_v42  ;;  %7696 = vmatprep.subr.bf16.mxu1 %v8932_v43  ;;  %v8983_v42 = vld [vmem:[%s11700_s1 + $0x14b0] ss:$20 sps:$4 sm:$0xff]   ;;  %v8984_v43 = vld [vmem:[%s11700_s1 + $0x1618] ss:$20 sps:$4 sm:$0xff]  }
 0x297   :  { %7675 = vmatpush3.bf16.msra.mxu0 %v8931_v44  ;;  %7697 = vmatpush3.bf16.msra.mxu1 %v8933_v45  ;;  %v9008_v44 = vld [vmem:[%s11702_s3 + $0x20] sm:$0xff]   ;;  %v9010_v45 = vld [vmem:[%s11702_s3 + $0x68] sm:$0xff]  }
 0x298   :  { %7676 = vmatprep.subr.bf16.mxu0 %v8934_v47  ;;  %7698 = vmatprep.subr.bf16.mxu1 %v8936_v48  ;;  %v8985_v47 = vld [vmem:[%s11700_s1 + $0x14d8] ss:$20 sps:$4 sm:$0xff]   ;;  %v8986_v48 = vld [vmem:[%s11700_s1 + $0x1640] ss:$20 sps:$4 sm:$0xff]  }
 0x29b   :  { %7677 = vmatpush3.bf16.msra.mxu0 %v8935_v49  ;;  %7699 = vmatpush3.bf16.msra.mxu1 %v8937_v51  ;;  %v9012_v49 = vld [vmem:[%s11702_s3 + $0x28] sm:$0xff]   ;;  %v9014_v51 = vld [vmem:[%s11702_s3 + $0x70] sm:$0xff]  }
 0x29c   :  { %7678 = vmatprep.subr.bf16.mxu0 %v8938_v52  ;;  %7700 = vmatprep.subr.bf16.mxu1 %v8940_v53  ;;  %v8987_v52 = vld [vmem:[%s11700_s1 + $0x1500] ss:$20 sps:$4 sm:$0xff]   ;;  %v8988_v53 = vld [vmem:[%s11700_s1 + $0x1668] ss:$20 sps:$4 sm:$0xff]  }
 0x29f   :  { %7679 = vmatpush3.bf16.msra.mxu0 %v8939_v29  ;;  %7701 = vmatpush3.bf16.msra.mxu1 %v8941_v55  ;;  %v9016_v29 = vld [vmem:[%s11702_s3 + $0x30] sm:$0xff]   ;;  %v9018_v55 = vld [vmem:[%s11702_s3 + $0x78] sm:$0xff]  }
 0x2a0   :  { %7708 = vmatprep.subr.bf16.mxu0 %v8942_v26  ;;  %7730 = vmatprep.subr.bf16.mxu1 %v8944_v17  ;;  %v8989_v26 = vld [vmem:[%s11700_s1 + $0x1528] ss:$20 sps:$4 sm:$0xff]   ;;  %v8991_v17 = vld [vmem:[%s11702_s3 + $0xc0] sm:$0xff]  }
 0x2a2   :  { %6038 = vmatmul.mubr.bf16.vlgmr.msra.gmra.mrb[12].mxu0 %v10206_v50  ;;  %6079 = vmatmul.mubr.bf16.vlgmr.msra.gmra.mrb[12].mxu1 %v10015_v36  ;;  %v8952_v50 = vld [vmem:[%s11700_s1 + $0x1320] ss:$20 sps:$4 sm:$0xff]  }
 0x2a3   :  { %7709 = vmatpush3.bf16.msra.mxu0 %v8943_v20  ;;  %7731 = vmatpush3.bf16.msra.mxu1 %v8945_v6  ;;  %v8951_v36 = vld [vmem:[%s11700_s1 + $0xf60] ss:$20 sps:$4 sm:$0xff]   ;;  %v9020_v20 = vld [vmem:[%s11702_s3 + $0x38] sm:$0xff]  }
 0x2a4   :  { %7710 = vmatprep.subr.bf16.mxu0 %v8946_v3  ;;  %7732 = vmatprep.subr.bf16.mxu1 %v8948_v0  ;;  %v8993_v6 = vld [vmem:[%s11702_s3 + $0x80] sm:$0xff]   ;;  %v8995_v3 = vld [vmem:[%s11702_s3 + $0xc8] sm:$0xff]  }
 0x2a5   :  { %6119 = vmatprep.mubr.bf16.mxu0 %v10442_v30  ;;  %6160 = vmatprep.mubr.bf16.mxu1 %v10434_v24  ;;  %v8956_v24 = vld [vmem:[%s11700_s1 + $0x1348] ss:$20 sps:$4 sm:$0xff]  }
 0x2a6   :  { %v8955_v30 = vld [vmem:[%s11700_s1 + $0xf88] ss:$20 sps:$4 sm:$0xff]  }
 0x2a7   :  { %7711 = vmatpush3.bf16.msra.mxu0 %v8947_v7  ;;  %7733 = vmatpush3.bf16.msra.mxu1 %v8949_v60  ;;  %v8997_v0 = vld [vmem:[%s11702_s3 + $0x88] sm:$0xff]   ;;  %v8999_v7 = vld [vmem:[%s11702_s3 + $0xd0] sm:$0xff]  }
 0x2a8   :  { %7712 = vmatprep.subr.bf16.mxu0 %v8950_v61  ;;  %7734 = vmatprep.subr.bf16.mxu1 %v8952_v50  ;;  %v9001_v60 = vld [vmem:[%s11702_s3 + $0x90] sm:$0xff]   ;;  %v9005_v61 = vld [vmem:[%s11702_s3 + $0x98] sm:$0xff]   ;;  %v9007_v50 = vld [vmem:[%s11702_s3 + $0xe0] sm:$0xff]  }
 0x2ab   :  { %7713 = vmatpush3.bf16.msra.mxu0 %v8951_v36  ;;  %7735 = vmatpush3.bf16.msra.mxu1 %v8953_v21  ;;  %v9009_v36 = vld [vmem:[%s11702_s3 + $0xa0] sm:$0xff]   ;;  %v9011_v21 = vld [vmem:[%s11702_s3 + $0xe8] sm:$0xff]  }
 0x2ac   :  { %7714 = vmatprep.subr.bf16.mxu0 %v8954_v56  ;;  %7736 = vmatprep.subr.bf16.mxu1 %v8956_v24  ;;  %v9013_v56 = vld [vmem:[%s11702_s3 + $0xa8] sm:$0xff]   ;;  %v9015_v24 = vld [vmem:[%s11702_s3 + $0xf0] sm:$0xff]  }
 0x2af   :  { %7715 = vmatpush3.bf16.msra.mxu0 %v8955_v30  ;;  %7737 = vmatpush3.bf16.msra.mxu1 %v8957_v54  ;;  %v9017_v30 = vld [vmem:[%s11702_s3 + $0xb0] sm:$0xff]   ;;  %v9019_v54 = vld [vmem:[%s11702_s3 + $0xf8] sm:$0xff]  }
 0x2b0   :  { %7716 = vmatprep.subr.bf16.mxu0 %v8958_v58  ;;  %7738 = vmatprep.subr.bf16.mxu1 %v8960_v59  ;;  %v9021_v58 = vld [vmem:[%s11702_s3 + $0xb8] sm:$0xff]   ;;  %v920_v59 = vsub.s32 0, %v9237_v46 }
 0x2b3   :  { %7717 = vmatpush3.bf16.msra.mxu0 %v8959_v1  ;;  %7739 = vmatpush3.bf16.msra.mxu1 %v8961_v2  ;;  %v916_v1 = vld [vmem:[%s11701_s2] sm:$0x1f]  ;;  %v928_v2 = vsub.s32 2, %v9237_v46 }
 0x2b4   :  { %7718 = vmatprep.subr.bf16.mxu0 %v8962_v4  ;;  %7740 = vmatprep.subr.bf16.mxu1 %v8964_v63  ;;  %v924_v4 = vsub.s32 1, %v9237_v46  ;;  %v932_v63 = vsub.s32 3, %v9237_v46 }
 0x2b7   :  { %7719 = vmatpush3.bf16.msra.mxu0 %v8963_v8  ;;  %7741 = vmatpush3.bf16.msra.mxu1 %v8965_v9  ;;  %v921_v8 = vrot.slane %v916_v1, %v920_v59 }
 0x2b8   :  { %7720 = vmatprep.subr.bf16.mxu0 %v8966_v10  ;;  %7742 = vmatprep.subr.bf16.mxu1 %v8968_v11  ;;  %v929_v10 = vrot.slane %v916_v1, %v928_v2  ;;  %v925_v11 = vrot.slane %v916_v1, %v924_v4 }
 0x2bb   :  { %7721 = vmatpush3.bf16.msra.mxu0 %v8967_v12  ;;  %7743 = vmatpush3.bf16.msra.mxu1 %v8969_v16 }
 0x2bc   :  { %7722 = vmatprep.subr.bf16.mxu0 %v8970_v31  ;;  %7744 = vmatprep.subr.bf16.mxu1 %v8972_v13  ;;  %v933_v31 = vrot.slane %v916_v1, %v932_v63 }
 0x2bf   :  { %7723 = vmatpush3.bf16.msra.mxu0 %v8971_v14  ;;  %7745 = vmatpush3.bf16.msra.mxu1 %v8973_v15 }
 0x2c0   :  { %7752 = vmatprep.subr.bf16.mxu0 %v8974_v18  ;;  %7774 = vmatprep.subr.bf16.mxu1 %v8990_v19 }
 0x2c2   :  { %6120 = vmatmul.mubr.bf16.vlgmr.msra.gmra.mrb[16].mxu0 %v10637_v28  ;;  %6161 = vmatmul.mubr.bf16.vlgmr.msra.gmra.mrb[16].mxu1 %v10446_v32  ;;  %v8996_v28 = vld [vmem:[%s11702_s3 + $0x8] sm:$0xff]   ;;  %v8998_v32 = vld [vmem:[%s11702_s3 + $0x50] sm:$0xff]  }
 0x2c3   :  { %7753 = vmatpush3.bf16.msra.mxu0 %v8975_v22  ;;  %6201 = vmatprep.mubr.bf16.mxu0 %v10871_v38  ;;  %v8980_v38 = vld [vmem:[%s11700_s1 + $0x15c8] ss:$20 sps:$4 sm:$0xff]  }
 0x2c4   :  { %7754 = vmatprep.subr.bf16.mxu0 %v8976_v23  ;;  %7775 = vmatpush3.bf16.msra.mxu1 %v8992_v62 }
 0x2c5   :  { %7776 = vmatprep.subr.bf16.mxu1 %v8994_v5 }
 0x2c7   :  { %7755 = vmatpush3.bf16.msra.mxu0 %v8977_v25 }
 0x2c8   :  { %7756 = vmatprep.subr.bf16.mxu0 %v8978_v27  ;;  %7777 = vmatpush3.bf16.msra.mxu1 %v8996_v28 }
 0x2c9   :  { %7778 = vmatprep.subr.bf16.mxu1 %v8998_v32 }
 0x2cb   :  { %7757 = vmatpush3.bf16.msra.mxu0 %v8979_v33 }
 0x2cc   :  { %7758 = vmatprep.subr.bf16.mxu0 %v8980_v38  ;;  %7779 = vmatpush3.bf16.msra.mxu1 %v9000_v35 }
 0x2cd   :  { %7780 = vmatprep.subr.bf16.mxu1 %v9002_v34 }
 0x2cf   :  { %7759 = vmatpush3.bf16.msra.mxu0 %v8981_v37  ;;  %v9022_v37 = vld [vmem:[%s11702_s3 + $0x100] sm:$0xff]  }
 0x2d0   :  { %7760 = vmatprep.subr.bf16.mxu0 %v8982_v39  ;;  %7781 = vmatpush3.bf16.msra.mxu1 %v9004_v40  ;;  %v9063_v39 = vmov 0.0   ;;  %v9023_v40 = vld [vmem:[%s11702_s3 + $0x108] sm:$0xff]  }
 0x2d1   :  { %7782 = vmatprep.subr.bf16.mxu1 %v9006_v41  ;;  %v9024_v41 = vld [vmem:[%s11702_s3 + $0x110] sm:$0xff]  }
 0x2d3   :  { %7761 = vmatpush3.bf16.msra.mxu0 %v8983_v42  ;;  %v9025_v42 = vld [vmem:[%s11702_s3 + $0x118] sm:$0xff]  }
 0x2d4   :  { %7762 = vmatprep.subr.bf16.mxu0 %v8984_v43  ;;  %7783 = vmatpush3.bf16.msra.mxu1 %v9008_v44  ;;  %v9026_v43 = vld [vmem:[%s11702_s3 + $0x120] sm:$0xff]   ;;  %v9027_v44 = vld [vmem:[%s11702_s3 + $0x128] sm:$0xff]  }
 0x2d5   :  { %7784 = vmatprep.subr.bf16.mxu1 %v9010_v45  ;;  %v936_v45 = vsub.s32 4, %v9237_v46 }
 0x2d7   :  { %7763 = vmatpush3.bf16.msra.mxu0 %v8985_v47 }
 0x2d8   :  { %7764 = vmatprep.subr.bf16.mxu0 %v8986_v48  ;;  %7785 = vmatpush3.bf16.msra.mxu1 %v9012_v49  ;;  %v937_v48 = vrot.slane %v916_v1, %v936_v45 }
 0x2d9   :  { %7786 = vmatprep.subr.bf16.mxu1 %v9014_v51 }
 0x2db   :  { %7765 = vmatpush3.bf16.msra.mxu0 %v8987_v52 }
 0x2dc   :  { %7766 = vmatprep.subr.bf16.mxu0 %v8988_v53  ;;  %7787 = vmatpush3.bf16.msra.mxu1 %v9016_v29 }
 0x2dd   :  { %7788 = vmatprep.subr.bf16.mxu1 %v9018_v55  ;;  %v9028_v55 = vld [vmem:[%s11702_s3 + $0x130] sm:$0xff]  }
 0x2df   :  { %7767 = vmatpush3.bf16.msra.mxu0 %v8989_v26 }
 0x2e0   :  { %7796 = vmatprep.subr.bf16.mxu0 %v8991_v17  ;;  %7789 = vmatpush3.bf16.msra.mxu1 %v9020_v20 }
 0x2e1   :  { %7836 = vmatprep.subr.bf16.mxu1 %v9063_v39 }
 0x2e2   :  { %6202 = vmatmul.mubr.bf16.vlgmr.msra.gmra.mrb[20].mxu0 %v11063_v57  ;;  %v9003_v57 = vld [vmem:[%s11702_s3 + $0xd8] sm:$0xff]  }
 0x2e3   :  { %7797 = vmatpush3.bf16.msra.mxu0 %v8993_v6 }
 0x2e4   :  { %7798 = vmatprep.subr.bf16.mxu0 %v8995_v3 }
 0x2e7   :  { %7799 = vmatpush3.bf16.msra.mxu0 %v8997_v0 }
 0x2e8   :  { %7800 = vmatprep.subr.bf16.mxu0 %v8999_v7 }
 0x2eb   :  { %7801 = vmatpush3.bf16.msra.mxu0 %v9001_v60 }
 0x2ec   :  { %7802 = vmatprep.subr.bf16.mxu0 %v9003_v57  ;;  %v9029_v57 = vld [vmem:[%s11702_s3 + $0x138] sm:$0xff]  }
 0x2ef   :  { %7803 = vmatpush3.bf16.msra.mxu0 %v9005_v61 }
 0x2f0   :  { %7804 = vmatprep.subr.bf16.mxu0 %v9007_v50 }
 0x2f3   :  { %7805 = vmatpush3.bf16.msra.mxu0 %v9009_v36 }
 0x2f4   :  { %7806 = vmatprep.subr.bf16.mxu0 %v9011_v21 }
 0x2f7   :  { %7807 = vmatpush3.bf16.msra.mxu0 %v9013_v56 }
 0x2f8   :  { %7808 = vmatprep.subr.bf16.mxu0 %v9015_v24 }
 0x2fb   :  { %7809 = vmatpush3.bf16.msra.mxu0 %v9017_v30 }
 0x2fc   :  { %7810 = vmatprep.subr.bf16.mxu0 %v9019_v54 }
 0x2ff   :  { %7811 = vmatpush3.bf16.msra.mxu0 %v9021_v58 }
 0x300   :  { %7856 = vmatprep.subr.bf16.mxu0 %v9063_v39 }
 0x315   :  { %v5445_v9 = vpop.f32.mrb[0].mxu0  ;;  %v5832_v12 = vpop.f32.mrb[0].mxu1 }
 0x316   :  { %v5447_v16 = vpop.f32.mrb[1].mxu0  ;;  %v5834_v13 = vpop.f32.mrb[1].mxu1  ;;  %v7876_v15 = vadd.f32 %v5445_v9, %v921_v8  ;;  %v7880_v23 = vadd.f32 %v5832_v12, %v929_v10 }
 0x317   :  { %v5449_v14 = vpop.f32.mrb[2].mxu0  ;;  %v5836_v19 = vpop.f32.mrb[2].mxu1  ;;  %v7877_v62 = vadd.f32 %v5447_v16, %v925_v11  ;;  %v7881_v28 = vadd.f32 %v5834_v13, %v933_v31 }
 0x318   :  { %v7878_v18 = vadd.f32 %v5449_v14, %v921_v8  ;;  %v5451_v22 = vpop.f32.mrb[3].mxu0  ;;  %v7882_v5 = vadd.f32 %v5836_v19, %v929_v10  ;;  %v5838_v27 = vpop.f32.mrb[3].mxu1 }
 0x319   :  { %v7879_v25 = vadd.f32 %v5451_v22, %v925_v11  ;;  %v7883_v33 = vadd.f32 %v5838_v27, %v933_v31 }
 0x31a   :  { %v6210_v32 = vpack.c.bf16 %v7878_v18, %v7876_v15  ;;  %v6212_v38 = vpack.c.bf16 %v7882_v5, %v7880_v23  ;;  %v9030_v15 = vld [vmem:[%s11704_s5] sm:$0xff]  }
 0x31b   :  { %v6211_v35 = vpack.c.bf16 %v7879_v25, %v7877_v62  ;;  %v6213_v34 = vpack.c.bf16 %v7883_v33, %v7881_v28  ;;  %v9031_v25 = vld [vmem:[%s11704_s5 + $0x8] sm:$0xff]  }
 0x31d   :  { %6584 = vmatprep.mubr.bf16.mxu1 %v6211_v35  ;;  %6625 = vmatprep.mubr.bf16.mxu0 %v6213_v34  ;;  %v9033_v35 = vld [vmem:[%s11704_s5 + $0x18] sm:$0xff]   ;;  %v9034_v34 = vld [vmem:[%s11704_s5 + $0x20] sm:$0xff]  }
 0x31e   :  { %6585 = vmatmul.mubr.bf16.vlgmr.msra.gmra.mrb[20].mxu1 %v6210_v32  ;;  %6626 = vmatmul.mubr.bf16.vlgmr.msra.gmra.mrb[24].mxu0 %v6212_v38  ;;  %v9032_v38 = vld [vmem:[%s11704_s5 + $0x10] sm:$0xff]  }
 0x31f   :  { %7837 = vmatpush3.bf16.msra.mxu1 %v9022_v37  ;;  %7852 = vmatprep.mubr.msk.bf16.mxu1 %vm9064_vm0, %v9063_v39  ;;  %v9035_v37 = vld [vmem:[%s11704_s5 + $0x28] sm:$0xff]  }
 0x320   :  { %7838 = vmatprep.subr.bf16.mxu1 %v9063_v39  ;;  %7872 = vmatprep.mubr.msk.bf16.mxu0 %vm9064_vm0, %v9063_v39 }
 0x321   :  { %7857 = vmatpush3.bf16.msra.mxu0 %v9030_v15 }
 0x322   :  { %7858 = vmatprep.subr.bf16.mxu0 %v9063_v39 }
 0x323   :  { %7839 = vmatpush3.bf16.msra.mxu1 %v9023_v40 }
 0x324   :  { %7840 = vmatprep.subr.bf16.mxu1 %v9063_v39 }
 0x325   :  { %7859 = vmatpush3.bf16.msra.mxu0 %v9031_v25 }
 0x326   :  { %7860 = vmatprep.subr.bf16.mxu0 %v9063_v39 }
 0x327   :  { %7841 = vmatpush3.bf16.msra.mxu1 %v9024_v41 }
 0x328   :  { %7842 = vmatprep.subr.bf16.mxu1 %v9063_v39 }
 0x329   :  { %7861 = vmatpush3.bf16.msra.mxu0 %v9032_v38 }
 0x32a   :  { %7862 = vmatprep.subr.bf16.mxu0 %v9063_v39 }
 0x32b   :  { %7843 = vmatpush3.bf16.msra.mxu1 %v9025_v42 }
 0x32c   :  { %7844 = vmatprep.subr.bf16.mxu1 %v9063_v39 }
 0x32d   :  { %7863 = vmatpush3.bf16.msra.mxu0 %v9033_v35 }
 0x32e   :  { %7864 = vmatprep.subr.bf16.mxu0 %v9063_v39 }
 0x32f   :  { %7845 = vmatpush3.bf16.msra.mxu1 %v9026_v43 }
 0x330   :  { %7846 = vmatprep.subr.bf16.mxu1 %v9063_v39 }
 0x331   :  { %7865 = vmatpush3.bf16.msra.mxu0 %v9034_v34 }
 0x332   :  { %7866 = vmatprep.subr.bf16.mxu0 %v9063_v39 }
 0x333   :  { %7847 = vmatpush3.bf16.msra.mxu1 %v9027_v44 }
 0x334   :  { %7848 = vmatprep.subr.bf16.mxu1 %v9063_v39 }
 0x335   :  { %v7592_v47 = vpop.f32.mrb[4].mxu0  ;;  %v7614_v51 = vpop.f32.mrb[4].mxu1  ;;  %7867 = vmatpush3.bf16.msra.mxu0 %v9035_v37 }
 0x336   :  { %v7593_v49 = vpop.f32.mrb[5].mxu0  ;;  %v7615_v29 = vpop.f32.mrb[5].mxu1  ;;  %7868 = vmatprep.subr.bf16.mxu0 %v9063_v39 }
 0x337   :  { %v7594_v52 = vadd.f32 %v7593_v49, %v7592_v47  ;;  %v7595_v53 = vpop.f32.mrb[6].mxu0  ;;  %v7616_v17 = vadd.f32 %v7615_v29, %v7614_v51  ;;  %v7617_v20 = vpop.f32.mrb[6].mxu1  ;;  %7849 = vmatpush3.bf16.msra.mxu1 %v9028_v55 }
 0x338   :  { %v7596_v26 = vpop.f32.mrb[7].mxu0  ;;  %v7618_v3 = vpop.f32.mrb[7].mxu1  ;;  %7850 = vmatprep.subr.bf16.mxu1 %v9063_v39 }
 0x339   :  { %v5876_v46 = vadd.f32 %v7594_v52, %v937_v48  ;;  %v7597_v6 = vadd.f32 %v7596_v26, %v7595_v53  ;;  %v7619_v0 = vadd.f32 %v7618_v3, %v7617_v20 }
 0x33b   :  { %v5879_v7 = vadd.f32 %v7597_v6, %v937_v48  ;;  %v5917_v60 = vadd.f32 %v7616_v17, %v5876_v46  ;;  %7851 = vmatpush3.bf16.msra.mxu1 %v9029_v57 }
 0x33d   :  { %v5920_v61 = vadd.f32 %v7619_v0, %v5879_v7 }
 0x355   :  { %v7636_v50 = vpop.f32.mrb[8].mxu0  ;;  %v7658_v21 = vpop.f32.mrb[8].mxu1 }
 0x356   :  { %v7637_v36 = vpop.f32.mrb[9].mxu0  ;;  %v7659_v30 = vpop.f32.mrb[9].mxu1 }
 0x357   :  { %v7638_v56 = vadd.f32 %v7637_v36, %v7636_v50  ;;  %v7639_v24 = vpop.f32.mrb[10].mxu0  ;;  %v7660_v58 = vadd.f32 %v7659_v30, %v7658_v21  ;;  %v7661_v59 = vpop.f32.mrb[10].mxu1  ;;  %v7526_v21 = vld [vmem:[%s11703_s4] ss:$0 sm:$0xff] }
 0x358   :  { %v7640_v54 = vpop.f32.mrb[11].mxu0  ;;  %v7662_v4 = vpop.f32.mrb[11].mxu1 }
 0x359   :  { %v5958_v1 = vadd.f32 %v7638_v56, %v5917_v60  ;;  %v7641_v2 = vadd.f32 %v7640_v54, %v7639_v24  ;;  %v7663_v63 = vadd.f32 %v7662_v4, %v7661_v59 }
 0x35b   :  { %v5961_v8 = vadd.f32 %v7641_v2, %v5920_v61  ;;  %v5999_v9 = vadd.f32 %v7660_v58, %v5958_v1 }
 0x35d   :  { %v6002_v10 = vadd.f32 %v7663_v63, %v5961_v8 }
 0x375   :  { %v7680_v11 = vpop.f32.mrb[12].mxu0  ;;  %v7702_v16 = vpop.f32.mrb[12].mxu1 }
 0x376   :  { %v7681_v12 = vpop.f32.mrb[13].mxu0  ;;  %v7703_v14 = vpop.f32.mrb[13].mxu1 }
 0x377   :  { %v7682_v31 = vadd.f32 %v7681_v12, %v7680_v11  ;;  %v7683_v13 = vpop.f32.mrb[14].mxu0  ;;  %v7704_v19 = vadd.f32 %v7703_v14, %v7702_v16  ;;  %v7705_v22 = vpop.f32.mrb[14].mxu1  ;;  %v9036_v12 = vld [vmem:[%s11704_s5 + $0x30] sm:$0xff]   ;;  %v9037_v16 = vld [vmem:[%s11704_s5 + $0x38] sm:$0xff]  }
 0x378   :  { %v7684_v18 = vpop.f32.mrb[15].mxu0  ;;  %v7706_v5 = vpop.f32.mrb[15].mxu1  ;;  %7869 = vmatpush3.bf16.msra.mxu0 %v9036_v12 }
 0x379   :  { %v6040_v23 = vadd.f32 %v7682_v31, %v5999_v9  ;;  %v7685_v62 = vadd.f32 %v7684_v18, %v7683_v13  ;;  %v7707_v27 = vadd.f32 %v7706_v5, %v7705_v22  ;;  %7870 = vmatprep.subr.bf16.mxu0 %v9063_v39 }
 0x37b   :  { %v6043_v28 = vadd.f32 %v7685_v62, %v6002_v10  ;;  %v6081_v32 = vadd.f32 %v7704_v19, %v6040_v23  ;;  %v7567_v23 = vld [vmem:[%s11705_s6] ss:$0 sm:$0xff] }
 0x37c   :  { %7871 = vmatpush3.bf16.msra.mxu0 %v9037_v16 }
 0x37d   :  { %v6084_v33 = vadd.f32 %v7707_v27, %v6043_v28 }
 0x395   :  { %v7724_v40 = vpop.f32.mrb[16].mxu0  ;;  %v7746_v42 = vpop.f32.mrb[16].mxu1 }
 0x396   :  { %v7725_v41 = vpop.f32.mrb[17].mxu0  ;;  %v7747_v45 = vpop.f32.mrb[17].mxu1 }
 0x397   :  { %v7726_v43 = vadd.f32 %v7725_v41, %v7724_v40  ;;  %v7727_v44 = vpop.f32.mrb[18].mxu0  ;;  %v7748_v48 = vadd.f32 %v7747_v45, %v7746_v42  ;;  %v7749_v49 = vpop.f32.mrb[18].mxu1 }
 0x398   :  { %v7728_v47 = vpop.f32.mrb[19].mxu0  ;;  %v7750_v53 = vpop.f32.mrb[19].mxu1 }
 0x399   :  { %v6122_v51 = vadd.f32 %v7726_v43, %v6081_v32  ;;  %v7729_v52 = vadd.f32 %v7728_v47, %v7727_v44  ;;  %v7751_v29 = vadd.f32 %v7750_v53, %v7749_v49 }
 0x39b   :  { %v6125_v55 = vadd.f32 %v7729_v52, %v6084_v33  ;;  %v6163_v26 = vadd.f32 %v7748_v48, %v6122_v51 }
 0x39d   :  { %v6166_v17 = vadd.f32 %v7751_v29, %v6125_v55 }
 0x3b5   :  { %v7768_v20 = vpop.f32.mrb[20].mxu0 }
 0x3b6   :  { %v7769_v46 = vpop.f32.mrb[21].mxu0 }
 0x3b7   :  { %v7770_v6 = vadd.f32 %v7769_v46, %v7768_v20  ;;  %v7771_v3 = vpop.f32.mrb[22].mxu0 }
 0x3b8   :  { %v7772_v0 = vpop.f32.mrb[23].mxu0 }
 0x3b9   :  { %v6204_v7 = vadd.f32 %v7770_v6, %v6163_v26  ;;  %v7773_v60 = vadd.f32 %v7772_v0, %v7771_v3 }
 0x3bb   :  { %v6207_v57 = vadd.f32 %v7773_v60, %v6166_v17 }
 0x3bd   :  { %v6214_v61 = vpack.c.bf16 %v6207_v57, %v6204_v7 }
 0x3bf   :  { %7853 = vmatmul.mubr.bf16.vlgmr.msra.gmra.mrb[24].mxu1 %v6214_v61 }
 0x3f1   :  { %v7790_v50 = vpop.f32.mrb[20].mxu1  ;;  %v7812_v36 = vpop.f32.mrb[24].mxu0 }
 0x3f2   :  { %v7791_v56 = vpop.f32.mrb[21].mxu1  ;;  %v7813_v30 = vpop.f32.mrb[25].mxu0 }
 0x3f3   :  { %v7792_v24 = vadd.f32 %v7791_v56, %v7790_v50  ;;  %v7793_v54 = vpop.f32.mrb[22].mxu1  ;;  %v7814_v58 = vadd.f32 %v7813_v30, %v7812_v36  ;;  %v7815_v59 = vpop.f32.mrb[26].mxu0 }
 0x3f4   :  { %v7794_v1 = vpop.f32.mrb[23].mxu1  ;;  %v7816_v63 = vpop.f32.mrb[27].mxu0 }
 0x3f5   :  { %v6587_v2 = vadd.f32 %v7792_v24, %v7526_v21  ;;  %v7795_v4 = vadd.f32 %v7794_v1, %v7793_v54  ;;  %v7817_v8 = vadd.f32 %v7816_v63, %v7815_v59 }
 0x3f7   :  { %v6590_v9 = vadd.f32 %v7795_v4, %v7526_v21  ;;  %v6628_v10 = vadd.f32 %v7814_v58, %v6587_v2 }
 0x3f9   :  { %v6631_v11 = vadd.f32 %v7817_v8, %v6590_v9 }
 0x492   :  { %v6668_v31 = vpop.f32.mrb[24].mxu1 }
 0x493   :  { %v6669_v13 = vadd.f32 %v6668_v31, %v6628_v10  ;;  %v7854_v14 = vpop.f32.mrb[25].mxu1 }
 0x494   :  { %v6671_v15 = vpop.f32.mrb[26].mxu1 }
 0x495   :  { %v6672_v18 = vadd.f32 %v6671_v15, %v6631_v11  ;;  %v7855_v19 = vpop.f32.mrb[27].mxu1 }
 0x497   :  { %v6675_v22 = vpack.c.bf16 %v6672_v18, %v6669_v13 }
 0x499   :  { %7873 = vmatmul.mubr.bf16.vlgmr.msra.gmra.mrb[28].mxu0 %v6675_v22 }
 0x56c   :  { %v6781_v62 = vpop.f32.mrb[28].mxu0 }
 0x56d   :  { %v6782_v5 = vadd.f32 %v7567_v23, %v6781_v62  ;;  %v7874_v39 = vpop.f32.mrb[29].mxu0 }
 0x56e   :  { %v6784_v25 = vpop.f32.mrb[30].mxu0 }
 0x56f   :  { %6788 = vst [vmem:[#allocation3] sm:$0xff] %v6782_v5  ;;  %v6785_v27 = vadd.f32 %v7567_v23, %v6784_v25  ;;  %v7875_v28 = vpop.f32.mrb[31].mxu0 }
 0x571   :  { %6789 = vst [vmem:[#allocation3 + $0x8] sm:$0xff] %v6785_v27 }
 0x572   :  { %6794 = vsyncadd [#allocation4], 224  ;;  %s9065_s5 = smov [#allocation3]  }
 0x573   :  { %s6795_s13 = sshll.u32 %s9065_s5, 4  ;;  %s6796_s13 = int_to_ptr.vmem [resolvable:$true] %s6795_s13 }
 0x574   :  { %s9038_s14 = scalar_lea.vmem %s6796_s13, 32  ;;  %s9042_s15 = scalar_lea.vmem %s6796_s13, 256 }
 0x575   :  { %p9039_p0 = scmp.ne.s32.totalorder %s6796_s13, %s9038_s14  ;;  %p9043_p1 = scmp.lt.s32.totalorder %s6796_s13, %s6796_s13 }
 0x576   :  { %p9044_p2 = scmp.lt.s32.totalorder %s9042_s15, %s9038_s14 }
 0x578   :  { %p9045_p3 = por %p9044_p2, %p9043_p1 }
 0x57a   :  { %p9046_p4 = pnand %p9045_p3, %p9039_p0 }
 0x57c   :  { %9049 = shalt.err (!%p9046_p4)
}
 0x57d   :  { %s9050_s17 = scalar_lea.hbm %s11706_s7, 32 }
 0x57e   :  { %p9051_p5 = scmp.ne.s32.totalorder %s11706_s7, %s9050_s17  ;;  %p9054_p6 = scmp.lt.u32.totalorder %s9050_s17, %s11706_s7 }
 0x580   :  { %p9056_p7 = pnand %p9054_p6, %p9051_p5 }
 0x582   :  { %9059 = shalt.err (!%p9056_p7)
}
 0x583   :  { %s9066_s20 = smov 32   ;;  %s9067_s21 = smov 2  }
 0x584   :  { %6801 = dma.vmem_to_hbm [thread:$0]  %s6796_s13, 32, %s11706_s7, [#allocation4], %s9066_s20, %s9066_s20, %s9067_s21  }
 0x585   :  { %9060 = dma.done.wait [#allocation4], 256  }
 0x586   :  { %9061 = vsyncadd [#allocation4], 4294967040 }
 0x587   :  { %6805 = vsyncpa [#allocation4], 1 }

</bundles_post_ra>
